<compile_context>
chip_gen: v7x
topology: tpu7x:2x2x1
jax: 0.10.0
libtpu: 0.0.40
codegen_flags: <defaults>
</compile_context>

<pallas_src>
import functools

import numpy as np
import jax
import jax.numpy as jnp
from jax.experimental import pallas as pl
from jax.experimental.pallas import tpu as pltpu


def _gelu_tanh(x):
    # tanh-form GELU: the transcendental goes to the EUP (its own VLIW slot).
    c = 0.7978845608028654  # sqrt(2/pi)
    return 0.5 * x * (1.0 + jnp.tanh(c * (x + 0.044715 * x * x * x)))


# ---------------------------------------------------------------------------
# Kernel 1: per-batch-tile front-end + reversible blocks (batch-parallel grid)
# ---------------------------------------------------------------------------
def _rev_block_kernel(TP, OC, n_rev,
                      rgb_ref, s_ref, w0_ref, b0_ref, wf_ref, bf_ref,
                      xb_ref):
    s16 = s_ref[...]                                    # (9*TP, TP) bf16 (0/1)

    def rev_fn(x, idx):          # f / g of a ReversibleBlock, x: (TP, OC) f32
        # depthwise 3x3 (replicate pad): ONE small per-tile shift matmul makes
        # all 9 shifted copies, sublane-stacked (no relayout needed) ...
        y = jnp.dot(s16, x.astype(jnp.bfloat16),
                    preferred_element_type=jnp.float32)        # (9*TP, OC)
        y16 = y.astype(jnp.bfloat16)                           # exact (copies)
        # ... and the per-tap per-channel weighting is folded host-side into
        # the 1x1 pointwise weight, so tap weighting + pointwise conv run on
        # the MXU (slices start at multiples of TP -> sublane-tile aligned).
        acc = jnp.dot(y16[0:TP], wf_ref[9 * idx + 0],
                      preferred_element_type=jnp.float32)      # (TP, OC) f32
        for t in range(1, 9):                                  # static unroll
            acc = acc + jnp.dot(y16[t * TP:(t + 1) * TP], wf_ref[9 * idx + t],
                                preferred_element_type=jnp.float32)
        return _gelu_tanh(acc + bf_ref[idx])                   # (TP, OC) f32

    # folded from_rgb -> ch_conv -> repeat_interleave/chunk: ONE matmul
    rgb16 = rgb_ref[...].astype(jnp.bfloat16)                  # (TP, 3)
    x0 = (jnp.dot(rgb16, w0_ref[...],
                  preferred_element_type=jnp.float32) + b0_ref[...])  # (TP, 2*OC)
    x1 = x0[:, :OC]          # OC kept a multiple of 128 -> lane-aligned split
    x2 = x0[:, OC:]

    for l in range(n_rev):                                     # reversible seq
        y1 = x1 + rev_fn(x2, 2 * l)
        y2 = x2 + rev_fn(y1, 2 * l + 1)
        x1, x2 = y1, y2

    xb_ref[...] = (x1 + x2) * 0.5                              # (TP, OC) f32


# ---------------------------------------------------------------------------
# Kernel 2: cross-batch epilogue (minibatch std, AvgPool2d(4), judge MLP)
# ---------------------------------------------------------------------------
def _judge_kernel(xb_ref, w1a_ref, w1b_ref, b1_ref, w2_ref, b2_ref, out_ref):
    x = xb_ref[...]                                            # (B, P, OC) f32
    B = x.shape[0]

    # minibatch std over the batch dim (unbiased), mean -> (1, 1) scalar
    mu = jnp.mean(x, axis=0, keepdims=True)                    # (1, P, OC)
    var = jnp.sum((x - mu) ** 2, axis=0) * (1.0 / (B - 1))     # (P, OC)
    std = jnp.sqrt(var)
    mb = jnp.mean(jnp.mean(std, axis=1, keepdims=True),
                  axis=0, keepdims=True)                       # (1, 1)

    # AvgPool2d(4) + flatten == per-sample mean over the P pixels
    pooled = jnp.mean(x, axis=1)                               # (B, OC)

    # judge MLP: Linear(OC+1, 64) -> GELU -> Linear(64, 1)
    h = (jnp.dot(pooled, w1a_ref[...], preferred_element_type=jnp.float32)
         + mb * w1b_ref[...] + b1_ref[...])                    # (B, 64)
    h = _gelu_tanh(h)
    out_ref[...] = (jnp.dot(h, w2_ref[...],
                            preferred_element_type=jnp.float32)
                    + b2_ref[...])                             # (B, 1)


# ---------------------------------------------------------------------------
# Host-side helpers (glue)
# ---------------------------------------------------------------------------
def _shift_core(H, W):
    """(9, P, P) replicate-pad 3x3 tap shift operators for a single sample."""
    P = H * W
    S = np.zeros((9, P, P), dtype=np.float32)
    for kh in range(3):
        for kw in range(3):
            t = kh * 3 + kw
            for h in range(H):
                for w in range(W):
                    sh = min(max(h + kh - 1, 0), H - 1)
                    sw = min(max(w + kw - 1, 0), W - 1)
                    S[t, h * W + w, sh * W + sw] = 1.0
    return S


def _stacked_shift(H, W, bt):
    """(9*bt*P, bt*P) stacked shift operator for ONE batch tile of bt samples.

    bt is a (small, fixed) tile size, not the batch -- the full batch is
    handled by the parallel grid axis, so nothing here scales with B.
    """
    core = _shift_core(H, W)                                   # (9, P, P)
    P = H * W
    out = np.zeros((9 * bt * P, bt * P), dtype=np.float32)
    for t in range(9):
        for b in range(bt):
            out[(t * bt + b) * P:(t * bt + b + 1) * P,
                b * P:(b + 1) * P] = core[t]
    return jnp.asarray(out)


def _const_spec(shape):
    n = len(shape)
    return pl.BlockSpec(shape, lambda i, n=n: (0,) * n)


def init_params(key, ic, oc, n_rev_fns, hidden=64, scale=0.1):
    ks = jax.random.split(key, 12)
    n = lambda k, s: scale * jax.random.normal(k, s, dtype=jnp.float32)
    return dict(
        wfr=n(ks[0], (3, ic)),   bfr=n(ks[1], (ic,)),
        wc=n(ks[2], (ic, oc)),   bc=n(ks[3], (oc,)),
        kd=n(ks[4], (n_rev_fns, 9, oc)),  bdw=n(ks[5], (n_rev_fns, oc)),
        wpw=n(ks[6], (n_rev_fns, oc, oc)), bpw=n(ks[7], (n_rev_fns, oc)),
        w1=n(ks[8], (oc + 1, hidden)), b1=n(ks[9], (hidden,)),
        w2=n(ks[10], (hidden, 1)),     b2=n(ks[11], (1,)),
    )


def discriminator_forward(rgb_nchw, params, num_layers_per_block=2,
                          batch_tile=1):
    B, Cin, H, W = rgb_nchw.shape
    assert Cin == 3 and H == 4 and W == 4, "judge Linear(oc+1) forces 4x4 input"
    assert B >= 2, "minibatch std needs B >= 2"
    assert B % batch_tile == 0
    P = H * W
    TP = batch_tile * P
    oc = params['wc'].shape[1]
    assert oc % 2 == 0
    n_fns = params['kd'].shape[0]
    HIGH = jax.lax.Precision.HIGHEST

    # NCHW -> channels-last pixel slab (channels on the 128-lane dim).
    # NOTE: oc should be a multiple of 128 for lane-dense vregs (pad if not).
    rgb_flat = jnp.transpose(rgb_nchw, (0, 2, 3, 1)).reshape(B * P, Cin)

    # Per-batch-tile shift operator; bf16 is exact for its 0/1 entries.
    S_tile = _stacked_shift(H, W, batch_tile).astype(jnp.bfloat16)

    # Fold from_rgb -> ch_conv -> repeat_interleave(2)/chunk(2) into ONE
    # (3, 2*oc) weight + (2*oc,) bias (exact linear reassociation).
    idx1 = np.arange(oc) // 2
    idx2 = oc // 2 + np.arange(oc) // 2
    wc_cat = jnp.concatenate([params['wc'][:, idx1], params['wc'][:, idx2]],
                             axis=1)
    bc_cat = jnp.concatenate([params['bc'][idx1], params['bc'][idx2]], axis=0)
    w0 = jnp.dot(params['wfr'], wc_cat, precision=HIGH).astype(jnp.bfloat16)
    b0 = (jnp.dot(params['bfr'], wc_cat, precision=HIGH) + bc_cat)[None, :]

    # Fold the per-tap per-channel depthwise weights into the pointwise conv:
    #   W_fold[f, t] = diag(kd[f, t]) @ wpw[f]   -> (n_fns*9, oc, oc) bf16
    #   b_fold[f]    = bdw[f] @ wpw[f] + bpw[f]  -> (n_fns, 1, oc)   f32
    wf = (params['kd'][:, :, :, None] * params['wpw'][:, None, :, :]
          ).reshape(n_fns * 9, oc, oc).astype(jnp.bfloat16)
    bfold = (jnp.einsum('fc,fcd->fd', params['bdw'], params['wpw'],
                        precision=HIGH) + params['bpw'])[:, None, :]
    # TODO(synk): at production oc (512) stream the folded (9*oc, oc) weights
    # per rev-fn (extra grid axis / pl.Buffered(1)) instead of holding all
    # n_fns*9 blocks resident, and tune batch_tile > 1 so per-step MXU work
    # amortizes the ~0.35us grid-step overhead.

    # ---- call 1: batch-parallel rev-block compute -------------------------
    xb_flat = pl.pallas_call(
        functools.partial(_rev_block_kernel, TP, oc, num_layers_per_block),
        out_shape=jax.ShapeDtypeStruct((B * P, oc), jnp.float32),
        grid=(B // batch_tile,),
        in_specs=[
            pl.BlockSpec((TP, Cin), lambda i: (i, 0)),
            _const_spec(S_tile.shape),
            _const_spec(w0.shape),
            _const_spec(b0.shape),
            _const_spec(wf.shape),
            _const_spec(bfold.shape),
        ],
        out_specs=pl.BlockSpec((TP, oc), lambda i: (i, 0)),
        compiler_params=pltpu.CompilerParams(
            dimension_semantics=("parallel",),
            vmem_limit_bytes=32 * 1024 * 1024),
    )(rgb_flat, S_tile, w0, b0, wf, bfold)

    # ---- call 2: tiny cross-batch epilogue (std + pool + judge) -----------
    xb3 = xb_flat.reshape(B, P, oc)
    args2 = [xb3,
             params['w1'][:oc],                     # (oc, 64)
             params['w1'][oc:oc + 1],               # (1, 64)  (std feature row)
             params['b1'][None, :],                 # (1, 64)
             params['w2'],                          # (64, 1)
             params['b2'].reshape(1, 1)]            # (1, 1)
    out = pl.pallas_call(
        _judge_kernel,
        out_shape=jax.ShapeDtypeStruct((B, 1), jnp.float32),
        grid=(1,),
        in_specs=[_const_spec(a.shape) for a in args2],
        out_specs=pl.BlockSpec((B, 1), lambda i: (0, 0)),
        compiler_params=pltpu.CompilerParams(
            dimension_semantics=("arbitrary",),
            vmem_limit_bytes=32 * 1024 * 1024),
    )(*args2)
    return out


# ---------------------------------------------------------------------------
# Pure-JAX reference (mirrors the PyTorch NCHW forward exactly)
# ---------------------------------------------------------------------------
def reference_forward(rgb, p, num_layers_per_block=2):
    B, _, H, W = rgb.shape
    oc = p['wc'].shape[1]
    PREC = jax.lax.Precision.HIGHEST
    gelu = lambda v: jax.nn.gelu(v, approximate=False)

    def conv1x1(x, w, b):
        return jnp.einsum('bchw,cd->bdhw', x, w, precision=PREC) \
            + b[None, :, None, None]

    def dwconv(x, kd, bdw):
        xp = jnp.pad(x, ((0, 0), (0, 0), (1, 1), (1, 1)), mode='edge')
        out = jnp.zeros_like(x)
        for kh in range(3):
            for kw in range(3):
                out = out + xp[:, :, kh:kh + H, kw:kw + W] \
                    * kd[kh * 3 + kw][None, :, None, None]
        return out + bdw[None, :, None, None]

    x = conv1x1(rgb, p['wfr'], p['bfr'])           # from_rgb
    x = conv1x1(x, p['wc'], p['bc'])               # ch_conv
    x = jnp.repeat(x, 2, axis=1)                   # repeat_interleave(2, dim=1)
    x1, x2 = x[:, :oc], x[:, oc:]
    for l in range(num_layers_per_block):
        def fg(v, i):
            return gelu(conv1x1(dwconv(v, p['kd'][i], p['bdw'][i]),
                                p['wpw'][i], p['bpw'][i]))
        y1 = x1 + fg(x2, 2 * l)
        y2 = x2 + fg(y1, 2 * l + 1)
        x1, x2 = y1, y2
    x = (x1 + x2) / 2.0

    mb = jnp.mean(jnp.std(x, axis=0, ddof=1))                 # scalar
    pooled = jnp.mean(x, axis=(2, 3))                         # AvgPool2d(4)+flatten
    feat = jnp.concatenate([pooled, jnp.ones((B, 1), x.dtype) * mb], axis=1)
    h = gelu(jnp.dot(feat, p['w1'], precision=PREC) + p['b1'])
    return jnp.dot(h, p['w2'], precision=PREC) + p['b2']


# ---------------------------------------------------------------------------
if __name__ == "__main__":
    B, H, W = 2, 4, 4
    # Small stand-in for the default channels=[...,512,512]; only the last two
    # entries (ic, oc) are used by the single block created in __init__.
    # oc=128 keeps every activation slab lane-dense (128-lane vregs).
    channels = (32, 128)
    num_layers_per_block = 2
    ic, oc = channels[-2], channels[-1]

    key = jax.random.PRNGKey(0)
    kx, kp = jax.random.split(key)
    rgb = jax.random.normal(kx, (B, 3, H, W), dtype=jnp.float32)
    params = init_params(kp, ic, oc, 2 * num_layers_per_block)

    out = discriminator_forward(rgb, params, num_layers_per_block,
                                batch_tile=1)
    out = jax.block_until_ready(out)

    ref = reference_forward(rgb, params, num_layers_per_block)
    assert out.shape == (B, 1)
    assert bool(jnp.all(jnp.isfinite(out)))
    assert bool(jnp.allclose(out, ref, atol=5e-3, rtol=5e-2))

    print("KERNEL_OK")
</pallas_src>

<mosaic_0001>
module attributes {stable_mosaic.version = 11 : i64} {
  func.func @_rev_block_kernel(%arg0: i32, %arg1: memref<16x3xf32, #tpu.memory_space<vmem>>, %arg2: memref<144x16xbf16, #tpu.memory_space<vmem>>, %arg3: memref<3x256xbf16, #tpu.memory_space<vmem>>, %arg4: memref<1x256xf32, #tpu.memory_space<vmem>>, %arg5: memref<36x128x128xbf16, #tpu.memory_space<vmem>>, %arg6: memref<4x1x128xf32, #tpu.memory_space<vmem>>, %arg7: memref<16x128xf32, #tpu.memory_space<vmem>>) attributes {dimension_semantics = [#tpu.dimension_semantics<parallel>], iteration_bounds = array<i64: 2>, scalar_prefetch = 0 : i64, scratch_operands = 0 : i64, tpu.core_type = #tpu.core_type<tc>, window_params = [{transform_indices = @transform_0, window_bounds = array<i64: 16, 3>}, {pipeline_mode = #tpu.pipeline_mode<synchronous>, transform_indices = @transform_1, window_bounds = array<i64: 144, 16>}, {pipeline_mode = #tpu.pipeline_mode<synchronous>, transform_indices = @transform_2, window_bounds = array<i64: 3, 256>}, {pipeline_mode = #tpu.pipeline_mode<synchronous>, transform_indices = @transform_3, window_bounds = array<i64: 1, 256>}, {pipeline_mode = #tpu.pipeline_mode<synchronous>, transform_indices = @transform_4, window_bounds = array<i64: 36, 128, 128>}, {pipeline_mode = #tpu.pipeline_mode<synchronous>, transform_indices = @transform_5, window_bounds = array<i64: 4, 1, 128>}, {transform_indices = @transform_6, window_bounds = array<i64: 16, 128>}]} {
    %c0 = arith.constant 0 : index
    %c0_0 = arith.constant 0 : index
    %0 = vector.load %arg2[%c0, %c0_0] : memref<144x16xbf16, #tpu.memory_space<vmem>>, vector<144x16xbf16>
    %c0_1 = arith.constant 0 : index
    %c0_2 = arith.constant 0 : index
    %1 = vector.load %arg1[%c0_1, %c0_2] : memref<16x3xf32, #tpu.memory_space<vmem>>, vector<16x3xf32>
    %2 = arith.truncf %1 : vector<16x3xf32> to vector<16x3xbf16>
    %c0_3 = arith.constant 0 : index
    %c0_4 = arith.constant 0 : index
    %3 = vector.load %arg3[%c0_3, %c0_4] : memref<3x256xbf16, #tpu.memory_space<vmem>>, vector<3x256xbf16>
    %cst = arith.constant dense<0.000000e+00> : vector<16x256xf32>
    %4 = tpu.matmul %2, %3, %cst {dimension_numbers = #tpu.dot_dimension_numbers<[1], [0], [0], [1], [0, 0, 1, 1], [], []>} : vector<16x3xbf16>, vector<3x256xbf16>, vector<16x256xf32> -> vector<16x256xf32>
    %c0_5 = arith.constant 0 : index
    %c0_6 = arith.constant 0 : index
    %5 = vector.load %arg4[%c0_5, %c0_6] : memref<1x256xf32, #tpu.memory_space<vmem>>, vector<1x256xf32>
    %6 = vector.broadcast %5 : vector<1x256xf32> to vector<16x256xf32>
    %7 = arith.addf %4, %6 : vector<16x256xf32>
    %8 = vector.extract_strided_slice %7 {offsets = [0, 0], sizes = [16, 128], strides = [1, 1]} : vector<16x256xf32> to vector<16x128xf32>
    %9 = vector.extract_strided_slice %7 {offsets = [0, 128], sizes = [16, 128], strides = [1, 1]} : vector<16x256xf32> to vector<16x128xf32>
    %10 = arith.truncf %9 : vector<16x128xf32> to vector<16x128xbf16>
    %cst_7 = arith.constant dense<0.000000e+00> : vector<144x128xf32>
    %11 = tpu.matmul %0, %10, %cst_7 {dimension_numbers = #tpu.dot_dimension_numbers<[1], [0], [0], [1], [0, 0, 1, 1], [], []>} : vector<144x16xbf16>, vector<16x128xbf16>, vector<144x128xf32> -> vector<144x128xf32>
    %12 = arith.truncf %11 : vector<144x128xf32> to vector<144x128xbf16>
    %13 = vector.extract_strided_slice %12 {offsets = [0, 0], sizes = [16, 128], strides = [1, 1]} : vector<144x128xbf16> to vector<16x128xbf16>
    %c0_8 = arith.constant 0 : index
    %c0_9 = arith.constant 0 : index
    %c0_10 = arith.constant 0 : index
    %14 = vector.load %arg5[%c0_8, %c0_9, %c0_10] : memref<36x128x128xbf16, #tpu.memory_space<vmem>>, vector<1x128x128xbf16>
    %15 = vector.shape_cast %14 : vector<1x128x128xbf16> to vector<128x128xbf16>
    %cst_11 = arith.constant dense<0.000000e+00> : vector<16x128xf32>
    %16 = tpu.matmul %13, %15, %cst_11 {dimension_numbers = #tpu.dot_dimension_numbers<[1], [0], [0], [1], [0, 0, 1, 1], [], []>} : vector<16x128xbf16>, vector<128x128xbf16>, vector<16x128xf32> -> vector<16x128xf32>
    %17 = vector.extract_strided_slice %12 {offsets = [16, 0], sizes = [16, 128], strides = [1, 1]} : vector<144x128xbf16> to vector<16x128xbf16>
    %c1 = arith.constant 1 : index
    %c0_12 = arith.constant 0 : index
    %c0_13 = arith.constant 0 : index
    %18 = vector.load %arg5[%c1, %c0_12, %c0_13] : memref<36x128x128xbf16, #tpu.memory_space<vmem>>, vector<1x128x128xbf16>
    %19 = vector.shape_cast %18 : vector<1x128x128xbf16> to vector<128x128xbf16>
    %cst_14 = arith.constant dense<0.000000e+00> : vector<16x128xf32>
    %20 = tpu.matmul %17, %19, %cst_14 {dimension_numbers = #tpu.dot_dimension_numbers<[1], [0], [0], [1], [0, 0, 1, 1], [], []>} : vector<16x128xbf16>, vector<128x128xbf16>, vector<16x128xf32> -> vector<16x128xf32>
    %21 = arith.addf %16, %20 : vector<16x128xf32>
    %22 = vector.extract_strided_slice %12 {offsets = [32, 0], sizes = [16, 128], strides = [1, 1]} : vector<144x128xbf16> to vector<16x128xbf16>
    %c2 = arith.constant 2 : index
    %c0_15 = arith.constant 0 : index
    %c0_16 = arith.constant 0 : index
    %23 = vector.load %arg5[%c2, %c0_15, %c0_16] : memref<36x128x128xbf16, #tpu.memory_space<vmem>>, vector<1x128x128xbf16>
    %24 = vector.shape_cast %23 : vector<1x128x128xbf16> to vector<128x128xbf16>
    %cst_17 = arith.constant dense<0.000000e+00> : vector<16x128xf32>
    %25 = tpu.matmul %22, %24, %cst_17 {dimension_numbers = #tpu.dot_dimension_numbers<[1], [0], [0], [1], [0, 0, 1, 1], [], []>} : vector<16x128xbf16>, vector<128x128xbf16>, vector<16x128xf32> -> vector<16x128xf32>
    %26 = arith.addf %21, %25 : vector<16x128xf32>
    %27 = vector.extract_strided_slice %12 {offsets = [48, 0], sizes = [16, 128], strides = [1, 1]} : vector<144x128xbf16> to vector<16x128xbf16>
    %c3 = arith.constant 3 : index
    %c0_18 = arith.constant 0 : index
    %c0_19 = arith.constant 0 : index
    %28 = vector.load %arg5[%c3, %c0_18, %c0_19] : memref<36x128x128xbf16, #tpu.memory_space<vmem>>, vector<1x128x128xbf16>
    %29 = vector.shape_cast %28 : vector<1x128x128xbf16> to vector<128x128xbf16>
    %cst_20 = arith.constant dense<0.000000e+00> : vector<16x128xf32>
    %30 = tpu.matmul %27, %29, %cst_20 {dimension_numbers = #tpu.dot_dimension_numbers<[1], [0], [0], [1], [0, 0, 1, 1], [], []>} : vector<16x128xbf16>, vector<128x128xbf16>, vector<16x128xf32> -> vector<16x128xf32>
    %31 = arith.addf %26, %30 : vector<16x128xf32>
    %32 = vector.extract_strided_slice %12 {offsets = [64, 0], sizes = [16, 128], strides = [1, 1]} : vector<144x128xbf16> to vector<16x128xbf16>
    %c4 = arith.constant 4 : index
    %c0_21 = arith.constant 0 : index
    %c0_22 = arith.constant 0 : index
    %33 = vector.load %arg5[%c4, %c0_21, %c0_22] : memref<36x128x128xbf16, #tpu.memory_space<vmem>>, vector<1x128x128xbf16>
    %34 = vector.shape_cast %33 : vector<1x128x128xbf16> to vector<128x128xbf16>
    %cst_23 = arith.constant dense<0.000000e+00> : vector<16x128xf32>
    %35 = tpu.matmul %32, %34, %cst_23 {dimension_numbers = #tpu.dot_dimension_numbers<[1], [0], [0], [1], [0, 0, 1, 1], [], []>} : vector<16x128xbf16>, vector<128x128xbf16>, vector<16x128xf32> -> vector<16x128xf32>
    %36 = arith.addf %31, %35 : vector<16x128xf32>
    %37 = vector.extract_strided_slice %12 {offsets = [80, 0], sizes = [16, 128], strides = [1, 1]} : vector<144x128xbf16> to vector<16x128xbf16>
    %c5 = arith.constant 5 : index
    %c0_24 = arith.constant 0 : index
    %c0_25 = arith.constant 0 : index
    %38 = vector.load %arg5[%c5, %c0_24, %c0_25] : memref<36x128x128xbf16, #tpu.memory_space<vmem>>, vector<1x128x128xbf16>
    %39 = vector.shape_cast %38 : vector<1x128x128xbf16> to vector<128x128xbf16>
    %cst_26 = arith.constant dense<0.000000e+00> : vector<16x128xf32>
    %40 = tpu.matmul %37, %39, %cst_26 {dimension_numbers = #tpu.dot_dimension_numbers<[1], [0], [0], [1], [0, 0, 1, 1], [], []>} : vector<16x128xbf16>, vector<128x128xbf16>, vector<16x128xf32> -> vector<16x128xf32>
    %41 = arith.addf %36, %40 : vector<16x128xf32>
    %42 = vector.extract_strided_slice %12 {offsets = [96, 0], sizes = [16, 128], strides = [1, 1]} : vector<144x128xbf16> to vector<16x128xbf16>
    %c6 = arith.constant 6 : index
    %c0_27 = arith.constant 0 : index
    %c0_28 = arith.constant 0 : index
    %43 = vector.load %arg5[%c6, %c0_27, %c0_28] : memref<36x128x128xbf16, #tpu.memory_space<vmem>>, vector<1x128x128xbf16>
    %44 = vector.shape_cast %43 : vector<1x128x128xbf16> to vector<128x128xbf16>
    %cst_29 = arith.constant dense<0.000000e+00> : vector<16x128xf32>
    %45 = tpu.matmul %42, %44, %cst_29 {dimension_numbers = #tpu.dot_dimension_numbers<[1], [0], [0], [1], [0, 0, 1, 1], [], []>} : vector<16x128xbf16>, vector<128x128xbf16>, vector<16x128xf32> -> vector<16x128xf32>
    %46 = arith.addf %41, %45 : vector<16x128xf32>
    %47 = vector.extract_strided_slice %12 {offsets = [112, 0], sizes = [16, 128], strides = [1, 1]} : vector<144x128xbf16> to vector<16x128xbf16>
    %c7 = arith.constant 7 : index
    %c0_30 = arith.constant 0 : index
    %c0_31 = arith.constant 0 : index
    %48 = vector.load %arg5[%c7, %c0_30, %c0_31] : memref<36x128x128xbf16, #tpu.memory_space<vmem>>, vector<1x128x128xbf16>
    %49 = vector.shape_cast %48 : vector<1x128x128xbf16> to vector<128x128xbf16>
    %cst_32 = arith.constant dense<0.000000e+00> : vector<16x128xf32>
    %50 = tpu.matmul %47, %49, %cst_32 {dimension_numbers = #tpu.dot_dimension_numbers<[1], [0], [0], [1], [0, 0, 1, 1], [], []>} : vector<16x128xbf16>, vector<128x128xbf16>, vector<16x128xf32> -> vector<16x128xf32>
    %51 = arith.addf %46, %50 : vector<16x128xf32>
    %52 = vector.extract_strided_slice %12 {offsets = [128, 0], sizes = [16, 128], strides = [1, 1]} : vector<144x128xbf16> to vector<16x128xbf16>
    %c8 = arith.constant 8 : index
    %c0_33 = arith.constant 0 : index
    %c0_34 = arith.constant 0 : index
    %53 = vector.load %arg5[%c8, %c0_33, %c0_34] : memref<36x128x128xbf16, #tpu.memory_space<vmem>>, vector<1x128x128xbf16>
    %54 = vector.shape_cast %53 : vector<1x128x128xbf16> to vector<128x128xbf16>
    %cst_35 = arith.constant dense<0.000000e+00> : vector<16x128xf32>
    %55 = tpu.matmul %52, %54, %cst_35 {dimension_numbers = #tpu.dot_dimension_numbers<[1], [0], [0], [1], [0, 0, 1, 1], [], []>} : vector<16x128xbf16>, vector<128x128xbf16>, vector<16x128xf32> -> vector<16x128xf32>
    %56 = arith.addf %51, %55 : vector<16x128xf32>
    %c0_36 = arith.constant 0 : index
    %c0_37 = arith.constant 0 : index
    %c0_38 = arith.constant 0 : index
    %57 = vector.load %arg6[%c0_36, %c0_37, %c0_38] : memref<4x1x128xf32, #tpu.memory_space<vmem>>, vector<1x1x128xf32>
    %58 = vector.shape_cast %57 : vector<1x1x128xf32> to vector<1x128xf32>
    %59 = vector.broadcast %58 : vector<1x128xf32> to vector<16x128xf32>
    %60 = arith.addf %56, %59 : vector<16x128xf32>
    %cst_39 = arith.constant 5.000000e-01 : f32
    %61 = vector.broadcast %cst_39 : f32 to vector<16x128xf32>
    %62 = arith.mulf %61, %60 : vector<16x128xf32>
    %cst_40 = arith.constant 4.471500e-02 : f32
    %63 = vector.broadcast %cst_40 : f32 to vector<16x128xf32>
    %64 = arith.mulf %63, %60 : vector<16x128xf32>
    %65 = arith.mulf %64, %60 : vector<16x128xf32>
    %66 = arith.mulf %65, %60 : vector<16x128xf32>
    %67 = arith.addf %60, %66 : vector<16x128xf32>
    %cst_41 = arith.constant 0.797884583 : f32
    %68 = vector.broadcast %cst_41 : f32 to vector<16x128xf32>
    %69 = arith.mulf %68, %67 : vector<16x128xf32>
    %70 = math.tanh %69 : vector<16x128xf32>
    %cst_42 = arith.constant 1.000000e+00 : f32
    %71 = vector.broadcast %cst_42 : f32 to vector<16x128xf32>
    %72 = arith.addf %71, %70 : vector<16x128xf32>
    %73 = arith.mulf %62, %72 : vector<16x128xf32>
    %74 = arith.addf %8, %73 : vector<16x128xf32>
    %75 = arith.truncf %74 : vector<16x128xf32> to vector<16x128xbf16>
    %cst_43 = arith.constant dense<0.000000e+00> : vector<144x128xf32>
    %76 = tpu.matmul %0, %75, %cst_43 {dimension_numbers = #tpu.dot_dimension_numbers<[1], [0], [0], [1], [0, 0, 1, 1], [], []>} : vector<144x16xbf16>, vector<16x128xbf16>, vector<144x128xf32> -> vector<144x128xf32>
    %77 = arith.truncf %76 : vector<144x128xf32> to vector<144x128xbf16>
    %78 = vector.extract_strided_slice %77 {offsets = [0, 0], sizes = [16, 128], strides = [1, 1]} : vector<144x128xbf16> to vector<16x128xbf16>
    %c9 = arith.constant 9 : index
    %c0_44 = arith.constant 0 : index
    %c0_45 = arith.constant 0 : index
    %79 = vector.load %arg5[%c9, %c0_44, %c0_45] : memref<36x128x128xbf16, #tpu.memory_space<vmem>>, vector<1x128x128xbf16>
    %80 = vector.shape_cast %79 : vector<1x128x128xbf16> to vector<128x128xbf16>
    %cst_46 = arith.constant dense<0.000000e+00> : vector<16x128xf32>
    %81 = tpu.matmul %78, %80, %cst_46 {dimension_numbers = #tpu.dot_dimension_numbers<[1], [0], [0], [1], [0, 0, 1, 1], [], []>} : vector<16x128xbf16>, vector<128x128xbf16>, vector<16x128xf32> -> vector<16x128xf32>
    %82 = vector.extract_strided_slice %77 {offsets = [16, 0], sizes = [16, 128], strides = [1, 1]} : vector<144x128xbf16> to vector<16x128xbf16>
    %c10 = arith.constant 10 : index
    %c0_47 = arith.constant 0 : index
    %c0_48 = arith.constant 0 : index
    %83 = vector.load %arg5[%c10, %c0_47, %c0_48] : memref<36x128x128xbf16, #tpu.memory_space<vmem>>, vector<1x128x128xbf16>
    %84 = vector.shape_cast %83 : vector<1x128x128xbf16> to vector<128x128xbf16>
    %cst_49 = arith.constant dense<0.000000e+00> : vector<16x128xf32>
    %85 = tpu.matmul %82, %84, %cst_49 {dimension_numbers = #tpu.dot_dimension_numbers<[1], [0], [0], [1], [0, 0, 1, 1], [], []>} : vector<16x128xbf16>, vector<128x128xbf16>, vector<16x128xf32> -> vector<16x128xf32>
    %86 = arith.addf %81, %85 : vector<16x128xf32>
    %87 = vector.extract_strided_slice %77 {offsets = [32, 0], sizes = [16, 128], strides = [1, 1]} : vector<144x128xbf16> to vector<16x128xbf16>
    %c11 = arith.constant 11 : index
    %c0_50 = arith.constant 0 : index
    %c0_51 = arith.constant 0 : index
    %88 = vector.load %arg5[%c11, %c0_50, %c0_51] : memref<36x128x128xbf16, #tpu.memory_space<vmem>>, vector<1x128x128xbf16>
    %89 = vector.shape_cast %88 : vector<1x128x128xbf16> to vector<128x128xbf16>
    %cst_52 = arith.constant dense<0.000000e+00> : vector<16x128xf32>
    %90 = tpu.matmul %87, %89, %cst_52 {dimension_numbers = #tpu.dot_dimension_numbers<[1], [0], [0], [1], [0, 0, 1, 1], [], []>} : vector<16x128xbf16>, vector<128x128xbf16>, vector<16x128xf32> -> vector<16x128xf32>
    %91 = arith.addf %86, %90 : vector<16x128xf32>
    %92 = vector.extract_strided_slice %77 {offsets = [48, 0], sizes = [16, 128], strides = [1, 1]} : vector<144x128xbf16> to vector<16x128xbf16>
    %c12 = arith.constant 12 : index
    %c0_53 = arith.constant 0 : index
    %c0_54 = arith.constant 0 : index
    %93 = vector.load %arg5[%c12, %c0_53, %c0_54] : memref<36x128x128xbf16, #tpu.memory_space<vmem>>, vector<1x128x128xbf16>
    %94 = vector.shape_cast %93 : vector<1x128x128xbf16> to vector<128x128xbf16>
    %cst_55 = arith.constant dense<0.000000e+00> : vector<16x128xf32>
    %95 = tpu.matmul %92, %94, %cst_55 {dimension_numbers = #tpu.dot_dimension_numbers<[1], [0], [0], [1], [0, 0, 1, 1], [], []>} : vector<16x128xbf16>, vector<128x128xbf16>, vector<16x128xf32> -> vector<16x128xf32>
    %96 = arith.addf %91, %95 : vector<16x128xf32>
    %97 = vector.extract_strided_slice %77 {offsets = [64, 0], sizes = [16, 128], strides = [1, 1]} : vector<144x128xbf16> to vector<16x128xbf16>
    %c13 = arith.constant 13 : index
    %c0_56 = arith.constant 0 : index
    %c0_57 = arith.constant 0 : index
    %98 = vector.load %arg5[%c13, %c0_56, %c0_57] : memref<36x128x128xbf16, #tpu.memory_space<vmem>>, vector<1x128x128xbf16>
    %99 = vector.shape_cast %98 : vector<1x128x128xbf16> to vector<128x128xbf16>
    %cst_58 = arith.constant dense<0.000000e+00> : vector<16x128xf32>
    %100 = tpu.matmul %97, %99, %cst_58 {dimension_numbers = #tpu.dot_dimension_numbers<[1], [0], [0], [1], [0, 0, 1, 1], [], []>} : vector<16x128xbf16>, vector<128x128xbf16>, vector<16x128xf32> -> vector<16x128xf32>
    %101 = arith.addf %96, %100 : vector<16x128xf32>
    %102 = vector.extract_strided_slice %77 {offsets = [80, 0], sizes = [16, 128], strides = [1, 1]} : vector<144x128xbf16> to vector<16x128xbf16>
    %c14 = arith.constant 14 : index
    %c0_59 = arith.constant 0 : index
    %c0_60 = arith.constant 0 : index
    %103 = vector.load %arg5[%c14, %c0_59, %c0_60] : memref<36x128x128xbf16, #tpu.memory_space<vmem>>, vector<1x128x128xbf16>
    %104 = vector.shape_cast %103 : vector<1x128x128xbf16> to vector<128x128xbf16>
    %cst_61 = arith.constant dense<0.000000e+00> : vector<16x128xf32>
    %105 = tpu.matmul %102, %104, %cst_61 {dimension_numbers = #tpu.dot_dimension_numbers<[1], [0], [0], [1], [0, 0, 1, 1], [], []>} : vector<16x128xbf16>, vector<128x128xbf16>, vector<16x128xf32> -> vector<16x128xf32>
    %106 = arith.addf %101, %105 : vector<16x128xf32>
    %107 = vector.extract_strided_slice %77 {offsets = [96, 0], sizes = [16, 128], strides = [1, 1]} : vector<144x128xbf16> to vector<16x128xbf16>
    %c15 = arith.constant 15 : index
    %c0_62 = arith.constant 0 : index
    %c0_63 = arith.constant 0 : index
    %108 = vector.load %arg5[%c15, %c0_62, %c0_63] : memref<36x128x128xbf16, #tpu.memory_space<vmem>>, vector<1x128x128xbf16>
    %109 = vector.shape_cast %108 : vector<1x128x128xbf16> to vector<128x128xbf16>
    %cst_64 = arith.constant dense<0.000000e+00> : vector<16x128xf32>
    %110 = tpu.matmul %107, %109, %cst_64 {dimension_numbers = #tpu.dot_dimension_numbers<[1], [0], [0], [1], [0, 0, 1, 1], [], []>} : vector<16x128xbf16>, vector<128x128xbf16>, vector<16x128xf32> -> vector<16x128xf32>
    %111 = arith.addf %106, %110 : vector<16x128xf32>
    %112 = vector.extract_strided_slice %77 {offsets = [112, 0], sizes = [16, 128], strides = [1, 1]} : vector<144x128xbf16> to vector<16x128xbf16>
    %c16 = arith.constant 16 : index
    %c0_65 = arith.constant 0 : index
    %c0_66 = arith.constant 0 : index
    %113 = vector.load %arg5[%c16, %c0_65, %c0_66] : memref<36x128x128xbf16, #tpu.memory_space<vmem>>, vector<1x128x128xbf16>
    %114 = vector.shape_cast %113 : vector<1x128x128xbf16> to vector<128x128xbf16>
    %cst_67 = arith.constant dense<0.000000e+00> : vector<16x128xf32>
    %115 = tpu.matmul %112, %114, %cst_67 {dimension_numbers = #tpu.dot_dimension_numbers<[1], [0], [0], [1], [0, 0, 1, 1], [], []>} : vector<16x128xbf16>, vector<128x128xbf16>, vector<16x128xf32> -> vector<16x128xf32>
    %116 = arith.addf %111, %115 : vector<16x128xf32>
    %117 = vector.extract_strided_slice %77 {offsets = [128, 0], sizes = [16, 128], strides = [1, 1]} : vector<144x128xbf16> to vector<16x128xbf16>
    %c17 = arith.constant 17 : index
    %c0_68 = arith.constant 0 : index
    %c0_69 = arith.constant 0 : index
    %118 = vector.load %arg5[%c17, %c0_68, %c0_69] : memref<36x128x128xbf16, #tpu.memory_space<vmem>>, vector<1x128x128xbf16>
    %119 = vector.shape_cast %118 : vector<1x128x128xbf16> to vector<128x128xbf16>
    %cst_70 = arith.constant dense<0.000000e+00> : vector<16x128xf32>
    %120 = tpu.matmul %117, %119, %cst_70 {dimension_numbers = #tpu.dot_dimension_numbers<[1], [0], [0], [1], [0, 0, 1, 1], [], []>} : vector<16x128xbf16>, vector<128x128xbf16>, vector<16x128xf32> -> vector<16x128xf32>
    %121 = arith.addf %116, %120 : vector<16x128xf32>
    %c1_71 = arith.constant 1 : index
    %c0_72 = arith.constant 0 : index
    %c0_73 = arith.constant 0 : index
    %122 = vector.load %arg6[%c1_71, %c0_72, %c0_73] : memref<4x1x128xf32, #tpu.memory_space<vmem>>, vector<1x1x128xf32>
    %123 = vector.shape_cast %122 : vector<1x1x128xf32> to vector<1x128xf32>
    %124 = vector.broadcast %123 : vector<1x128xf32> to vector<16x128xf32>
    %125 = arith.addf %121, %124 : vector<16x128xf32>
    %cst_74 = arith.constant 5.000000e-01 : f32
    %126 = vector.broadcast %cst_74 : f32 to vector<16x128xf32>
    %127 = arith.mulf %126, %125 : vector<16x128xf32>
    %cst_75 = arith.constant 4.471500e-02 : f32
    %128 = vector.broadcast %cst_75 : f32 to vector<16x128xf32>
    %129 = arith.mulf %128, %125 : vector<16x128xf32>
    %130 = arith.mulf %129, %125 : vector<16x128xf32>
    %131 = arith.mulf %130, %125 : vector<16x128xf32>
    %132 = arith.addf %125, %131 : vector<16x128xf32>
    %cst_76 = arith.constant 0.797884583 : f32
    %133 = vector.broadcast %cst_76 : f32 to vector<16x128xf32>
    %134 = arith.mulf %133, %132 : vector<16x128xf32>
    %135 = math.tanh %134 : vector<16x128xf32>
    %cst_77 = arith.constant 1.000000e+00 : f32
    %136 = vector.broadcast %cst_77 : f32 to vector<16x128xf32>
    %137 = arith.addf %136, %135 : vector<16x128xf32>
    %138 = arith.mulf %127, %137 : vector<16x128xf32>
    %139 = arith.addf %9, %138 : vector<16x128xf32>
    %140 = arith.truncf %139 : vector<16x128xf32> to vector<16x128xbf16>
    %cst_78 = arith.constant dense<0.000000e+00> : vector<144x128xf32>
    %141 = tpu.matmul %0, %140, %cst_78 {dimension_numbers = #tpu.dot_dimension_numbers<[1], [0], [0], [1], [0, 0, 1, 1], [], []>} : vector<144x16xbf16>, vector<16x128xbf16>, vector<144x128xf32> -> vector<144x128xf32>
    %142 = arith.truncf %141 : vector<144x128xf32> to vector<144x128xbf16>
    %143 = vector.extract_strided_slice %142 {offsets = [0, 0], sizes = [16, 128], strides = [1, 1]} : vector<144x128xbf16> to vector<16x128xbf16>
    %c18 = arith.constant 18 : index
    %c0_79 = arith.constant 0 : index
    %c0_80 = arith.constant 0 : index
    %144 = vector.load %arg5[%c18, %c0_79, %c0_80] : memref<36x128x128xbf16, #tpu.memory_space<vmem>>, vector<1x128x128xbf16>
    %145 = vector.shape_cast %144 : vector<1x128x128xbf16> to vector<128x128xbf16>
    %cst_81 = arith.constant dense<0.000000e+00> : vector<16x128xf32>
    %146 = tpu.matmul %143, %145, %cst_81 {dimension_numbers = #tpu.dot_dimension_numbers<[1], [0], [0], [1], [0, 0, 1, 1], [], []>} : vector<16x128xbf16>, vector<128x128xbf16>, vector<16x128xf32> -> vector<16x128xf32>
    %147 = vector.extract_strided_slice %142 {offsets = [16, 0], sizes = [16, 128], strides = [1, 1]} : vector<144x128xbf16> to vector<16x128xbf16>
    %c19 = arith.constant 19 : index
    %c0_82 = arith.constant 0 : index
    %c0_83 = arith.constant 0 : index
    %148 = vector.load %arg5[%c19, %c0_82, %c0_83] : memref<36x128x128xbf16, #tpu.memory_space<vmem>>, vector<1x128x128xbf16>
    %149 = vector.shape_cast %148 : vector<1x128x128xbf16> to vector<128x128xbf16>
    %cst_84 = arith.constant dense<0.000000e+00> : vector<16x128xf32>
    %150 = tpu.matmul %147, %149, %cst_84 {dimension_numbers = #tpu.dot_dimension_numbers<[1], [0], [0], [1], [0, 0, 1, 1], [], []>} : vector<16x128xbf16>, vector<128x128xbf16>, vector<16x128xf32> -> vector<16x128xf32>
    %151 = arith.addf %146, %150 : vector<16x128xf32>
    %152 = vector.extract_strided_slice %142 {offsets = [32, 0], sizes = [16, 128], strides = [1, 1]} : vector<144x128xbf16> to vector<16x128xbf16>
    %c20 = arith.constant 20 : index
    %c0_85 = arith.constant 0 : index
    %c0_86 = arith.constant 0 : index
    %153 = vector.load %arg5[%c20, %c0_85, %c0_86] : memref<36x128x128xbf16, #tpu.memory_space<vmem>>, vector<1x128x128xbf16>
    %154 = vector.shape_cast %153 : vector<1x128x128xbf16> to vector<128x128xbf16>
    %cst_87 = arith.constant dense<0.000000e+00> : vector<16x128xf32>
    %155 = tpu.matmul %152, %154, %cst_87 {dimension_numbers = #tpu.dot_dimension_numbers<[1], [0], [0], [1], [0, 0, 1, 1], [], []>} : vector<16x128xbf16>, vector<128x128xbf16>, vector<16x128xf32> -> vector<16x128xf32>
    %156 = arith.addf %151, %155 : vector<16x128xf32>
    %157 = vector.extract_strided_slice %142 {offsets = [48, 0], sizes = [16, 128], strides = [1, 1]} : vector<144x128xbf16> to vector<16x128xbf16>
    %c21 = arith.constant 21 : index
    %c0_88 = arith.constant 0 : index
    %c0_89 = arith.constant 0 : index
    %158 = vector.load %arg5[%c21, %c0_88, %c0_89] : memref<36x128x128xbf16, #tpu.memory_space<vmem>>, vector<1x128x128xbf16>
    %159 = vector.shape_cast %158 : vector<1x128x128xbf16> to vector<128x128xbf16>
    %cst_90 = arith.constant dense<0.000000e+00> : vector<16x128xf32>
    %160 = tpu.matmul %157, %159, %cst_90 {dimension_numbers = #tpu.dot_dimension_numbers<[1], [0], [0], [1], [0, 0, 1, 1], [], []>} : vector<16x128xbf16>, vector<128x128xbf16>, vector<16x128xf32> -> vector<16x128xf32>
    %161 = arith.addf %156, %160 : vector<16x128xf32>
    %162 = vector.extract_strided_slice %142 {offsets = [64, 0], sizes = [16, 128], strides = [1, 1]} : vector<144x128xbf16> to vector<16x128xbf16>
    %c22 = arith.constant 22 : index
    %c0_91 = arith.constant 0 : index
    %c0_92 = arith.constant 0 : index
    %163 = vector.load %arg5[%c22, %c0_91, %c0_92] : memref<36x128x128xbf16, #tpu.memory_space<vmem>>, vector<1x128x128xbf16>
    %164 = vector.shape_cast %163 : vector<1x128x128xbf16> to vector<128x128xbf16>
    %cst_93 = arith.constant dense<0.000000e+00> : vector<16x128xf32>
    %165 = tpu.matmul %162, %164, %cst_93 {dimension_numbers = #tpu.dot_dimension_numbers<[1], [0], [0], [1], [0, 0, 1, 1], [], []>} : vector<16x128xbf16>, vector<128x128xbf16>, vector<16x128xf32> -> vector<16x128xf32>
    %166 = arith.addf %161, %165 : vector<16x128xf32>
    %167 = vector.extract_strided_slice %142 {offsets = [80, 0], sizes = [16, 128], strides = [1, 1]} : vector<144x128xbf16> to vector<16x128xbf16>
    %c23 = arith.constant 23 : index
    %c0_94 = arith.constant 0 : index
    %c0_95 = arith.constant 0 : index
    %168 = vector.load %arg5[%c23, %c0_94, %c0_95] : memref<36x128x128xbf16, #tpu.memory_space<vmem>>, vector<1x128x128xbf16>
    %169 = vector.shape_cast %168 : vector<1x128x128xbf16> to vector<128x128xbf16>
    %cst_96 = arith.constant dense<0.000000e+00> : vector<16x128xf32>
    %170 = tpu.matmul %167, %169, %cst_96 {dimension_numbers = #tpu.dot_dimension_numbers<[1], [0], [0], [1], [0, 0, 1, 1], [], []>} : vector<16x128xbf16>, vector<128x128xbf16>, vector<16x128xf32> -> vector<16x128xf32>
    %171 = arith.addf %166, %170 : vector<16x128xf32>
    %172 = vector.extract_strided_slice %142 {offsets = [96, 0], sizes = [16, 128], strides = [1, 1]} : vector<144x128xbf16> to vector<16x128xbf16>
    %c24 = arith.constant 24 : index
    %c0_97 = arith.constant 0 : index
    %c0_98 = arith.constant 0 : index
    %173 = vector.load %arg5[%c24, %c0_97, %c0_98] : memref<36x128x128xbf16, #tpu.memory_space<vmem>>, vector<1x128x128xbf16>
    %174 = vector.shape_cast %173 : vector<1x128x128xbf16> to vector<128x128xbf16>
    %cst_99 = arith.constant dense<0.000000e+00> : vector<16x128xf32>
    %175 = tpu.matmul %172, %174, %cst_99 {dimension_numbers = #tpu.dot_dimension_numbers<[1], [0], [0], [1], [0, 0, 1, 1], [], []>} : vector<16x128xbf16>, vector<128x128xbf16>, vector<16x128xf32> -> vector<16x128xf32>
    %176 = arith.addf %171, %175 : vector<16x128xf32>
    %177 = vector.extract_strided_slice %142 {offsets = [112, 0], sizes = [16, 128], strides = [1, 1]} : vector<144x128xbf16> to vector<16x128xbf16>
    %c25 = arith.constant 25 : index
    %c0_100 = arith.constant 0 : index
    %c0_101 = arith.constant 0 : index
    %178 = vector.load %arg5[%c25, %c0_100, %c0_101] : memref<36x128x128xbf16, #tpu.memory_space<vmem>>, vector<1x128x128xbf16>
    %179 = vector.shape_cast %178 : vector<1x128x128xbf16> to vector<128x128xbf16>
    %cst_102 = arith.constant dense<0.000000e+00> : vector<16x128xf32>
    %180 = tpu.matmul %177, %179, %cst_102 {dimension_numbers = #tpu.dot_dimension_numbers<[1], [0], [0], [1], [0, 0, 1, 1], [], []>} : vector<16x128xbf16>, vector<128x128xbf16>, vector<16x128xf32> -> vector<16x128xf32>
    %181 = arith.addf %176, %180 : vector<16x128xf32>
    %182 = vector.extract_strided_slice %142 {offsets = [128, 0], sizes = [16, 128], strides = [1, 1]} : vector<144x128xbf16> to vector<16x128xbf16>
    %c26 = arith.constant 26 : index
    %c0_103 = arith.constant 0 : index
    %c0_104 = arith.constant 0 : index
    %183 = vector.load %arg5[%c26, %c0_103, %c0_104] : memref<36x128x128xbf16, #tpu.memory_space<vmem>>, vector<1x128x128xbf16>
    %184 = vector.shape_cast %183 : vector<1x128x128xbf16> to vector<128x128xbf16>
    %cst_105 = arith.constant dense<0.000000e+00> : vector<16x128xf32>
    %185 = tpu.matmul %182, %184, %cst_105 {dimension_numbers = #tpu.dot_dimension_numbers<[1], [0], [0], [1], [0, 0, 1, 1], [], []>} : vector<16x128xbf16>, vector<128x128xbf16>, vector<16x128xf32> -> vector<16x128xf32>
    %186 = arith.addf %181, %185 : vector<16x128xf32>
    %c2_106 = arith.constant 2 : index
    %c0_107 = arith.constant 0 : index
    %c0_108 = arith.constant 0 : index
    %187 = vector.load %arg6[%c2_106, %c0_107, %c0_108] : memref<4x1x128xf32, #tpu.memory_space<vmem>>, vector<1x1x128xf32>
    %188 = vector.shape_cast %187 : vector<1x1x128xf32> to vector<1x128xf32>
    %189 = vector.broadcast %188 : vector<1x128xf32> to vector<16x128xf32>
    %190 = arith.addf %186, %189 : vector<16x128xf32>
    %cst_109 = arith.constant 5.000000e-01 : f32
    %191 = vector.broadcast %cst_109 : f32 to vector<16x128xf32>
    %192 = arith.mulf %191, %190 : vector<16x128xf32>
    %cst_110 = arith.constant 4.471500e-02 : f32
    %193 = vector.broadcast %cst_110 : f32 to vector<16x128xf32>
    %194 = arith.mulf %193, %190 : vector<16x128xf32>
    %195 = arith.mulf %194, %190 : vector<16x128xf32>
    %196 = arith.mulf %195, %190 : vector<16x128xf32>
    %197 = arith.addf %190, %196 : vector<16x128xf32>
    %cst_111 = arith.constant 0.797884583 : f32
    %198 = vector.broadcast %cst_111 : f32 to vector<16x128xf32>
    %199 = arith.mulf %198, %197 : vector<16x128xf32>
    %200 = math.tanh %199 : vector<16x128xf32>
    %cst_112 = arith.constant 1.000000e+00 : f32
    %201 = vector.broadcast %cst_112 : f32 to vector<16x128xf32>
    %202 = arith.addf %201, %200 : vector<16x128xf32>
    %203 = arith.mulf %192, %202 : vector<16x128xf32>
    %204 = arith.addf %74, %203 : vector<16x128xf32>
    %205 = arith.truncf %204 : vector<16x128xf32> to vector<16x128xbf16>
    %cst_113 = arith.constant dense<0.000000e+00> : vector<144x128xf32>
    %206 = tpu.matmul %0, %205, %cst_113 {dimension_numbers = #tpu.dot_dimension_numbers<[1], [0], [0], [1], [0, 0, 1, 1], [], []>} : vector<144x16xbf16>, vector<16x128xbf16>, vector<144x128xf32> -> vector<144x128xf32>
    %207 = arith.truncf %206 : vector<144x128xf32> to vector<144x128xbf16>
    %208 = vector.extract_strided_slice %207 {offsets = [0, 0], sizes = [16, 128], strides = [1, 1]} : vector<144x128xbf16> to vector<16x128xbf16>
    %c27 = arith.constant 27 : index
    %c0_114 = arith.constant 0 : index
    %c0_115 = arith.constant 0 : index
    %209 = vector.load %arg5[%c27, %c0_114, %c0_115] : memref<36x128x128xbf16, #tpu.memory_space<vmem>>, vector<1x128x128xbf16>
    %210 = vector.shape_cast %209 : vector<1x128x128xbf16> to vector<128x128xbf16>
    %cst_116 = arith.constant dense<0.000000e+00> : vector<16x128xf32>
    %211 = tpu.matmul %208, %210, %cst_116 {dimension_numbers = #tpu.dot_dimension_numbers<[1], [0], [0], [1], [0, 0, 1, 1], [], []>} : vector<16x128xbf16>, vector<128x128xbf16>, vector<16x128xf32> -> vector<16x128xf32>
    %212 = vector.extract_strided_slice %207 {offsets = [16, 0], sizes = [16, 128], strides = [1, 1]} : vector<144x128xbf16> to vector<16x128xbf16>
    %c28 = arith.constant 28 : index
    %c0_117 = arith.constant 0 : index
    %c0_118 = arith.constant 0 : index
    %213 = vector.load %arg5[%c28, %c0_117, %c0_118] : memref<36x128x128xbf16, #tpu.memory_space<vmem>>, vector<1x128x128xbf16>
    %214 = vector.shape_cast %213 : vector<1x128x128xbf16> to vector<128x128xbf16>
    %cst_119 = arith.constant dense<0.000000e+00> : vector<16x128xf32>
    %215 = tpu.matmul %212, %214, %cst_119 {dimension_numbers = #tpu.dot_dimension_numbers<[1], [0], [0], [1], [0, 0, 1, 1], [], []>} : vector<16x128xbf16>, vector<128x128xbf16>, vector<16x128xf32> -> vector<16x128xf32>
    %216 = arith.addf %211, %215 : vector<16x128xf32>
    %217 = vector.extract_strided_slice %207 {offsets = [32, 0], sizes = [16, 128], strides = [1, 1]} : vector<144x128xbf16> to vector<16x128xbf16>
    %c29 = arith.constant 29 : index
    %c0_120 = arith.constant 0 : index
    %c0_121 = arith.constant 0 : index
    %218 = vector.load %arg5[%c29, %c0_120, %c0_121] : memref<36x128x128xbf16, #tpu.memory_space<vmem>>, vector<1x128x128xbf16>
    %219 = vector.shape_cast %218 : vector<1x128x128xbf16> to vector<128x128xbf16>
    %cst_122 = arith.constant dense<0.000000e+00> : vector<16x128xf32>
    %220 = tpu.matmul %217, %219, %cst_122 {dimension_numbers = #tpu.dot_dimension_numbers<[1], [0], [0], [1], [0, 0, 1, 1], [], []>} : vector<16x128xbf16>, vector<128x128xbf16>, vector<16x128xf32> -> vector<16x128xf32>
    %221 = arith.addf %216, %220 : vector<16x128xf32>
    %222 = vector.extract_strided_slice %207 {offsets = [48, 0], sizes = [16, 128], strides = [1, 1]} : vector<144x128xbf16> to vector<16x128xbf16>
    %c30 = arith.constant 30 : index
    %c0_123 = arith.constant 0 : index
    %c0_124 = arith.constant 0 : index
    %223 = vector.load %arg5[%c30, %c0_123, %c0_124] : memref<36x128x128xbf16, #tpu.memory_space<vmem>>, vector<1x128x128xbf16>
    %224 = vector.shape_cast %223 : vector<1x128x128xbf16> to vector<128x128xbf16>
    %cst_125 = arith.constant dense<0.000000e+00> : vector<16x128xf32>
    %225 = tpu.matmul %222, %224, %cst_125 {dimension_numbers = #tpu.dot_dimension_numbers<[1], [0], [0], [1], [0, 0, 1, 1], [], []>} : vector<16x128xbf16>, vector<128x128xbf16>, vector<16x128xf32> -> vector<16x128xf32>
    %226 = arith.addf %221, %225 : vector<16x128xf32>
    %227 = vector.extract_strided_slice %207 {offsets = [64, 0], sizes = [16, 128], strides = [1, 1]} : vector<144x128xbf16> to vector<16x128xbf16>
    %c31 = arith.constant 31 : index
    %c0_126 = arith.constant 0 : index
    %c0_127 = arith.constant 0 : index
    %228 = vector.load %arg5[%c31, %c0_126, %c0_127] : memref<36x128x128xbf16, #tpu.memory_space<vmem>>, vector<1x128x128xbf16>
    %229 = vector.shape_cast %228 : vector<1x128x128xbf16> to vector<128x128xbf16>
    %cst_128 = arith.constant dense<0.000000e+00> : vector<16x128xf32>
    %230 = tpu.matmul %227, %229, %cst_128 {dimension_numbers = #tpu.dot_dimension_numbers<[1], [0], [0], [1], [0, 0, 1, 1], [], []>} : vector<16x128xbf16>, vector<128x128xbf16>, vector<16x128xf32> -> vector<16x128xf32>
    %231 = arith.addf %226, %230 : vector<16x128xf32>
    %232 = vector.extract_strided_slice %207 {offsets = [80, 0], sizes = [16, 128], strides = [1, 1]} : vector<144x128xbf16> to vector<16x128xbf16>
    %c32 = arith.constant 32 : index
    %c0_129 = arith.constant 0 : index
    %c0_130 = arith.constant 0 : index
    %233 = vector.load %arg5[%c32, %c0_129, %c0_130] : memref<36x128x128xbf16, #tpu.memory_space<vmem>>, vector<1x128x128xbf16>
    %234 = vector.shape_cast %233 : vector<1x128x128xbf16> to vector<128x128xbf16>
    %cst_131 = arith.constant dense<0.000000e+00> : vector<16x128xf32>
    %235 = tpu.matmul %232, %234, %cst_131 {dimension_numbers = #tpu.dot_dimension_numbers<[1], [0], [0], [1], [0, 0, 1, 1], [], []>} : vector<16x128xbf16>, vector<128x128xbf16>, vector<16x128xf32> -> vector<16x128xf32>
    %236 = arith.addf %231, %235 : vector<16x128xf32>
    %237 = vector.extract_strided_slice %207 {offsets = [96, 0], sizes = [16, 128], strides = [1, 1]} : vector<144x128xbf16> to vector<16x128xbf16>
    %c33 = arith.constant 33 : index
    %c0_132 = arith.constant 0 : index
    %c0_133 = arith.constant 0 : index
    %238 = vector.load %arg5[%c33, %c0_132, %c0_133] : memref<36x128x128xbf16, #tpu.memory_space<vmem>>, vector<1x128x128xbf16>
    %239 = vector.shape_cast %238 : vector<1x128x128xbf16> to vector<128x128xbf16>
    %cst_134 = arith.constant dense<0.000000e+00> : vector<16x128xf32>
    %240 = tpu.matmul %237, %239, %cst_134 {dimension_numbers = #tpu.dot_dimension_numbers<[1], [0], [0], [1], [0, 0, 1, 1], [], []>} : vector<16x128xbf16>, vector<128x128xbf16>, vector<16x128xf32> -> vector<16x128xf32>
    %241 = arith.addf %236, %240 : vector<16x128xf32>
    %242 = vector.extract_strided_slice %207 {offsets = [112, 0], sizes = [16, 128], strides = [1, 1]} : vector<144x128xbf16> to vector<16x128xbf16>
    %c34 = arith.constant 34 : index
    %c0_135 = arith.constant 0 : index
    %c0_136 = arith.constant 0 : index
    %243 = vector.load %arg5[%c34, %c0_135, %c0_136] : memref<36x128x128xbf16, #tpu.memory_space<vmem>>, vector<1x128x128xbf16>
    %244 = vector.shape_cast %243 : vector<1x128x128xbf16> to vector<128x128xbf16>
    %cst_137 = arith.constant dense<0.000000e+00> : vector<16x128xf32>
    %245 = tpu.matmul %242, %244, %cst_137 {dimension_numbers = #tpu.dot_dimension_numbers<[1], [0], [0], [1], [0, 0, 1, 1], [], []>} : vector<16x128xbf16>, vector<128x128xbf16>, vector<16x128xf32> -> vector<16x128xf32>
    %246 = arith.addf %241, %245 : vector<16x128xf32>
    %247 = vector.extract_strided_slice %207 {offsets = [128, 0], sizes = [16, 128], strides = [1, 1]} : vector<144x128xbf16> to vector<16x128xbf16>
    %c35 = arith.constant 35 : index
    %c0_138 = arith.constant 0 : index
    %c0_139 = arith.constant 0 : index
    %248 = vector.load %arg5[%c35, %c0_138, %c0_139] : memref<36x128x128xbf16, #tpu.memory_space<vmem>>, vector<1x128x128xbf16>
    %249 = vector.shape_cast %248 : vector<1x128x128xbf16> to vector<128x128xbf16>
    %cst_140 = arith.constant dense<0.000000e+00> : vector<16x128xf32>
    %250 = tpu.matmul %247, %249, %cst_140 {dimension_numbers = #tpu.dot_dimension_numbers<[1], [0], [0], [1], [0, 0, 1, 1], [], []>} : vector<16x128xbf16>, vector<128x128xbf16>, vector<16x128xf32> -> vector<16x128xf32>
    %251 = arith.addf %246, %250 : vector<16x128xf32>
    %c3_141 = arith.constant 3 : index
    %c0_142 = arith.constant 0 : index
    %c0_143 = arith.constant 0 : index
    %252 = vector.load %arg6[%c3_141, %c0_142, %c0_143] : memref<4x1x128xf32, #tpu.memory_space<vmem>>, vector<1x1x128xf32>
    %253 = vector.shape_cast %252 : vector<1x1x128xf32> to vector<1x128xf32>
    %254 = vector.broadcast %253 : vector<1x128xf32> to vector<16x128xf32>
    %255 = arith.addf %251, %254 : vector<16x128xf32>
    %cst_144 = arith.constant 5.000000e-01 : f32
    %256 = vector.broadcast %cst_144 : f32 to vector<16x128xf32>
    %257 = arith.mulf %256, %255 : vector<16x128xf32>
    %cst_145 = arith.constant 4.471500e-02 : f32
    %258 = vector.broadcast %cst_145 : f32 to vector<16x128xf32>
    %259 = arith.mulf %258, %255 : vector<16x128xf32>
    %260 = arith.mulf %259, %255 : vector<16x128xf32>
    %261 = arith.mulf %260, %255 : vector<16x128xf32>
    %262 = arith.addf %255, %261 : vector<16x128xf32>
    %cst_146 = arith.constant 0.797884583 : f32
    %263 = vector.broadcast %cst_146 : f32 to vector<16x128xf32>
    %264 = arith.mulf %263, %262 : vector<16x128xf32>
    %265 = math.tanh %264 : vector<16x128xf32>
    %cst_147 = arith.constant 1.000000e+00 : f32
    %266 = vector.broadcast %cst_147 : f32 to vector<16x128xf32>
    %267 = arith.addf %266, %265 : vector<16x128xf32>
    %268 = arith.mulf %257, %267 : vector<16x128xf32>
    %269 = arith.addf %139, %268 : vector<16x128xf32>
    %270 = arith.addf %204, %269 : vector<16x128xf32>
    %cst_148 = arith.constant 5.000000e-01 : f32
    %271 = vector.broadcast %cst_148 : f32 to vector<16x128xf32>
    %272 = arith.mulf %270, %271 : vector<16x128xf32>
    %c0_149 = arith.constant 0 : index
    %c0_150 = arith.constant 0 : index
    %273 = vector.load %arg7[%c0_149, %c0_150] : memref<16x128xf32, #tpu.memory_space<vmem>>, vector<16x128xf32>
    tpu.vector_store %arg7[%c0_149, %c0_150], %272 {strides = array<i32>} : memref<16x128xf32, #tpu.memory_space<vmem>>, vector<16x128xf32>,
    return
  }
  func.func @transform_0(%arg0: i32) -> (i32, i32) {
    %c0_i32 = arith.constant 0 : i32
    %c0_i32_0 = arith.constant 0 : i32
    return %arg0, %c0_i32 : i32, i32
  }
  func.func @transform_1(%arg0: i32) -> (i32, i32) {
    %c0_i32 = arith.constant 0 : i32
    %c0_i32_0 = arith.constant 0 : i32
    %c0_i32_1 = arith.constant 0 : i32
    return %c0_i32, %c0_i32_0 : i32, i32
  }
  func.func @transform_2(%arg0: i32) -> (i32, i32) {
    %c0_i32 = arith.constant 0 : i32
    %c0_i32_0 = arith.constant 0 : i32
    %c0_i32_1 = arith.constant 0 : i32
    return %c0_i32, %c0_i32_0 : i32, i32
  }
  func.func @transform_3(%arg0: i32) -> (i32, i32) {
    %c0_i32 = arith.constant 0 : i32
    %c0_i32_0 = arith.constant 0 : i32
    %c0_i32_1 = arith.constant 0 : i32
    return %c0_i32, %c0_i32_0 : i32, i32
  }
  func.func @transform_4(%arg0: i32) -> (i32, i32, i32) {
    %c0_i32 = arith.constant 0 : i32
    %c0_i32_0 = arith.constant 0 : i32
    %c0_i32_1 = arith.constant 0 : i32
    %c0_i32_2 = arith.constant 0 : i32
    return %c0_i32, %c0_i32_0, %c0_i32_1 : i32, i32, i32
  }
  func.func @transform_5(%arg0: i32) -> (i32, i32, i32) {
    %c0_i32 = arith.constant 0 : i32
    %c0_i32_0 = arith.constant 0 : i32
    %c0_i32_1 = arith.constant 0 : i32
    %c0_i32_2 = arith.constant 0 : i32
    return %c0_i32, %c0_i32_0, %c0_i32_1 : i32, i32, i32
  }
  func.func @transform_6(%arg0: i32) -> (i32, i32) {
    %c0_i32 = arith.constant 0 : i32
    %c0_i32_0 = arith.constant 0 : i32
    return %arg0, %c0_i32 : i32, i32
  }
}

</mosaic_0001>

<bundles_post_ra>
// kernel: tpu_custom_call.1
= control target key start
LH: loop header
LB: loop body
LE: loop exit
PB: predicated region body
PF: predicated region fallthrough
CT: control target
= control target key end

     0   :  { %s8382_s0 = inlined_call_operand.vmem [shape: f32[32,3], index: 0, kind: input, shape index: {}]   ;;  %s8383_s1 = inlined_call_operand.vmem [shape: bf16[144,16], index: 1, kind: input, shape index: {}]   ;;  %s8384_s2 = inlined_call_operand.hbm [shape: bf16[3,256], index: 2, kind: input, shape index: {}]   ;;  %s8385_s3 = inlined_call_operand.hbm [shape: f32[1,256], index: 3, kind: input, shape index: {}]   ;;  %s8386_s4 = inlined_call_operand.hbm [shape: bf16[36,128,128], index: 4, kind: input, shape index: {}]   ;;  %s8387_s5 = inlined_call_operand.hbm [shape: f32[4,1,128], index: 5, kind: input, shape index: {}]   ;;  %s8388_s6 = inlined_call_operand.hbm [shape: f32[32,128], index: 6, kind: output, shape index: {}]  }
   0x1   :  { %8392 = sst [smem:[#allocation15_spill]] %s8384_s2 }
   0x2   :  { %8393 = sst [smem:[#allocation16_spill]] %s8385_s3 }
   0x3   :  { %11 = vsyncpa [#allocation3], 0 }
   0x4   :  { %12 = vsyncpa [#allocation6], 0 }
   0x5   :  { %13 = vsyncpa [#allocation9], 0 }
   0x6   :  { %14 = vsyncpa [#allocation4], 0 }
   0x7   :  { %16 = vsyncpa [#allocation4 + $0x1], 0  ;;  %s7301_s21 = smov 0   ;;  %s7303_s22 = smov 0  }
   0x8   :  { %s7305_s23 = smov 0   ;;  %s7307_s24 = smov 0  }
   0x9 LB: > { %s7322_s25 = sadd.s32 4294967295, %s7249_s24   ;;  %s5055_s26 = sadd.s32 4294967294, %s7249_s24   ;;  %s7249_s24 = sphi %s7307_s24, %s8413_s24   ;;  %s7245_s23 = sphi %s7305_s23, %s8412_s23   ;;  %s7241_s22 = sphi %s7303_s22, %s8411_s22   ;;  %s7237_s21 = sphi %s7301_s21, %s8410_s21  }
   0xa   : > { %s7326_s27 = sadd.s32 1, %s7249_s24   ;;  %s160_s28 = sadd.s32 1, %s7245_s23 }
   0xb   : > { %s157_s29 = ssub.s32 %s7249_s24, %s7326_s27  ;;  %p170_p0 = scmp.ne.s32.totalorder %s7245_s23, %s7241_s22 }
   0xc   : > { %p158_p1 = scmp.eq.s32.totalorder %s157_s29, 0  ;;  %p171_p2 = scmp.eq.s32.totalorder %s7322_s25, 1 }
   0xd   : > { %p176_p3 = scmp.ne.s32.totalorder %s7241_s22, %s7237_s21  ;;  %p177_p4 = scmp.eq.s32.totalorder %s5055_s26, 1 }
   0xe   : > { %s7337_s30 = scalar_select %p158_p1, %s7245_s23, %s160_s28  }
   0xf   : > { %p7339_p5 = por %p171_p2, %p170_p0  ;;  %p7343_p6 = por %p177_p4, %p176_p3 }
  0x10   : > { %p5056_p7 = scmp.ge.s32.totalorder %s7249_s24, 1  ;;  %p184_p8 = scmp.lt.s32.totalorder %s7249_s24, 3 }
  0x11   : > { %s8394_s7 = scalar_select %p7339_p5, 1, 0 }
  0x12   : > { %s8395_s8 = scalar_select %p7343_p6, 1, 0 }
  0x13   : > { %p8389_p9 = scmp.eq.s32.totalorder %s7322_s25, 0  ;;  %p7350_p10 = pnand %p5056_p7, %p184_p8 }
  0x14   : > { %s7251_s10 = smov [#allocation5]   ;;  %s7252_s12 = smov [#allocation2]  }
  0x15   : > { %s8396_s9 = scalar_select %p7350_p10, 1, 0 }
  0x16   : > { %s211_s11 = sshll.u32 %s7251_s10, 4  ;;  %p6669_p11 = pneg %p7350_p10  ;;  %s212_s11 = int_to_ptr.vmem [resolvable:$true] %s211_s11 }
  0x17   : > { %s200_s13 = sshll.u32 %s7252_s12, 4  ;;  %s7253_s15 = smov [#allocation7]   ;;  %s7362_s13 = int_to_ptr.vmem [resolvable:$true] %s200_s13 }
  0x18   : > { %p7358_p12 = pnand %p8389_p9, %p6669_p11  ;;  %s221_s16 = sshll.u32 %s7253_s15, 4  ;;  %s7364_s16 = int_to_ptr.vmem [resolvable:$true] %s221_s16 }
  0x19   : > { %s8398_s3 = sld [smem:[#allocation16_spill]] }
  0x1a   : > { %p7374_p0 = pneg %p7358_p12 }
  0x1f   : > { %s7063_s19 = scalar_lea.hbm %s8398_s3, 32 }
  0x20   : > { %p7064_p13 = scmp.ne.s32.totalorder %s8398_s3, %s7063_s19  ;;  %p7070_p3 = scmp.lt.u32.totalorder %s7063_s19, %s8398_s3 }
  0x22   : > { %p7066_p1 = pnand %p7374_p0, %p7064_p13 }
  0x24   : > { %p7067_p2 = pneg %p7066_p1 }
  0x26   : > { %p7072_p4 = pnand %p7070_p3, %p7067_p2 }
  0x28   : > { %7075 = shalt.err (!%p7072_p4)
}
  0x29   : > { %s7076_s12 = scalar_lea.vmem %s212_s11, 32  ;;  %p7084_p9 = scmp.lt.s32.totalorder %s212_s11, %s212_s11 }
  0x2a   : > { %p7077_p7 = scmp.ne.s32.totalorder %s212_s11, %s7076_s12  ;;  %p7085_p6 = scmp.lt.s32.totalorder %s7076_s12, %s7076_s12 }
  0x2c   : > { %p7079_p8 = pnand %p7077_p7, %p7374_p0  ;;  %p7086_p5 = por %p7085_p6, %p7084_p9 }
  0x2e   : > { %p7080_p11 = pneg %p7079_p8 }
  0x30   : > { %p7087_p10 = pnand %p7086_p5, %p7080_p11 }
  0x32   : > { %7090 = shalt.err (!%p7087_p10)
}
  0x33   : > { %6675 = dma.hbm_to_vmem [thread:$0]  (!%p7358_p12), %s8398_s3, 32, %s212_s11, [#allocation6]  }
  0x34   : > { %s8400_s2 = sld [smem:[#allocation15_spill]] }
  0x3a   : > { %s7091_s20 = scalar_lea.hbm %s8400_s2, 64 }
  0x3b   : > { %p7092_p13 = scmp.ne.s32.totalorder %s8400_s2, %s7091_s20  ;;  %p7098_p5 = scmp.lt.u32.totalorder %s7091_s20, %s8400_s2 }
  0x3d   : > { %p7094_p1 = pnand %p7092_p13, %p7374_p0 }
  0x3f   : > { %p7095_p6 = pneg %p7094_p1 }
  0x41   : > { %p7100_p9 = pnand %p7098_p5, %p7095_p6 }
  0x43   : > { %7103 = shalt.err (!%p7100_p9)
}
  0x44   : > { %s7104_s11 = scalar_lea.vmem %s7362_s13, 64  ;;  %p7112_p4 = scmp.lt.s32.totalorder %s7362_s13, %s7362_s13 }
  0x45   : > { %p7105_p10 = scmp.ne.s32.totalorder %s7362_s13, %s7104_s11  ;;  %p7113_p7 = scmp.lt.s32.totalorder %s7104_s11, %s7104_s11 }
  0x47   : > { %p7107_p2 = pnand %p7105_p10, %p7374_p0  ;;  %p7114_p8 = por %p7113_p7, %p7112_p4 }
  0x49   : > { %p7108_p3 = pneg %p7107_p2 }
  0x4b   : > { %p7115_p11 = pnand %p7114_p8, %p7108_p3 }
  0x4d   : > { %7118 = shalt.err (!%p7115_p11)
}
  0x4e   : > { %6672 = dma.hbm_to_vmem [thread:$0]  (!%p7358_p12), %s8400_s2, 64, %s7362_s13, [#allocation3]  }
  0x4f   : > { %s7119_s20 = scalar_lea.hbm %s8386_s4, 36864 }
  0x50   : > { %p7120_p13 = scmp.ne.s32.totalorder %s8386_s4, %s7119_s20  ;;  %p7126_p5 = scmp.lt.u32.totalorder %s7119_s20, %s8386_s4 }
  0x52   : > { %p7122_p1 = pnand %p7120_p13, %p7374_p0 }
  0x54   : > { %p7123_p6 = pneg %p7122_p1 }
  0x56   : > { %p7128_p9 = pnand %p7126_p5, %p7123_p6 }
  0x58   : > { %7131 = shalt.err (!%p7128_p9)
}
  0x59   : > { %s7132_s13 = scalar_lea.vmem %s7364_s16, 36864  ;;  %p7140_p4 = scmp.lt.s32.totalorder %s7364_s16, %s7364_s16 }
  0x5a   : > { %p7133_p10 = scmp.ne.s32.totalorder %s7364_s16, %s7132_s13  ;;  %p7141_p7 = scmp.lt.s32.totalorder %s7132_s13, %s7132_s13 }
  0x5c   : > { %p7135_p2 = pnand %p7133_p10, %p7374_p0  ;;  %p7142_p8 = por %p7141_p7, %p7140_p4 }
  0x5e   : > { %p7136_p3 = pneg %p7135_p2 }
  0x60   : > { %p7143_p11 = pnand %p7142_p8, %p7136_p3 }
  0x62   : > { %7146 = shalt.err (!%p7143_p11)
}
  0x63   : > { %s7254_s11 = smov 64   ;;  %s7255_s15 = smov 4  }
  0x64   : > { %6678 = dma.hbm_to_vmem [thread:$0]  (!%p7358_p12), %s8386_s4, 36864, %s7364_s16, [#allocation6], %s7254_s11, %s7254_s11, %s7255_s15  }
  0x65   : > { %s7256_s19 = smov [#allocation8]   ;;  %s7147_s10 = scalar_lea.hbm %s8387_s5, 64 }
  0x66   : > { %s234_s20 = sshll.u32 %s7256_s19, 4  ;;  %p7148_p13 = scmp.ne.s32.totalorder %s8387_s5, %s7147_s10  ;;  %s235_s20 = int_to_ptr.vmem [resolvable:$true] %s234_s20 }
  0x67   : > { %p7154_p5 = scmp.lt.u32.totalorder %s7147_s10, %s8387_s5 }
  0x68   : > { %p7150_p1 = pnand %p7148_p13, %p7374_p0 }
  0x6a   : > { %p7151_p6 = pneg %p7150_p1 }
  0x6c   : > { %p7156_p9 = pnand %p7154_p5, %p7151_p6 }
  0x6e   : > { %7159 = shalt.err (!%p7156_p9)
}
  0x6f   : > { %s7160_s16 = scalar_lea.vmem %s235_s20, 64  ;;  %p7168_p4 = scmp.lt.s32.totalorder %s235_s20, %s235_s20 }
  0x70   : > { %p7161_p10 = scmp.ne.s32.totalorder %s235_s20, %s7160_s16  ;;  %p7169_p7 = scmp.lt.s32.totalorder %s7160_s16, %s7160_s16 }
  0x72   : > { %p7163_p2 = pnand %p7161_p10, %p7374_p0  ;;  %p7170_p8 = por %p7169_p7, %p7168_p4 }
  0x74   : > { %p7164_p3 = pneg %p7163_p2 }
  0x76   : > { %p7171_p11 = pnand %p7170_p8, %p7164_p3 }
  0x78   : > { %7174 = shalt.err (!%p7171_p11)
}
  0x79   : > { %s7257_s11 = smov 16   ;;  %s7258_s15 = smov 1  }
  0x7a   : > { %6681 = dma.hbm_to_vmem [thread:$0]  (!%p7358_p12), %s8387_s5, 64, %s235_s20, [#allocation9], %s7257_s11, %s7257_s11, %s7258_s15  }
  0x7b   : > { %p8401_p13 = scmp.ne.s32.totalorder %s8396_s9, 0 }
  0x7c   : > { %p8402_p1 = scmp.eq.s32.totalorder (!%p8401_p13), %s7322_s25, 0 }
  0x7d   : > { %259 = sbr.rel (%p8401_p13) target bundleno = 2802 (0xaf2), region = 44 }
  0x84   : > { %7220 = dma.done.wait (%p8402_p1), [#allocation3], 64   ;;  %p8403_p0 = pmov %p8402_p1 }
  0x86   : > { %7222 = vsyncadd (%p8403_p0), [#allocation3], 4294967232  ;;  %p8404_p6 = pmov %p8403_p0 }
  0x87   : > { %p8405_p5 = pmov %p8403_p0 }
  0x88   : > { %7224 = dma.done.wait (%p8404_p6), [#allocation6], 36896  }
  0x89   : > { %7226 = vsyncadd (%p8405_p5), [#allocation6], 4294930400  ;;  %p8406_p9 = pmov %p8403_p0 }
  0x8a   : > { %p8407_p12 = pmov %p8403_p0 }
  0x8b   : > { %7228 = dma.done.wait (%p8406_p9), [#allocation9], 64  }
  0x8c   : > { %7230 = vsyncadd (%p8407_p12), [#allocation9], 4294967232  ;;  %vm356_vm0 = vcmask 1040384   ;;  %v7259_v0 = vmov 0   ;;  %s5068_s3 = sshll.u32 %s7322_s25, 1  ;;  %vm357_vm1 = vcmask 1041408   ;;  %v333_v17 = vlaneseq }
  0x8d   : > { %398 = vmatprep.mubr.bf16.mxu0 %v7259_v0  ;;  %p302_p10 = scmp.lt.s32.totalorder %s5068_s3, 3  ;;  %v7260_v1 = vmov 65535   ;;  %v5070_v4 = vld.sshfl [vmem:[#allocation2] sm:$0x33 pattern:$0x76325410] }
  0x8e   : > { %v358_v2 = vsel %vm356_vm0, 4294967295, %v7260_v1  ;;  %v351_v5 = vcombine.high %v5070_v4, %v5070_v4  ;;  %vm352_vm2 = vcmask 23552   ;;  %v7261_v11 = vmov 0.0   ;;  %v6751_v12 = vld [vmem:[#allocation7 + $0x40] sm:$0xff]   ;;  %v6752_v13 = vld [vmem:[#allocation7 + $0x48] sm:$0xff]   ;;  %v6753_v14 = vld [vmem:[#allocation7 + $0x50] sm:$0xff]  }
  0x8f   : > { %s8415_s3 = smov (!%p302_p10, %s5068_s3), 3  ;;  %v359_v3 = vsel %vm357_vm1, %v358_v2, 0  ;;  %5779 = vmatprep.subr.bf16.mxu1 %v7261_v11  ;;  %vm7262_vm3 = vmmov 0   ;;  %v6755_v15 = vld [vmem:[#allocation7 + $0x58] sm:$0xff]   ;;  %v6756_v16 = vld [vmem:[#allocation7 + $0x60] sm:$0xff]   ;;  %v7483_v18 = vshrl.u32 %v333_v17, 7 }
  0x90   : > { %s5069_s9 = sshll.u32 %s8415_s3, 3  ;;  %v361_v8 = vand.u32 %v5070_v4, %v359_v3  ;;  %v364_v9 = vand.u32 %v359_v3, %v351_v5  ;;  %5781 = vmatprep.mubr.msk.bf16.mxu1 %vm7262_vm3, %v7261_v11  ;;  %v7486_v20 = vld [vmem:[#allocation5] sm:$0x3]  ;;  %vm455_vm4 = vcmask 130048   ;;  %v6750_v30 = vld [vmem:[#allocation7 + $0x80] sm:$0xff]   ;;  %v6754_v31 = vld [vmem:[#allocation7 + $0x88] sm:$0xff]  }
  0x91   : > { %s305_s18 = scalar_lea.vmem %s8382_s0, %s5069_s9  ;;  %v339_v19 = vsub.s32 1, %v7483_v18  ;;  %v7502_v29 = vld [vmem:[%s8383_s1] sm:$0xff]   ;;  %v7513_v32 = vld [vmem:[%s8383_s1 + $0x8] sm:$0xff]   ;;  %v6757_v33 = vld [vmem:[#allocation7 + $0x90] sm:$0xff]   ;;  %s298_s26 = sand.u32 1, %s7241_s22  }
  0x92   : > { %v327_v6 = vld [vmem:[%s305_s18] sm:$0xff]  ;;  %v328_v7 = vld [vmem:[%s305_s18 + $0x8] sm:$0xff]  ;;  %366 = vmatprep.subr.bf16.mxu0 %v364_v9  ;;  %v7524_v34 = vld [vmem:[%s8383_s1 + $0x10] sm:$0xff]   ;;  %s5067_s29 = sshll.u32 %s298_s26, 4  ;;  %s5414_s10 = sshll.u32 %s7322_s25, 8 }
  0x93   : > { %v329_v10 = vpack.c.bf16 %v328_v7, %v327_v6  ;;  %367 = vmatpush1.bf16.msra.mxu0 %v361_v8  ;;  %v340_v22 = vrot.slane %v7486_v20, %v339_v19  ;;  %v7533_v35 = vld [vmem:[%s8383_s1 + $0x18] sm:$0xff]   ;;  %v7542_v36 = vld [vmem:[%s8383_s1 + $0x20] sm:$0xff]   ;;  %v7551_v37 = vld [vmem:[%s8383_s1 + $0x28] sm:$0xff]   ;;  %s300_s12 = scalar_lea.vmem [#allocation10], %s5067_s29  ;;  %s8337_s15 = scalar_lea.hbm %s8388_s6, %s5414_s10 }
  0x94   : > { %5817 = vmatprep.subr.bf16.mxu0 %v7261_v11  ;;  %v7560_v38 = vld [vmem:[%s8383_s1 + $0x30] sm:$0xff]   ;;  %v7569_v39 = vld [vmem:[%s8383_s1 + $0x38] sm:$0xff]   ;;  %v7578_v40 = vld [vmem:[%s8383_s1 + $0x40] sm:$0xff]   ;;  %s4952_s13 = sshll.u32 %s300_s12, 4  ;;  %s8341_s17 = scalar_lea.sflag [#allocation4], %s298_s26  ;;  %s8339_s13 = int_to_ptr.vmem [resolvable:$true] %s4952_s13 }
  0x95   : > { %v6758_v41 = vld [vmem:[#allocation7 + $0x68] sm:$0xff]   ;;  %v6759_v42 = vld [vmem:[#allocation7 + $0x70] sm:$0xff]   ;;  %v6760_v43 = vld [vmem:[#allocation7 + $0x98] sm:$0xff]   ;;  %s7175_s25 = scalar_lea.vmem %s8339_s13, 256  ;;  %p8408_p3 = scmp.ne.s32.totalorder %s8394_s7, 0 }
  0x96   : > { %5071 = vmatmul.mubr.msk.bf16.vlgmr.msra.gmra.mrb[0].mxu0 %vm352_vm2, %v329_v10  ;;  %v6761_v44 = vld [vmem:[#allocation7 + $0x78] sm:$0xff]   ;;  %v6763_v45 = vld [vmem:[#allocation7 + $0xa0] sm:$0xff]   ;;  %v6767_v46 = vld [vmem:[#allocation7 + $0xa8] sm:$0xff]   ;;  %p7176_p2 = scmp.ne.s32.totalorder %s8339_s13, %s7175_s25  ;;  %s7263_s2 = smov [#allocation10]  }
  0x97   : > { %5833 = vmatprep.mubr.msk.bf16.mxu0 %vm7262_vm3, %v7261_v11  ;;  %5818 = vmatpush3.bf16.msra.mxu0 %v6751_v12  ;;  %v6770_v47 = vld [vmem:[#allocation7 + $0xb0] sm:$0xff]   ;;  %v6772_v48 = vld [vmem:[#allocation7 + $0xb8] sm:$0xff]   ;;  %v6762_v57 = vld [vmem:[#allocation7] sm:$0xff]   ;;  %s7179_s3 = sshll.u32 %s7263_s2, 4  ;;  %s7180_s3 = int_to_ptr.vmem [resolvable:$false] %s7179_s3 }
  0x98   : > { %5819 = vmatprep.subr.bf16.mxu0 %v7261_v11  ;;  %v6764_v60 = vld [vmem:[#allocation7 + $0x8] sm:$0xff]   ;;  %v6765_v63 = vld [vmem:[#allocation7 + $0x10] sm:$0xff]   ;;  %v6774_v1 = vld [vmem:[#allocation7 + $0x100] sm:$0xff]   ;;  %p7177_p4 = pnand %p7176_p2, %p8408_p3  ;;  %s7181_s9 = scalar_lea.vmem %s7180_s3, 512 }
  0x99   : > { %v6766_v4 = vld [vmem:[#allocation7 + $0x18] sm:$0xff]   ;;  %v6776_v5 = vld [vmem:[#allocation7 + $0x108] sm:$0xff]   ;;  %v6768_v8 = vld [vmem:[#allocation7 + $0x20] sm:$0xff]   ;;  %p7182_p8 = scmp.lt.s32.totalorder %s8339_s13, %s7180_s3  ;;  %p7183_p11 = scmp.lt.s32.totalorder %s7181_s9, %s7175_s25 }
  0x9a   : > { %v6778_v9 = vld [vmem:[#allocation7 + $0x110] sm:$0xff]   ;;  %p7178_p7 = pneg %p7177_p4 }
  0x9b   : > { %5820 = vmatpush3.bf16.msra.mxu0 %v6752_v13  ;;  %v6771_v19 = vld [vmem:[#allocation7 + $0x30] sm:$0xff]   ;;  %p7184_p13 = por %p7183_p11, %p7182_p8 }
  0x9c   : > { %5821 = vmatprep.subr.bf16.mxu0 %v7261_v11 }
  0x9d   : > { %p7185_p1 = pnand %p7184_p13, %p7178_p7 }
  0x9f   : > { %5822 = vmatpush3.bf16.msra.mxu0 %v6753_v14  ;;  %v6769_v14 = vld [vmem:[#allocation7 + $0x28] sm:$0xff]  }
  0xa0   : > { %5823 = vmatprep.subr.bf16.mxu0 %v7261_v11 }
  0xa3   : > { %5824 = vmatpush3.bf16.msra.mxu0 %v6755_v15  ;;  %v6780_v15 = vld [vmem:[#allocation7 + $0x118] sm:$0xff]  }
  0xa4   : > { %5825 = vmatprep.subr.bf16.mxu0 %v7261_v11 }
  0xa7   : > { %5826 = vmatpush3.bf16.msra.mxu0 %v6756_v16 }
  0xa8   : > { %5827 = vmatprep.subr.bf16.mxu0 %v7261_v11 }
  0xab   : > { %5828 = vmatpush3.bf16.msra.mxu0 %v6758_v41 }
  0xac   : > { %5829 = vmatprep.subr.bf16.mxu0 %v7261_v11 }
  0xaf   : > { %5830 = vmatpush3.bf16.msra.mxu0 %v6759_v42  ;;  %v6775_v42 = vld [vmem:[#allocation7 + $0xc0] sm:$0xff]  }
  0xb0   : > { %5831 = vmatprep.subr.bf16.mxu0 %v7261_v11 }
  0xb3   : > { %5832 = vmatpush3.bf16.msra.mxu0 %v6761_v44 }
  0xb4   : > { %5837 = vmatprep.subr.bf16.mxu0 %v7261_v11 }
 0x169   : > { %v7488_v21 = vpop.f32.mrb[0].mxu0 }
 0x16a   : > { %v402_v23 = vpop.f32.mrb[1].mxu0 }
 0x16b   : > { %v7491_v24 = vpop.f32.mrb[2].mxu0  ;;  %v7493_v26 = vadd.f32 %v402_v23, %v340_v22 }
 0x16c   : > { %v406_v25 = vpop.f32.mrb[3].mxu0 }
 0x16d   : > { %v7495_v27 = vadd.f32 %v406_v25, %v340_v22  ;;  %v6782_v22 = vld [vmem:[#allocation7 + $0x120] sm:$0xff]  }
 0x16f   : > { %v409_v28 = vpack.c.bf16 %v7495_v27, %v7493_v26 }
 0x171   : > { %5780 = vmatpush3.bf16.msra.mxu1 %v409_v28 }
 0x172   : > { %5857 = vmatprep.subr.bf16.mxu1 %v7261_v11 }
 0x174   : > { %5782 = vmatmul.mubr.msk.bf16.vlgmr.msra.gmra.mrb[0].mxu1 %vm455_vm4, %v7502_v29 }
 0x175   : > { %5785 = vmatprep.mubr.msk.bf16.mxu1 %vm7262_vm3, %v7261_v11  ;;  %5858 = vmatpush3.bf16.msra.mxu1 %v6750_v30  ;;  %v6773_v30 = vld [vmem:[#allocation7 + $0x38] sm:$0xff]  }
 0x176   : > { %5859 = vmatprep.subr.bf16.mxu1 %v7261_v11 }
 0x179   : > { %5860 = vmatpush3.bf16.msra.mxu1 %v6754_v31  ;;  %v6784_v31 = vld [vmem:[#allocation7 + $0x128] sm:$0xff]  }
 0x17a   : > { %5861 = vmatprep.subr.bf16.mxu1 %v7261_v11 }
 0x17c   : > { %5786 = vmatmul.mubr.msk.bf16.gmra.mrb[4].mxu1 %vm455_vm4, %v7513_v32 }
 0x17d   : > { %5789 = vmatprep.mubr.msk.bf16.mxu1 %vm7262_vm3, %v7261_v11  ;;  %5862 = vmatpush3.bf16.msra.mxu1 %v6757_v33 }
 0x17e   : > { %5863 = vmatprep.subr.bf16.mxu1 %v7261_v11 }
 0x181   : > { %5864 = vmatpush3.bf16.msra.mxu1 %v6760_v43  ;;  %v6786_v43 = vld [vmem:[#allocation7 + $0x130] sm:$0xff]  }
 0x182   : > { %5865 = vmatprep.subr.bf16.mxu1 %v7261_v11 }
 0x184   : > { %5790 = vmatmul.mubr.msk.bf16.gmra.mrb[8].mxu1 %vm455_vm4, %v7524_v34 }
 0x185   : > { %5793 = vmatprep.mubr.msk.bf16.mxu1 %vm7262_vm3, %v7261_v11  ;;  %5866 = vmatpush3.bf16.msra.mxu1 %v6763_v45 }
 0x186   : > { %5867 = vmatprep.subr.bf16.mxu1 %v7261_v11 }
 0x189   : > { %5868 = vmatpush3.bf16.msra.mxu1 %v6767_v46 }
 0x18a   : > { %5869 = vmatprep.subr.bf16.mxu1 %v7261_v11 }
 0x18c   : > { %5794 = vmatmul.mubr.msk.bf16.gmra.mrb[12].mxu1 %vm455_vm4, %v7533_v35 }
 0x18d   : > { %5797 = vmatprep.mubr.msk.bf16.mxu1 %vm7262_vm3, %v7261_v11  ;;  %5870 = vmatpush3.bf16.msra.mxu1 %v6770_v47  ;;  %v6777_v47 = vld [vmem:[#allocation7 + $0xc8] sm:$0xff]  }
 0x18e   : > { %5871 = vmatprep.subr.bf16.mxu1 %v7261_v11 }
 0x191   : > { %5872 = vmatpush3.bf16.msra.mxu1 %v6772_v48  ;;  %v6788_v48 = vld [vmem:[#allocation7 + $0x138] sm:$0xff]  }
 0x192   : > { %5897 = vmatprep.subr.bf16.mxu1 %v7261_v11 }
 0x194   : > { %5798 = vmatmul.mubr.msk.bf16.gmra.mrb[16].mxu1 %vm455_vm4, %v7542_v36 }
 0x195   : > { %5801 = vmatprep.mubr.msk.bf16.mxu1 %vm7262_vm3, %v7261_v11 }
 0x19c   : > { %5802 = vmatmul.mubr.msk.bf16.gmra.mrb[20].mxu1 %vm455_vm4, %v7551_v37 }
 0x19d   : > { %5805 = vmatprep.mubr.msk.bf16.mxu1 %vm7262_vm3, %v7261_v11 }
 0x1a4   : > { %5806 = vmatmul.mubr.msk.bf16.gmra.mrb[24].mxu1 %vm455_vm4, %v7560_v38 }
 0x1a5   : > { %5809 = vmatprep.mubr.msk.bf16.mxu1 %vm7262_vm3, %v7261_v11 }
 0x1ac   : > { %5810 = vmatmul.mubr.msk.bf16.gmra.mrb[28].mxu1 %vm455_vm4, %v7569_v39 }
 0x1ad   : > { %5813 = vmatprep.mubr.msk.bf16.mxu1 %vm7262_vm3, %v7261_v11 }
 0x1b4   : > { %5814 = vmatmul.mubr.msk.bf16.gmra.mrb[32].mxu1 %vm455_vm4, %v7578_v40 }
 0x1b5   : > { %5873 = vmatprep.mubr.msk.bf16.mxu1 %vm7262_vm3, %v7261_v11 }
 0x247   : > { %v7592_v49 = vpop.f32.mrb[0].mxu1 }
 0x248   : > { %v5783_v50 = vpop.f32.mrb[1].mxu1 }
 0x249   : > { %v7594_v51 = vpop.f32.mrb[2].mxu1 }
 0x24a   : > { %v588_v52 = vpack.c.bf16 %v7594_v51, %v7592_v49  ;;  %v5784_v53 = vpop.f32.mrb[3].mxu1 }
 0x24f   : > { %v525_v54 = vpop.f32.mrb[4].mxu1 }
 0x250   : > { %v5787_v55 = vpop.f32.mrb[5].mxu1 }
 0x251   : > { %v528_v56 = vpop.f32.mrb[6].mxu1  ;;  %v6790_v55 = vld [vmem:[#allocation7 + $0x180] sm:$0xff]  }
 0x252   : > { %v589_v58 = vpack.c.bf16 %v528_v56, %v525_v54  ;;  %v5788_v59 = vpop.f32.mrb[7].mxu1  ;;  %v6779_v54 = vld [vmem:[#allocation7 + $0xd0] sm:$0xff]   ;;  %v6781_v56 = vld [vmem:[#allocation7 + $0xd8] sm:$0xff]  }
 0x254   : > { %5834 = vmatmul.mubr.bf16.vlgmr.msra.gmra.mrb[4].mxu0 %v589_v58 }
 0x255   : > { %5838 = vmatpush3.bf16.msra.mxu0 %v6762_v57  ;;  %5853 = vmatprep.mubr.msk.bf16.mxu0 %vm7262_vm3, %v7261_v11  ;;  %v6792_v57 = vld [vmem:[#allocation7 + $0x188] sm:$0xff]  }
 0x256   : > { %5839 = vmatprep.subr.bf16.mxu0 %v7261_v11 }
 0x257   : > { %v533_v61 = vpop.f32.mrb[8].mxu1 }
 0x258   : > { %v5791_v62 = vpop.f32.mrb[9].mxu1 }
 0x259   : > { %5840 = vmatpush3.bf16.msra.mxu0 %v6764_v60  ;;  %v536_v0 = vpop.f32.mrb[10].mxu1  ;;  %v6783_v60 = vld [vmem:[#allocation7 + $0xe0] sm:$0xff]  }
 0x25a   : > { %5841 = vmatprep.subr.bf16.mxu0 %v7261_v11  ;;  %v590_v2 = vpack.c.bf16 %v536_v0, %v533_v61  ;;  %v5792_v3 = vpop.f32.mrb[11].mxu1  ;;  %v6794_v61 = vld [vmem:[#allocation7 + $0x190] sm:$0xff]  }
 0x25c   : > { %5874 = vmatmul.mubr.bf16.vlgmr.msra.gmra.mrb[36].mxu1 %v590_v2  ;;  %v6796_v2 = vld [vmem:[#allocation7 + $0x198] sm:$0xff]  }
 0x25d   : > { %5842 = vmatpush3.bf16.msra.mxu0 %v6765_v63  ;;  %5898 = vmatpush3.bf16.msra.mxu1 %v6774_v1  ;;  %v6785_v1 = vld [vmem:[#allocation7 + $0xe8] sm:$0xff]  }
 0x25e   : > { %5843 = vmatprep.subr.bf16.mxu0 %v7261_v11  ;;  %5899 = vmatprep.subr.bf16.mxu1 %v7261_v11 }
 0x25f   : > { %v7604_v6 = vpop.f32.mrb[12].mxu1  ;;  %5913 = vmatprep.mubr.msk.bf16.mxu1 %vm7262_vm3, %v7261_v11 }
 0x260   : > { %v5795_v7 = vpop.f32.mrb[13].mxu1 }
 0x261   : > { %5844 = vmatpush3.bf16.msra.mxu0 %v6766_v4  ;;  %5900 = vmatpush3.bf16.msra.mxu1 %v6776_v5  ;;  %v7608_v10 = vpop.f32.mrb[14].mxu1  ;;  %v6787_v5 = vld [vmem:[#allocation7 + $0xf0] sm:$0xff]   ;;  %v6798_v7 = vld [vmem:[#allocation7 + $0x1a0] sm:$0xff]  }
 0x262   : > { %5845 = vmatprep.subr.bf16.mxu0 %v7261_v11  ;;  %5901 = vmatprep.subr.bf16.mxu1 %v7261_v11  ;;  %v591_v12 = vpack.c.bf16 %v7608_v10, %v7604_v6  ;;  %v5796_v13 = vpop.f32.mrb[15].mxu1  ;;  %v6797_v6 = vld [vmem:[#allocation7 + $0x158] sm:$0xff]   ;;  %v6808_v10 = vld [vmem:[#allocation7 + $0x208] sm:$0xff]  }
 0x265   : > { %5846 = vmatpush3.bf16.msra.mxu0 %v6768_v8  ;;  %5902 = vmatpush3.bf16.msra.mxu1 %v6778_v9 }
 0x266   : > { %5847 = vmatprep.subr.bf16.mxu0 %v7261_v11  ;;  %5903 = vmatprep.subr.bf16.mxu1 %v7261_v11 }
 0x267   : > { %v549_v16 = vpop.f32.mrb[16].mxu1 }
 0x268   : > { %v5799_v17 = vpop.f32.mrb[17].mxu1 }
 0x269   : > { %5848 = vmatpush3.bf16.msra.mxu0 %v6769_v14  ;;  %5904 = vmatpush3.bf16.msra.mxu1 %v6780_v15  ;;  %v552_v23 = vpop.f32.mrb[18].mxu1  ;;  %v6789_v14 = vld [vmem:[#allocation7 + $0xf8] sm:$0xff]   ;;  %v6800_v15 = vld [vmem:[#allocation7 + $0x1a8] sm:$0xff]   ;;  %v6802_v17 = vld [vmem:[#allocation7 + $0x1b0] sm:$0xff]  }
 0x26a   : > { %5849 = vmatprep.subr.bf16.mxu0 %v7261_v11  ;;  %5905 = vmatprep.subr.bf16.mxu1 %v7261_v11  ;;  %v592_v25 = vpack.c.bf16 %v552_v23, %v549_v16  ;;  %v5800_v28 = vpop.f32.mrb[19].mxu1  ;;  %v6791_v16 = vld [vmem:[#allocation7 + $0x140] sm:$0xff]   ;;  %v6795_v23 = vld [vmem:[#allocation7 + $0x150] sm:$0xff]  }
 0x26b   : > { %v6810_v28 = vld [vmem:[#allocation7 + $0x210] sm:$0xff]  }
 0x26d   : > { %5850 = vmatpush3.bf16.msra.mxu0 %v6771_v19  ;;  %5906 = vmatpush3.bf16.msra.mxu1 %v6782_v22  ;;  %v6793_v19 = vld [vmem:[#allocation7 + $0x148] sm:$0xff]   ;;  %v6804_v22 = vld [vmem:[#allocation7 + $0x1b8] sm:$0xff]  }
 0x26e   : > { %5851 = vmatprep.subr.bf16.mxu0 %v7261_v11  ;;  %5907 = vmatprep.subr.bf16.mxu1 %v7261_v11 }
 0x26f   : > { %v7620_v33 = vpop.f32.mrb[20].mxu1 }
 0x270   : > { %v5803_v41 = vpop.f32.mrb[21].mxu1 }
 0x271   : > { %5852 = vmatpush3.bf16.msra.mxu0 %v6773_v30  ;;  %5908 = vmatpush3.bf16.msra.mxu1 %v6784_v31  ;;  %v7622_v44 = vpop.f32.mrb[22].mxu1  ;;  %v6801_v30 = vld [vmem:[#allocation7 + $0x168] sm:$0xff]   ;;  %v6812_v31 = vld [vmem:[#allocation7 + $0x218] sm:$0xff]   ;;  %v6803_v41 = vld [vmem:[#allocation7 + $0x170] sm:$0xff]  }
 0x272   : > { %5877 = vmatprep.subr.bf16.mxu0 %v7261_v11  ;;  %5909 = vmatprep.subr.bf16.mxu1 %v7261_v11  ;;  %v593_v45 = vpack.c.bf16 %v7622_v44, %v7620_v33  ;;  %v5804_v46 = vpop.f32.mrb[23].mxu1  ;;  %v6813_v33 = vld [vmem:[#allocation7 + $0x1d8] sm:$0xff]   ;;  %v6815_v44 = vld [vmem:[#allocation7 + $0x1e0] sm:$0xff]  }
 0x273   : > { %v6816_v46 = vld [vmem:[#allocation7 + $0x228] sm:$0xff]  }
 0x274   : > { %5854 = vmatmul.mubr.bf16.vlgmr.msra.gmra.mrb[8].mxu0 %v588_v52 }
 0x275   : > { %5878 = vmatpush3.bf16.msra.mxu0 %v6775_v42  ;;  %5910 = vmatpush3.bf16.msra.mxu1 %v6786_v43  ;;  %v6814_v42 = vld [vmem:[#allocation7 + $0x220] sm:$0xff]   ;;  %v6805_v43 = vld [vmem:[#allocation7 + $0x178] sm:$0xff]  }
 0x276   : > { %5879 = vmatprep.subr.bf16.mxu0 %v7261_v11  ;;  %5911 = vmatprep.subr.bf16.mxu1 %v7261_v11 }
 0x277   : > { %5893 = vmatprep.mubr.msk.bf16.mxu0 %vm7262_vm3, %v7261_v11  ;;  %v7635_v50 = vpop.f32.mrb[24].mxu1 }
 0x278   : > { %v5807_v53 = vpop.f32.mrb[25].mxu1 }
 0x279   : > { %5880 = vmatpush3.bf16.msra.mxu0 %v6777_v47  ;;  %5912 = vmatpush3.bf16.msra.mxu1 %v6788_v48  ;;  %v7637_v49 = vpop.f32.mrb[26].mxu1  ;;  %v6807_v47 = vld [vmem:[#allocation7 + $0x1c0] sm:$0xff]   ;;  %v6818_v48 = vld [vmem:[#allocation7 + $0x230] sm:$0xff]   ;;  %v6820_v53 = vld [vmem:[#allocation7 + $0x238] sm:$0xff]  }
 0x27a   : > { %5881 = vmatprep.subr.bf16.mxu0 %v7261_v11  ;;  %5937 = vmatprep.subr.bf16.mxu1 %v7261_v11  ;;  %v594_v51 = vpack.c.bf16 %v7637_v49, %v7635_v50  ;;  %v5808_v52 = vpop.f32.mrb[27].mxu1  ;;  %v6809_v50 = vld [vmem:[#allocation7 + $0x1c8] sm:$0xff]   ;;  %v6821_v49 = vld [vmem:[#allocation7 + $0x1f8] sm:$0xff]  }
 0x27c   : > { %5914 = vmatmul.mubr.bf16.vlgmr.msra.gmra.mrb[40].mxu1 %v592_v25  ;;  %v6806_v25 = vld [vmem:[#allocation7 + $0x200] sm:$0xff]  }
 0x27d   : > { %5882 = vmatpush3.bf16.msra.mxu0 %v6779_v54  ;;  %5938 = vmatpush3.bf16.msra.mxu1 %v6790_v55  ;;  %v6811_v54 = vld [vmem:[#allocation7 + $0x1d0] sm:$0xff]  }
 0x27e   : > { %5883 = vmatprep.subr.bf16.mxu0 %v7261_v11  ;;  %5939 = vmatprep.subr.bf16.mxu1 %v7261_v11  ;;  %v6819_v55 = vld [vmem:[#allocation7 + $0x1f0] sm:$0xff]  }
 0x27f   : > { %5953 = vmatprep.mubr.msk.bf16.mxu1 %vm7262_vm3, %v7261_v11  ;;  %v7647_v58 = vpop.f32.mrb[28].mxu1 }
 0x280   : > { %v5811_v59 = vpop.f32.mrb[29].mxu1 }
 0x281   : > { %5884 = vmatpush3.bf16.msra.mxu0 %v6781_v56  ;;  %5940 = vmatpush3.bf16.msra.mxu1 %v6792_v57  ;;  %v7649_v62 = vpop.f32.mrb[30].mxu1 }
 0x282   : > { %5885 = vmatprep.subr.bf16.mxu0 %v7261_v11  ;;  %5941 = vmatprep.subr.bf16.mxu1 %v7261_v11  ;;  %v595_v63 = vpack.c.bf16 %v7649_v62, %v7647_v58  ;;  %v5812_v0 = vpop.f32.mrb[31].mxu1 }
 0x285   : > { %5886 = vmatpush3.bf16.msra.mxu0 %v6783_v60  ;;  %5942 = vmatpush3.bf16.msra.mxu1 %v6794_v61 }
 0x286   : > { %5887 = vmatprep.subr.bf16.mxu0 %v7261_v11  ;;  %5943 = vmatprep.subr.bf16.mxu1 %v7261_v11 }
 0x287   : > { %v7657_v3 = vpop.f32.mrb[32].mxu1 }
 0x288   : > { %v5815_v4 = vpop.f32.mrb[33].mxu1 }
 0x289   : > { %5888 = vmatpush3.bf16.msra.mxu0 %v6785_v1  ;;  %5944 = vmatpush3.bf16.msra.mxu1 %v6796_v2  ;;  %v7659_v8 = vpop.f32.mrb[34].mxu1 }
 0x28a   : > { %5889 = vmatprep.subr.bf16.mxu0 %v7261_v11  ;;  %5945 = vmatprep.subr.bf16.mxu1 %v7261_v11  ;;  %v596_v9 = vpack.c.bf16 %v7659_v8, %v7657_v3  ;;  %v5816_v13 = vpop.f32.mrb[35].mxu1 }
 0x28d   : > { %5890 = vmatpush3.bf16.msra.mxu0 %v6787_v5  ;;  %5946 = vmatpush3.bf16.msra.mxu1 %v6798_v7 }
 0x28e   : > { %5891 = vmatprep.subr.bf16.mxu0 %v7261_v11  ;;  %5947 = vmatprep.subr.bf16.mxu1 %v7261_v11 }
 0x291   : > { %5892 = vmatpush3.bf16.msra.mxu0 %v6789_v14  ;;  %5948 = vmatpush3.bf16.msra.mxu1 %v6800_v15 }
 0x292   : > { %5917 = vmatprep.subr.bf16.mxu0 %v7261_v11  ;;  %5949 = vmatprep.subr.bf16.mxu1 %v7261_v11 }
 0x294   : > { %5894 = vmatmul.mubr.bf16.vlgmr.msra.gmra.mrb[12].mxu0 %v591_v12  ;;  %v6799_v12 = vld [vmem:[#allocation7 + $0x160] sm:$0xff]  }
 0x295   : > { %5918 = vmatpush3.bf16.msra.mxu0 %v6791_v16  ;;  %5950 = vmatpush3.bf16.msra.mxu1 %v6802_v17 }
 0x296   : > { %5919 = vmatprep.subr.bf16.mxu0 %v7261_v11  ;;  %5951 = vmatprep.subr.bf16.mxu1 %v7261_v11 }
 0x297   : > { %5933 = vmatprep.mubr.msk.bf16.mxu0 %vm7262_vm3, %v7261_v11 }
 0x299   : > { %5920 = vmatpush3.bf16.msra.mxu0 %v6793_v19  ;;  %5952 = vmatpush3.bf16.msra.mxu1 %v6804_v22 }
 0x29a   : > { %5921 = vmatprep.subr.bf16.mxu0 %v7261_v11  ;;  %5977 = vmatprep.subr.bf16.mxu1 %v7261_v11 }
 0x29c   : > { %5954 = vmatmul.mubr.bf16.vlgmr.msra.gmra.mrb[44].mxu1 %v594_v51 }
 0x29d   : > { %5922 = vmatpush3.bf16.msra.mxu0 %v6795_v23  ;;  %5978 = vmatpush3.bf16.msra.mxu1 %v6806_v25 }
 0x29e   : > { %5923 = vmatprep.subr.bf16.mxu0 %v7261_v11  ;;  %5979 = vmatprep.subr.bf16.mxu1 %v7261_v11 }
 0x29f   : > { %5993 = vmatprep.mubr.msk.bf16.mxu1 %vm7262_vm3, %v7261_v11 }
 0x2a1   : > { %5924 = vmatpush3.bf16.msra.mxu0 %v6797_v6  ;;  %5980 = vmatpush3.bf16.msra.mxu1 %v6808_v10 }
 0x2a2   : > { %5925 = vmatprep.subr.bf16.mxu0 %v7261_v11  ;;  %5981 = vmatprep.subr.bf16.mxu1 %v7261_v11 }
 0x2a5   : > { %5926 = vmatpush3.bf16.msra.mxu0 %v6799_v12  ;;  %5982 = vmatpush3.bf16.msra.mxu1 %v6810_v28 }
 0x2a6   : > { %5927 = vmatprep.subr.bf16.mxu0 %v7261_v11  ;;  %5983 = vmatprep.subr.bf16.mxu1 %v7261_v11 }
 0x2a9   : > { %5928 = vmatpush3.bf16.msra.mxu0 %v6801_v30  ;;  %5984 = vmatpush3.bf16.msra.mxu1 %v6812_v31 }
 0x2aa   : > { %5929 = vmatprep.subr.bf16.mxu0 %v7261_v11  ;;  %5985 = vmatprep.subr.bf16.mxu1 %v7261_v11 }
 0x2ad   : > { %5930 = vmatpush3.bf16.msra.mxu0 %v6803_v41  ;;  %5986 = vmatpush3.bf16.msra.mxu1 %v6814_v42 }
 0x2ae   : > { %5931 = vmatprep.subr.bf16.mxu0 %v7261_v11  ;;  %5987 = vmatprep.subr.bf16.mxu1 %v7261_v11 }
 0x2b1   : > { %5932 = vmatpush3.bf16.msra.mxu0 %v6805_v43  ;;  %5988 = vmatpush3.bf16.msra.mxu1 %v6816_v46 }
 0x2b2   : > { %5957 = vmatprep.subr.bf16.mxu0 %v7261_v11  ;;  %5989 = vmatprep.subr.bf16.mxu1 %v7261_v11 }
 0x2b4   : > { %5934 = vmatmul.mubr.bf16.vlgmr.msra.gmra.mrb[16].mxu0 %v593_v45  ;;  %v6817_v45 = vld [vmem:[#allocation7 + $0x1e8] sm:$0xff]  }
 0x2b5   : > { %5958 = vmatpush3.bf16.msra.mxu0 %v6807_v47  ;;  %5990 = vmatpush3.bf16.msra.mxu1 %v6818_v48 }
 0x2b6   : > { %5959 = vmatprep.subr.bf16.mxu0 %v7261_v11  ;;  %5991 = vmatprep.subr.bf16.mxu1 %v7261_v11 }
 0x2b7   : > { %5973 = vmatprep.mubr.msk.bf16.mxu0 %vm7262_vm3, %v7261_v11 }
 0x2b9   : > { %5960 = vmatpush3.bf16.msra.mxu0 %v6809_v50  ;;  %5992 = vmatpush3.bf16.msra.mxu1 %v6820_v53 }
 0x2ba   : > { %5961 = vmatprep.subr.bf16.mxu0 %v7261_v11  ;;  %6035 = vmatprep.subr.bf16.mxu1 %v7261_v11 }
 0x2bc   : > { %5994 = vmatmul.mubr.bf16.vlgmr.msra.gmra.mrb[48].mxu1 %v596_v9 }
 0x2bd   : > { %5962 = vmatpush3.bf16.msra.mxu0 %v6811_v54  ;;  %6051 = vmatprep.mubr.msk.bf16.mxu1 %vm7262_vm3, %v7261_v11  ;;  %v6823_v54 = vld [vmem:[#allocation7 + $0x280] sm:$0xff]  }
 0x2be   : > { %5963 = vmatprep.subr.bf16.mxu0 %v7261_v11  ;;  %6036 = vmatpush3.bf16.msra.mxu1 %v6823_v54 }
 0x2bf   : > { %6037 = vmatprep.subr.bf16.mxu1 %v7261_v11 }
 0x2c1   : > { %5964 = vmatpush3.bf16.msra.mxu0 %v6813_v33 }
 0x2c2   : > { %5965 = vmatprep.subr.bf16.mxu0 %v7261_v11 }
 0x2c5   : > { %5966 = vmatpush3.bf16.msra.mxu0 %v6815_v44 }
 0x2c6   : > { %5967 = vmatprep.subr.bf16.mxu0 %v7261_v11 }
 0x2c9   : > { %5968 = vmatpush3.bf16.msra.mxu0 %v6817_v45  ;;  %v6824_v45 = vld [vmem:[#allocation7 + $0x288] sm:$0xff]  }
 0x2ca   : > { %5969 = vmatprep.subr.bf16.mxu0 %v7261_v11  ;;  %6038 = vmatpush3.bf16.msra.mxu1 %v6824_v45 }
 0x2cb   : > { %6039 = vmatprep.subr.bf16.mxu1 %v7261_v11 }
 0x2cd   : > { %5970 = vmatpush3.bf16.msra.mxu0 %v6819_v55  ;;  %v6825_v55 = vld [vmem:[#allocation7 + $0x290] sm:$0xff]  }
 0x2ce   : > { %5971 = vmatprep.subr.bf16.mxu0 %v7261_v11  ;;  %6040 = vmatpush3.bf16.msra.mxu1 %v6825_v55  ;;  %v6836_v55 = vld [vmem:[#allocation7 + $0x248] sm:$0xff]  }
 0x2cf   : > { %6041 = vmatprep.subr.bf16.mxu1 %v7261_v11 }
 0x2d1   : > { %5972 = vmatpush3.bf16.msra.mxu0 %v6821_v49  ;;  %v6827_v49 = vld [vmem:[#allocation7 + $0x298] sm:$0xff]  }
 0x2d2   : > { %5997 = vmatprep.subr.bf16.mxu0 %v7261_v11  ;;  %6042 = vmatpush3.bf16.msra.mxu1 %v6827_v49 }
 0x2d3   : > { %6043 = vmatprep.subr.bf16.mxu1 %v7261_v11 }
 0x2d4   : > { %5974 = vmatmul.mubr.bf16.vlgmr.msra.gmra.mrb[20].mxu0 %v595_v63 }
 0x2d5   : > { %5999 = vmatprep.mubr.msk.bf16.mxu0 %vm7262_vm3, %v7261_v11 }
 0x327   : > { %v712_v51 = vpop.f32.mrb[4].mxu0 }
 0x328   : > { %v5835_v52 = vpop.f32.mrb[5].mxu0 }
 0x329   : > { %v715_v56 = vpop.f32.mrb[6].mxu0 }
 0x32a   : > { %v5836_v57 = vpop.f32.mrb[7].mxu0 }
 0x32f   : > { %v907_v59 = vpop.f32.mrb[36].mxu1 }
 0x330   : > { %v5875_v60 = vpop.f32.mrb[37].mxu1 }
 0x331   : > { %v910_v61 = vpop.f32.mrb[38].mxu1 }
 0x332   : > { %v5876_v0 = vpop.f32.mrb[39].mxu1 }
 0x347   : > { %v801_v1 = vpop.f32.mrb[8].mxu0 }
 0x348   : > { %v802_v2 = vadd.f32 %v801_v1, %v712_v51  ;;  %v5855_v3 = vpop.f32.mrb[9].mxu0  ;;  %v6828_v51 = vld [vmem:[#allocation7 + $0x2a0] sm:$0xff]  }
 0x349   : > { %v804_v4 = vpop.f32.mrb[10].mxu0  ;;  %6044 = vmatpush3.bf16.msra.mxu1 %v6828_v51 }
 0x34a   : > { %v805_v5 = vadd.f32 %v804_v4, %v715_v56  ;;  %v5856_v7 = vpop.f32.mrb[11].mxu0  ;;  %v914_v8 = vadd.f32 %v907_v59, %v802_v2  ;;  %6045 = vmatprep.subr.bf16.mxu1 %v7261_v11  ;;  %v5162_v59 = vld [vmem:[#allocation8] ss:$0 sm:$0xff] }
 0x34c   : > { %v915_v58 = vadd.f32 %v910_v61, %v805_v5 }
 0x34f   : > { %v1123_v62 = vpop.f32.mrb[40].mxu1 }
 0x350   : > { %v5915_v63 = vpop.f32.mrb[41].mxu1 }
 0x351   : > { %v1126_v9 = vpop.f32.mrb[42].mxu1 }
 0x352   : > { %v5916_v13 = vpop.f32.mrb[43].mxu1 }
 0x367   : > { %v1015_v14 = vpop.f32.mrb[12].mxu0 }
 0x368   : > { %v1022_v15 = vadd.f32 %v1015_v14, %v914_v8  ;;  %v5895_v16 = vpop.f32.mrb[13].mxu0 }
 0x369   : > { %v1018_v17 = vpop.f32.mrb[14].mxu0  ;;  %v335_v16 = vsub.s32 0, %v7483_v18 }
 0x36a   : > { %v1023_v19 = vadd.f32 %v1018_v17, %v915_v58  ;;  %v5896_v22 = vpop.f32.mrb[15].mxu0  ;;  %v1130_v23 = vadd.f32 %v1123_v62, %v1022_v15 }
 0x36b   : > { %v336_v17 = vrot.slane %v7486_v20, %v335_v16  ;;  %v6822_v20 = vld [vmem:[#allocation7 + $0x2c0] sm:$0xff]  }
 0x36c   : > { %v1131_v25 = vadd.f32 %v1126_v9, %v1023_v19 }
 0x36f   : > { %v1339_v6 = vpop.f32.mrb[44].mxu1 }
 0x370   : > { %v5955_v10 = vpop.f32.mrb[45].mxu1 }
 0x371   : > { %v1342_v12 = vpop.f32.mrb[46].mxu1 }
 0x372   : > { %v5956_v28 = vpop.f32.mrb[47].mxu1 }
 0x387   : > { %v1231_v30 = vpop.f32.mrb[16].mxu0 }
 0x388   : > { %v1238_v31 = vadd.f32 %v1231_v30, %v1130_v23  ;;  %v5935_v41 = vpop.f32.mrb[17].mxu0  ;;  %v405_v30 = vadd.f32 %v7491_v24, %v336_v17  ;;  %v6829_v24 = vld [vmem:[#allocation7 + $0x2d0] sm:$0xff]  }
 0x389   : > { %v1234_v42 = vpop.f32.mrb[18].mxu0 }
 0x38a   : > { %v1239_v43 = vadd.f32 %v1234_v42, %v1131_v25  ;;  %v5936_v46 = vpop.f32.mrb[19].mxu0  ;;  %v1346_v47 = vadd.f32 %v1339_v6, %v1238_v31  ;;  %v401_v6 = vadd.f32 %v7488_v21, %v336_v17  ;;  %v6826_v21 = vld [vmem:[#allocation7 + $0x2c8] sm:$0xff]  }
 0x38c   : > { %v1347_v48 = vadd.f32 %v1342_v12, %v1239_v43 }
 0x38f   : > { %v1555_v50 = vpop.f32.mrb[48].mxu1 }
 0x390   : > { %v5995_v53 = vpop.f32.mrb[49].mxu1 }
 0x391   : > { %v1558_v33 = vpop.f32.mrb[50].mxu1 }
 0x392   : > { %v5996_v44 = vpop.f32.mrb[51].mxu1 }
 0x3a7   : > { %v1447_v52 = vpop.f32.mrb[20].mxu0 }
 0x3a8   : > { %v1454_v56 = vadd.f32 %v1447_v52, %v1346_v47  ;;  %v5975_v57 = vpop.f32.mrb[21].mxu0  ;;  %v6837_v52 = vld [vmem:[#allocation7 + $0x250] sm:$0xff]  }
 0x3a9   : > { %v1450_v60 = vpop.f32.mrb[22].mxu0  ;;  %v6846_v57 = vld [vmem:[#allocation7 + $0x340] sm:$0xff]  }
 0x3aa   : > { %v1562_v61 = vadd.f32 %v1555_v50, %v1454_v56  ;;  %v1455_v0 = vadd.f32 %v1450_v60, %v1347_v48  ;;  %v5976_v1 = vpop.f32.mrb[23].mxu0 }
 0x3ac   : > { %v1571_v2 = vadd.f32 %v5162_v59, %v1562_v61  ;;  %v1563_v3 = vadd.f32 %v1558_v33, %v1455_v0  ;;  %v6834_v33 = vld [vmem:[#allocation7 + $0x240] sm:$0xff]   ;;  %v6838_v61 = vld [vmem:[#allocation7 + $0x258] sm:$0xff]   ;;  %v6848_v0 = vld [vmem:[#allocation7 + $0x348] sm:$0xff]  }
 0x3ae   : > { %v1575_v4 = vmul.f32 0.044715, %v1571_v2  ;;  %v1572_v5 = vadd.f32 %v5162_v59, %v1563_v3  ;;  %v1573_v22 = vmul.f32 0.5, %v1571_v2  ;;  %v6840_v3 = vld [vmem:[#allocation7 + $0x260] sm:$0xff]  }
 0x3b0   : > { %v1577_v7 = vmul.f32 %v1575_v4, %v1571_v2  ;;  %v1576_v8 = vmul.f32 0.044715, %v1572_v5  ;;  %v1574_v10 = vmul.f32 0.5, %v1572_v5  ;;  %v6850_v4 = vld [vmem:[#allocation7 + $0x350] sm:$0xff]  }
 0x3b2   : > { %v1579_v58 = vmul.f32 %v1577_v7, %v1571_v2  ;;  %v1578_v62 = vmul.f32 %v1576_v8, %v1572_v5 }
 0x3b4   : > { %v1581_v63 = vadd.f32 %v1579_v58, %v1571_v2  ;;  %v1580_v9 = vmul.f32 %v1578_v62, %v1572_v5  ;;  %v6841_v58 = vld [vmem:[#allocation7 + $0x268] sm:$0xff]   ;;  %v6852_v62 = vld [vmem:[#allocation7 + $0x358] sm:$0xff]  }
 0x3b6   : > { %v1582_v13 = vadd.f32 %v1580_v9, %v1572_v5  ;;  %v1583_v14 = vmul.f32 0.7978846, %v1581_v63 }
 0x3b8   : > { %v1584_v15 = vmul.f32 0.7978846, %v1582_v13  ;;  %7038 = vtanh.f32 %v1583_v14  ;;  %v6843_v13 = vld [vmem:[#allocation7 + $0x270] sm:$0xff]   ;;  %v6854_v14 = vld [vmem:[#allocation7 + $0x360] sm:$0xff]  }
 0x3ba   : > { %7040 = vtanh.f32 %v1584_v15 }
 0x3c2   : > { %v7039_v19 = vpop.eup %7038 }
 0x3c3   : > { %v1587_v23 = vadd.f32 1.0, %v7039_v19  ;;  %v6845_v19 = vld [vmem:[#allocation7 + $0x278] sm:$0xff]  }
 0x3c4   : > { %v7041_v25 = vpop.eup %7040 }
 0x3c5   : > { %v1588_v12 = vadd.f32 1.0, %v7041_v25  ;;  %v1589_v28 = vmul.f32 %v1587_v23, %v1573_v22  ;;  %v6856_v22 = vld [vmem:[#allocation7 + $0x368] sm:$0xff]  }
 0x3c7   : > { %v1590_v31 = vmul.f32 %v1588_v12, %v1574_v10  ;;  %v7729_v41 = vadd.f32 %v1589_v28, %v401_v6  ;;  %v6847_v6 = vld [vmem:[#allocation7 + $0x300] sm:$0xff]   ;;  %v6858_v10 = vld [vmem:[#allocation7 + $0x370] sm:$0xff]  }
 0x3c9   : > { %v7731_v42 = vadd.f32 %v1590_v31, %v405_v30  ;;  %v6849_v31 = vld [vmem:[#allocation7 + $0x308] sm:$0xff]  }
 0x3cb   : > { %v1593_v18 = vpack.c.bf16 %v7731_v42, %v7729_v41 }
 0x3cd   : > { %5998 = vmatpush3.bf16.msra.mxu0 %v1593_v18  ;;  %v6860_v18 = vld [vmem:[#allocation7 + $0x378] sm:$0xff]  }
 0x3ce   : > { %6075 = vmatprep.subr.bf16.mxu0 %v7261_v11 }
 0x3d0   : > { %6000 = vmatmul.mubr.msk.bf16.vlgmr.msra.gmra.mrb[24].mxu0 %vm455_vm4, %v7502_v29  ;;  %v6830_v29 = vld [vmem:[#allocation7 + $0x2a8] sm:$0xff]  }
 0x3d1   : > { %6003 = vmatprep.mubr.msk.bf16.mxu0 %vm7262_vm3, %v7261_v11  ;;  %6076 = vmatpush3.bf16.msra.mxu0 %v6822_v20 }
 0x3d2   : > { %6077 = vmatprep.subr.bf16.mxu0 %v7261_v11  ;;  %6046 = vmatpush3.bf16.msra.mxu1 %v6830_v29  ;;  %v6862_v29 = vld [vmem:[#allocation7 + $0x3c0] sm:$0xff]  }
 0x3d3   : > { %6047 = vmatprep.subr.bf16.mxu1 %v7261_v11 }
 0x3d5   : > { %6078 = vmatpush3.bf16.msra.mxu0 %v6826_v21 }
 0x3d6   : > { %6079 = vmatprep.subr.bf16.mxu0 %v7261_v11 }
 0x3d8   : > { %6004 = vmatmul.mubr.msk.bf16.gmra.mrb[28].mxu0 %vm455_vm4, %v7513_v32  ;;  %v6831_v32 = vld [vmem:[#allocation7 + $0x2b0] sm:$0xff]  }
 0x3d9   : > { %6007 = vmatprep.mubr.msk.bf16.mxu0 %vm7262_vm3, %v7261_v11  ;;  %6080 = vmatpush3.bf16.msra.mxu0 %v6829_v24  ;;  %v6851_v24 = vld [vmem:[#allocation7 + $0x310] sm:$0xff]  }
 0x3da   : > { %6081 = vmatprep.subr.bf16.mxu0 %v7261_v11  ;;  %6048 = vmatpush3.bf16.msra.mxu1 %v6831_v32 }
 0x3db   : > { %6049 = vmatprep.subr.bf16.mxu1 %v7261_v11 }
 0x3e0   : > { %6008 = vmatmul.mubr.msk.bf16.gmra.mrb[32].mxu0 %vm455_vm4, %v7524_v34  ;;  %v6832_v34 = vld [vmem:[#allocation7 + $0x2d8] sm:$0xff]  }
 0x3e1   : > { %6011 = vmatprep.mubr.msk.bf16.mxu0 %vm7262_vm3, %v7261_v11  ;;  %6082 = vmatpush3.bf16.msra.mxu0 %v6832_v34 }
 0x3e2   : > { %6083 = vmatprep.subr.bf16.mxu0 %v7261_v11 }
 0x3e8   : > { %6012 = vmatmul.mubr.msk.bf16.gmra.mrb[36].mxu0 %vm455_vm4, %v7533_v35  ;;  %v6833_v35 = vld [vmem:[#allocation7 + $0x2b8] sm:$0xff]  }
 0x3e9   : > { %6015 = vmatprep.mubr.msk.bf16.mxu0 %vm7262_vm3, %v7261_v11  ;;  %6050 = vmatpush3.bf16.msra.mxu1 %v6833_v35 }
 0x3ea   : > { %6055 = vmatprep.subr.bf16.mxu1 %v7261_v11 }
 0x3f0   : > { %6016 = vmatmul.mubr.msk.bf16.gmra.mrb[40].mxu0 %vm455_vm4, %v7542_v36  ;;  %v6835_v36 = vld [vmem:[#allocation7 + $0x2e0] sm:$0xff]  }
 0x3f1   : > { %6019 = vmatprep.mubr.msk.bf16.mxu0 %vm7262_vm3, %v7261_v11  ;;  %6084 = vmatpush3.bf16.msra.mxu0 %v6835_v36  ;;  %v6853_v36 = vld [vmem:[#allocation7 + $0x318] sm:$0xff]  }
 0x3f2   : > { %6085 = vmatprep.subr.bf16.mxu0 %v7261_v11 }
 0x3f8   : > { %6020 = vmatmul.mubr.msk.bf16.gmra.mrb[44].mxu0 %vm455_vm4, %v7551_v37  ;;  %v6839_v37 = vld [vmem:[#allocation7 + $0x2e8] sm:$0xff]  }
 0x3f9   : > { %6023 = vmatprep.mubr.msk.bf16.mxu0 %vm7262_vm3, %v7261_v11  ;;  %6086 = vmatpush3.bf16.msra.mxu0 %v6839_v37  ;;  %v6864_v37 = vld [vmem:[#allocation7 + $0x3c8] sm:$0xff]  }
 0x3fa   : > { %6087 = vmatprep.subr.bf16.mxu0 %v7261_v11 }
 0x400   : > { %6024 = vmatmul.mubr.msk.bf16.gmra.mrb[48].mxu0 %vm455_vm4, %v7560_v38  ;;  %v6842_v38 = vld [vmem:[#allocation7 + $0x2f0] sm:$0xff]  }
 0x401   : > { %6027 = vmatprep.mubr.msk.bf16.mxu0 %vm7262_vm3, %v7261_v11  ;;  %6088 = vmatpush3.bf16.msra.mxu0 %v6842_v38 }
 0x402   : > { %6089 = vmatprep.subr.bf16.mxu0 %v7261_v11 }
 0x408   : > { %6028 = vmatmul.mubr.msk.bf16.gmra.mrb[52].mxu0 %vm455_vm4, %v7569_v39  ;;  %v6844_v39 = vld [vmem:[#allocation7 + $0x2f8] sm:$0xff]  }
 0x409   : > { %6031 = vmatprep.mubr.msk.bf16.mxu0 %vm7262_vm3, %v7261_v11  ;;  %6090 = vmatpush3.bf16.msra.mxu0 %v6844_v39 }
 0x40a   : > { %6115 = vmatprep.subr.bf16.mxu0 %v7261_v11 }
 0x410   : > { %6032 = vmatmul.mubr.msk.bf16.gmra.mrb[56].mxu0 %vm455_vm4, %v7578_v40 }
 0x411   : > { %6091 = vmatprep.mubr.msk.bf16.mxu0 %vm7262_vm3, %v7261_v11 }
 0x4a3   : > { %v7783_v40 = vpop.f32.mrb[24].mxu0 }
 0x4a4   : > { %v6001_v43 = vpop.f32.mrb[25].mxu0 }
 0x4a5   : > { %v7785_v46 = vpop.f32.mrb[26].mxu0  ;;  %v6866_v43 = vld [vmem:[#allocation7 + $0x3d0] sm:$0xff]  }
 0x4a6   : > { %v1699_v47 = vpack.c.bf16 %v7785_v46, %v7783_v40  ;;  %v6002_v48 = vpop.f32.mrb[27].mxu0  ;;  %v6855_v40 = vld [vmem:[#allocation7 + $0x320] sm:$0xff]  }
 0x4ab   : > { %v1636_v50 = vpop.f32.mrb[28].mxu0 }
 0x4ac   : > { %v6005_v53 = vpop.f32.mrb[29].mxu0 }
 0x4ad   : > { %v1639_v54 = vpop.f32.mrb[30].mxu0  ;;  %v6868_v53 = vld [vmem:[#allocation7 + $0x3d8] sm:$0xff]  }
 0x4ae   : > { %v1700_v44 = vpack.c.bf16 %v1639_v54, %v1636_v50  ;;  %v6006_v45 = vpop.f32.mrb[31].mxu0  ;;  %v6857_v50 = vld [vmem:[#allocation7 + $0x328] sm:$0xff]  }
 0x4af   : > { %v6870_v45 = vld [vmem:[#allocation7 + $0x3e0] sm:$0xff]  }
 0x4b0   : > { %6052 = vmatmul.mubr.bf16.vlgmr.msra.gmra.mrb[52].mxu1 %v1700_v44  ;;  %v6859_v44 = vld [vmem:[#allocation7 + $0x330] sm:$0xff]  }
 0x4b1   : > { %6056 = vmatpush3.bf16.msra.mxu1 %v6834_v33  ;;  %6071 = vmatprep.mubr.msk.bf16.mxu1 %vm7262_vm3, %v7261_v11 }
 0x4b2   : > { %6057 = vmatprep.subr.bf16.mxu1 %v7261_v11 }
 0x4b3   : > { %v1644_v49 = vpop.f32.mrb[32].mxu0 }
 0x4b4   : > { %v6009_v51 = vpop.f32.mrb[33].mxu0 }
 0x4b5   : > { %6058 = vmatpush3.bf16.msra.mxu1 %v6836_v55  ;;  %v1647_v56 = vpop.f32.mrb[34].mxu0 }
 0x4b6   : > { %6059 = vmatprep.subr.bf16.mxu1 %v7261_v11  ;;  %v1701_v59 = vpack.c.bf16 %v1647_v56, %v1644_v49  ;;  %v6010_v60 = vpop.f32.mrb[35].mxu0  ;;  %v6872_v56 = vld [vmem:[#allocation7 + $0x3e8] sm:$0xff]  }
 0x4b7   : > { %v6865_v60 = vld [vmem:[#allocation7 + $0x388] sm:$0xff]  }
 0x4b8   : > { %6092 = vmatmul.mubr.bf16.vlgmr.msra.gmra.mrb[60].mxu0 %v1701_v59  ;;  %v6874_v59 = vld [vmem:[#allocation7 + $0x3f0] sm:$0xff]  }
 0x4b9   : > { %6060 = vmatpush3.bf16.msra.mxu1 %v6837_v52  ;;  %6116 = vmatpush3.bf16.msra.mxu0 %v6846_v57  ;;  %v6861_v52 = vld [vmem:[#allocation7 + $0x338] sm:$0xff]   ;;  %v6863_v57 = vld [vmem:[#allocation7 + $0x380] sm:$0xff]  }
 0x4ba   : > { %6061 = vmatprep.subr.bf16.mxu1 %v7261_v11  ;;  %6117 = vmatprep.subr.bf16.mxu0 %v7261_v11 }
 0x4bb   : > { %v7795_v1 = vpop.f32.mrb[36].mxu0  ;;  %6131 = vmatprep.mubr.msk.bf16.mxu0 %vm7262_vm3, %v7261_v11 }
 0x4bc   : > { %v6013_v2 = vpop.f32.mrb[37].mxu0 }
 0x4bd   : > { %6062 = vmatpush3.bf16.msra.mxu1 %v6838_v61  ;;  %6118 = vmatpush3.bf16.msra.mxu0 %v6848_v0  ;;  %v7799_v5 = vpop.f32.mrb[38].mxu0  ;;  %v6876_v61 = vld [vmem:[#allocation7 + $0x3f8] sm:$0xff]   ;;  %v6867_v0 = vld [vmem:[#allocation7 + $0x390] sm:$0xff]   ;;  %v6878_v2 = vld [vmem:[#allocation7 + $0x440] sm:$0xff]  }
 0x4be   : > { %6063 = vmatprep.subr.bf16.mxu1 %v7261_v11  ;;  %6119 = vmatprep.subr.bf16.mxu0 %v7261_v11  ;;  %v1702_v7 = vpack.c.bf16 %v7799_v5, %v7795_v1  ;;  %v6014_v8 = vpop.f32.mrb[39].mxu0  ;;  %v6869_v1 = vld [vmem:[#allocation7 + $0x398] sm:$0xff]   ;;  %v6882_v5 = vld [vmem:[#allocation7 + $0x450] sm:$0xff]  }
 0x4bf   : > { %v6884_v8 = vld [vmem:[#allocation7 + $0x458] sm:$0xff]  }
 0x4c1   : > { %6064 = vmatpush3.bf16.msra.mxu1 %v6840_v3  ;;  %6120 = vmatpush3.bf16.msra.mxu0 %v6850_v4  ;;  %v6880_v3 = vld [vmem:[#allocation7 + $0x448] sm:$0xff]   ;;  %v6871_v4 = vld [vmem:[#allocation7 + $0x3a0] sm:$0xff]  }
 0x4c2   : > { %6065 = vmatprep.subr.bf16.mxu1 %v7261_v11  ;;  %6121 = vmatprep.subr.bf16.mxu0 %v7261_v11 }
 0x4c3   : > { %v1660_v63 = vpop.f32.mrb[40].mxu0 }
 0x4c4   : > { %v6017_v9 = vpop.f32.mrb[41].mxu0 }
 0x4c5   : > { %6066 = vmatpush3.bf16.msra.mxu1 %v6841_v58  ;;  %6122 = vmatpush3.bf16.msra.mxu0 %v6852_v62  ;;  %v1663_v15 = vpop.f32.mrb[42].mxu0  ;;  %v6875_v58 = vld [vmem:[#allocation7 + $0x3b0] sm:$0xff]   ;;  %v6886_v62 = vld [vmem:[#allocation7 + $0x460] sm:$0xff]   ;;  %v6888_v9 = vld [vmem:[#allocation7 + $0x468] sm:$0xff]  }
 0x4c6   : > { %6067 = vmatprep.subr.bf16.mxu1 %v7261_v11  ;;  %6123 = vmatprep.subr.bf16.mxu0 %v7261_v11  ;;  %v1703_v16 = vpack.c.bf16 %v1663_v15, %v1660_v63  ;;  %v6018_v17 = vpop.f32.mrb[43].mxu0  ;;  %v6877_v63 = vld [vmem:[#allocation7 + $0x3b8] sm:$0xff]   ;;  %v6881_v15 = vld [vmem:[#allocation7 + $0x408] sm:$0xff]  }
 0x4c7   : > { %v6883_v17 = vld [vmem:[#allocation7 + $0x410] sm:$0xff]  }
 0x4c9   : > { %6068 = vmatpush3.bf16.msra.mxu1 %v6843_v13  ;;  %6124 = vmatpush3.bf16.msra.mxu0 %v6854_v14  ;;  %v6879_v13 = vld [vmem:[#allocation7 + $0x400] sm:$0xff]   ;;  %v6890_v14 = vld [vmem:[#allocation7 + $0x470] sm:$0xff]  }
 0x4ca   : > { %6069 = vmatprep.subr.bf16.mxu1 %v7261_v11  ;;  %6125 = vmatprep.subr.bf16.mxu0 %v7261_v11 }
 0x4cb   : > { %v7811_v23 = vpop.f32.mrb[44].mxu0 }
 0x4cc   : > { %v6021_v25 = vpop.f32.mrb[45].mxu0 }
 0x4cd   : > { %6070 = vmatpush3.bf16.msra.mxu1 %v6845_v19  ;;  %6126 = vmatpush3.bf16.msra.mxu0 %v6856_v22  ;;  %v7813_v12 = vpop.f32.mrb[46].mxu0  ;;  %v6885_v19 = vld [vmem:[#allocation7 + $0x418] sm:$0xff]   ;;  %v6887_v22 = vld [vmem:[#allocation7 + $0x420] sm:$0xff]   ;;  %v6891_v25 = vld [vmem:[#allocation7 + $0x430] sm:$0xff]  }
 0x4ce   : > { %6095 = vmatprep.subr.bf16.mxu1 %v7261_v11  ;;  %6127 = vmatprep.subr.bf16.mxu0 %v7261_v11  ;;  %v1704_v28 = vpack.c.bf16 %v7813_v12, %v7811_v23  ;;  %v6022_v30 = vpop.f32.mrb[47].mxu0  ;;  %v6889_v23 = vld [vmem:[#allocation7 + $0x428] sm:$0xff]  }
 0x4d0   : > { %6072 = vmatmul.mubr.bf16.vlgmr.msra.gmra.mrb[56].mxu1 %v1699_v47 }
 0x4d1   : > { %6096 = vmatpush3.bf16.msra.mxu1 %v6847_v6  ;;  %6128 = vmatpush3.bf16.msra.mxu0 %v6858_v10  ;;  %v6893_v6 = vld [vmem:[#allocation7 + $0x438] sm:$0xff]  }
 0x4d2   : > { %6097 = vmatprep.subr.bf16.mxu1 %v7261_v11  ;;  %6129 = vmatprep.subr.bf16.mxu0 %v7261_v11 }
 0x4d3   : > { %6111 = vmatprep.mubr.msk.bf16.mxu1 %vm7262_vm3, %v7261_v11  ;;  %v7826_v20 = vpop.f32.mrb[48].mxu0 }
 0x4d4   : > { %v6025_v21 = vpop.f32.mrb[49].mxu0 }
 0x4d5   : > { %6098 = vmatpush3.bf16.msra.mxu1 %v6849_v31  ;;  %6130 = vmatpush3.bf16.msra.mxu0 %v6860_v18  ;;  %v7828_v32 = vpop.f32.mrb[50].mxu0 }
 0x4d6   : > { %6099 = vmatprep.subr.bf16.mxu1 %v7261_v11  ;;  %6155 = vmatprep.subr.bf16.mxu0 %v7261_v11  ;;  %v1705_v34 = vpack.c.bf16 %v7828_v32, %v7826_v20  ;;  %v6026_v35 = vpop.f32.mrb[51].mxu0 }
 0x4d8   : > { %6132 = vmatmul.mubr.bf16.vlgmr.msra.gmra.mrb[64].mxu0 %v1703_v16  ;;  %v6892_v16 = vld [vmem:[#allocation7 + $0x478] sm:$0xff]  }
 0x4d9   : > { %6100 = vmatpush3.bf16.msra.mxu1 %v6851_v24  ;;  %6156 = vmatpush3.bf16.msra.mxu0 %v6862_v29 }
 0x4da   : > { %6101 = vmatprep.subr.bf16.mxu1 %v7261_v11  ;;  %6157 = vmatprep.subr.bf16.mxu0 %v7261_v11 }
 0x4db   : > { %6171 = vmatprep.mubr.msk.bf16.mxu0 %vm7262_vm3, %v7261_v11  ;;  %v7838_v38 = vpop.f32.mrb[52].mxu0 }
 0x4dc   : > { %v6029_v39 = vpop.f32.mrb[53].mxu0 }
 0x4dd   : > { %6102 = vmatpush3.bf16.msra.mxu1 %v6853_v36  ;;  %6158 = vmatpush3.bf16.msra.mxu0 %v6864_v37  ;;  %v7840_v46 = vpop.f32.mrb[54].mxu0 }
 0x4de   : > { %6103 = vmatprep.subr.bf16.mxu1 %v7261_v11  ;;  %6159 = vmatprep.subr.bf16.mxu0 %v7261_v11  ;;  %v1706_v47 = vpack.c.bf16 %v7840_v46, %v7838_v38  ;;  %v6030_v48 = vpop.f32.mrb[55].mxu0 }
 0x4e1   : > { %6104 = vmatpush3.bf16.msra.mxu1 %v6855_v40  ;;  %6160 = vmatpush3.bf16.msra.mxu0 %v6866_v43 }
 0x4e2   : > { %6105 = vmatprep.subr.bf16.mxu1 %v7261_v11  ;;  %6161 = vmatprep.subr.bf16.mxu0 %v7261_v11 }
 0x4e3   : > { %v7848_v54 = vpop.f32.mrb[56].mxu0 }
 0x4e4   : > { %v6033_v33 = vpop.f32.mrb[57].mxu0 }
 0x4e5   : > { %6106 = vmatpush3.bf16.msra.mxu1 %v6857_v50  ;;  %6162 = vmatpush3.bf16.msra.mxu0 %v6868_v53  ;;  %v7850_v55 = vpop.f32.mrb[58].mxu0 }
 0x4e6   : > { %6107 = vmatprep.subr.bf16.mxu1 %v7261_v11  ;;  %6163 = vmatprep.subr.bf16.mxu0 %v7261_v11  ;;  %v1707_v49 = vpack.c.bf16 %v7850_v55, %v7848_v54  ;;  %v6034_v51 = vpop.f32.mrb[59].mxu0 }
 0x4e9   : > { %6108 = vmatpush3.bf16.msra.mxu1 %v6859_v44  ;;  %6164 = vmatpush3.bf16.msra.mxu0 %v6870_v45 }
 0x4ea   : > { %6109 = vmatprep.subr.bf16.mxu1 %v7261_v11  ;;  %6165 = vmatprep.subr.bf16.mxu0 %v7261_v11 }
 0x4ed   : > { %6110 = vmatpush3.bf16.msra.mxu1 %v6861_v52  ;;  %6166 = vmatpush3.bf16.msra.mxu0 %v6872_v56 }
 0x4ee   : > { %6135 = vmatprep.subr.bf16.mxu1 %v7261_v11  ;;  %6167 = vmatprep.subr.bf16.mxu0 %v7261_v11 }
 0x4f0   : > { %6112 = vmatmul.mubr.bf16.vlgmr.msra.gmra.mrb[60].mxu1 %v1702_v7  ;;  %v6873_v7 = vld [vmem:[#allocation7 + $0x3a8] sm:$0xff]  }
 0x4f1   : > { %6136 = vmatpush3.bf16.msra.mxu1 %v6863_v57  ;;  %6168 = vmatpush3.bf16.msra.mxu0 %v6874_v59 }
 0x4f2   : > { %6137 = vmatprep.subr.bf16.mxu1 %v7261_v11  ;;  %6169 = vmatprep.subr.bf16.mxu0 %v7261_v11 }
 0x4f3   : > { %6151 = vmatprep.mubr.msk.bf16.mxu1 %vm7262_vm3, %v7261_v11 }
 0x4f5   : > { %6138 = vmatpush3.bf16.msra.mxu1 %v6865_v60  ;;  %6170 = vmatpush3.bf16.msra.mxu0 %v6876_v61 }
 0x4f6   : > { %6139 = vmatprep.subr.bf16.mxu1 %v7261_v11  ;;  %6195 = vmatprep.subr.bf16.mxu0 %v7261_v11 }
 0x4f8   : > { %6172 = vmatmul.mubr.bf16.vlgmr.msra.gmra.mrb[68].mxu0 %v1705_v34 }
 0x4f9   : > { %6140 = vmatpush3.bf16.msra.mxu1 %v6867_v0  ;;  %6196 = vmatpush3.bf16.msra.mxu0 %v6878_v2 }
 0x4fa   : > { %6141 = vmatprep.subr.bf16.mxu1 %v7261_v11  ;;  %6197 = vmatprep.subr.bf16.mxu0 %v7261_v11 }
 0x4fb   : > { %6211 = vmatprep.mubr.msk.bf16.mxu0 %vm7262_vm3, %v7261_v11 }
 0x4fd   : > { %6142 = vmatpush3.bf16.msra.mxu1 %v6869_v1  ;;  %6198 = vmatpush3.bf16.msra.mxu0 %v6880_v3 }
 0x4fe   : > { %6143 = vmatprep.subr.bf16.mxu1 %v7261_v11  ;;  %6199 = vmatprep.subr.bf16.mxu0 %v7261_v11 }
 0x501   : > { %6144 = vmatpush3.bf16.msra.mxu1 %v6871_v4  ;;  %6200 = vmatpush3.bf16.msra.mxu0 %v6882_v5  ;;  %v6895_v5 = vld [vmem:[#allocation7 + $0x4c0] sm:$0xff]  }
 0x502   : > { %6145 = vmatprep.subr.bf16.mxu1 %v7261_v11  ;;  %6201 = vmatprep.subr.bf16.mxu0 %v7261_v11 }
 0x505   : > { %6146 = vmatpush3.bf16.msra.mxu1 %v6873_v7  ;;  %6202 = vmatpush3.bf16.msra.mxu0 %v6884_v8 }
 0x506   : > { %6147 = vmatprep.subr.bf16.mxu1 %v7261_v11  ;;  %6203 = vmatprep.subr.bf16.mxu0 %v7261_v11 }
 0x509   : > { %6148 = vmatpush3.bf16.msra.mxu1 %v6875_v58  ;;  %6204 = vmatpush3.bf16.msra.mxu0 %v6886_v62  ;;  %v6896_v58 = vld [vmem:[#allocation7 + $0x4c8] sm:$0xff]   ;;  %v6897_v62 = vld [vmem:[#allocation7 + $0x4d0] sm:$0xff]  }
 0x50a   : > { %6149 = vmatprep.subr.bf16.mxu1 %v7261_v11  ;;  %6205 = vmatprep.subr.bf16.mxu0 %v7261_v11 }
 0x50d   : > { %6150 = vmatpush3.bf16.msra.mxu1 %v6877_v63  ;;  %6206 = vmatpush3.bf16.msra.mxu0 %v6888_v9  ;;  %v6899_v63 = vld [vmem:[#allocation7 + $0x4d8] sm:$0xff]   ;;  %v6900_v9 = vld [vmem:[#allocation7 + $0x4e0] sm:$0xff]  }
 0x50e   : > { %6175 = vmatprep.subr.bf16.mxu1 %v7261_v11  ;;  %6207 = vmatprep.subr.bf16.mxu0 %v7261_v11 }
 0x510   : > { %6152 = vmatmul.mubr.bf16.vlgmr.msra.gmra.mrb[64].mxu1 %v1704_v28 }
 0x511   : > { %6176 = vmatpush3.bf16.msra.mxu1 %v6879_v13  ;;  %6208 = vmatpush3.bf16.msra.mxu0 %v6890_v14 }
 0x512   : > { %6177 = vmatprep.subr.bf16.mxu1 %v7261_v11  ;;  %6209 = vmatprep.subr.bf16.mxu0 %v7261_v11 }
 0x513   : > { %6191 = vmatprep.mubr.msk.bf16.mxu1 %vm7262_vm3, %v7261_v11 }
 0x515   : > { %6178 = vmatpush3.bf16.msra.mxu1 %v6881_v15  ;;  %6210 = vmatpush3.bf16.msra.mxu0 %v6892_v16  ;;  %v5244_v16 = vld [vmem:[#allocation8 + $0x1] ss:$0 sm:$0xff] }
 0x516   : > { %6179 = vmatprep.subr.bf16.mxu1 %v7261_v11  ;;  %6253 = vmatprep.subr.bf16.mxu0 %v7261_v11 }
 0x518   : > { %6212 = vmatmul.mubr.bf16.vlgmr.msra.gmra.mrb[72].mxu0 %v1707_v49 }
 0x519   : > { %6180 = vmatpush3.bf16.msra.mxu1 %v6883_v17  ;;  %6269 = vmatprep.mubr.msk.bf16.mxu0 %vm7262_vm3, %v7261_v11 }
 0x51a   : > { %6181 = vmatprep.subr.bf16.mxu1 %v7261_v11  ;;  %6254 = vmatpush3.bf16.msra.mxu0 %v6895_v5 }
 0x51b   : > { %6255 = vmatprep.subr.bf16.mxu0 %v7261_v11 }
 0x51d   : > { %6182 = vmatpush3.bf16.msra.mxu1 %v6885_v19 }
 0x51e   : > { %6183 = vmatprep.subr.bf16.mxu1 %v7261_v11  ;;  %6256 = vmatpush3.bf16.msra.mxu0 %v6896_v58 }
 0x51f   : > { %6257 = vmatprep.subr.bf16.mxu0 %v7261_v11 }
 0x521   : > { %6184 = vmatpush3.bf16.msra.mxu1 %v6887_v22 }
 0x522   : > { %6185 = vmatprep.subr.bf16.mxu1 %v7261_v11  ;;  %6258 = vmatpush3.bf16.msra.mxu0 %v6897_v62 }
 0x523   : > { %6259 = vmatprep.subr.bf16.mxu0 %v7261_v11 }
 0x525   : > { %6186 = vmatpush3.bf16.msra.mxu1 %v6889_v23 }
 0x526   : > { %6187 = vmatprep.subr.bf16.mxu1 %v7261_v11  ;;  %6260 = vmatpush3.bf16.msra.mxu0 %v6899_v63 }
 0x527   : > { %6261 = vmatprep.subr.bf16.mxu0 %v7261_v11 }
 0x529   : > { %6188 = vmatpush3.bf16.msra.mxu1 %v6891_v25 }
 0x52a   : > { %6189 = vmatprep.subr.bf16.mxu1 %v7261_v11  ;;  %6262 = vmatpush3.bf16.msra.mxu0 %v6900_v9  ;;  %v6906_v9 = vld [vmem:[#allocation7 + $0x480] sm:$0xff]  }
 0x52b   : > { %6263 = vmatprep.subr.bf16.mxu0 %v7261_v11 }
 0x52d   : > { %6190 = vmatpush3.bf16.msra.mxu1 %v6893_v6 }
 0x52e   : > { %6215 = vmatprep.subr.bf16.mxu1 %v7261_v11 }
 0x530   : > { %6192 = vmatmul.mubr.bf16.vlgmr.msra.gmra.mrb[68].mxu1 %v1706_v47 }
 0x531   : > { %6217 = vmatprep.mubr.msk.bf16.mxu1 %vm7262_vm3, %v7261_v11 }
 0x583   : > { %v1824_v10 = vpop.f32.mrb[52].mxu1 }
 0x584   : > { %v6053_v12 = vpop.f32.mrb[53].mxu1 }
 0x585   : > { %v1827_v28 = vpop.f32.mrb[54].mxu1 }
 0x586   : > { %v6054_v30 = vpop.f32.mrb[55].mxu1 }
 0x58b   : > { %v2019_v31 = vpop.f32.mrb[60].mxu0 }
 0x58c   : > { %v6093_v18 = vpop.f32.mrb[61].mxu0 }
 0x58d   : > { %v2022_v20 = vpop.f32.mrb[62].mxu0 }
 0x58e   : > { %v6094_v21 = vpop.f32.mrb[63].mxu0 }
 0x5a3   : > { %v1913_v24 = vpop.f32.mrb[56].mxu1 }
 0x5a4   : > { %v1914_v29 = vadd.f32 %v1913_v24, %v1824_v10  ;;  %v6073_v32 = vpop.f32.mrb[57].mxu1 }
 0x5a5   : > { %v1916_v34 = vpop.f32.mrb[58].mxu1 }
 0x5a6   : > { %v1917_v35 = vadd.f32 %v1916_v34, %v1827_v28  ;;  %v6074_v36 = vpop.f32.mrb[59].mxu1  ;;  %v2026_v37 = vadd.f32 %v2019_v31, %v1914_v29 }
 0x5a8   : > { %v2027_v38 = vadd.f32 %v2022_v20, %v1917_v35 }
 0x5ab   : > { %v2235_v39 = vpop.f32.mrb[64].mxu0 }
 0x5ac   : > { %v6133_v40 = vpop.f32.mrb[65].mxu0 }
 0x5ad   : > { %v2238_v43 = vpop.f32.mrb[66].mxu0 }
 0x5ae   : > { %v6134_v46 = vpop.f32.mrb[67].mxu0 }
 0x5c3   : > { %v2127_v47 = vpop.f32.mrb[60].mxu1 }
 0x5c4   : > { %v2134_v48 = vadd.f32 %v2127_v47, %v2026_v37  ;;  %v6113_v50 = vpop.f32.mrb[61].mxu1 }
 0x5c5   : > { %v2130_v53 = vpop.f32.mrb[62].mxu1  ;;  %v6894_v50 = vld [vmem:[#allocation7 + $0x500] sm:$0xff]  }
 0x5c6   : > { %v2135_v54 = vadd.f32 %v2130_v53, %v2027_v38  ;;  %v6114_v33 = vpop.f32.mrb[63].mxu1  ;;  %v2242_v44 = vadd.f32 %v2235_v39, %v2134_v48  ;;  %v7928_v53 = vld [vmem:[%s8383_s1] sm:$0xff]  }
 0x5c7   : > { %v7949_v33 = vld [vmem:[%s8383_s1 + $0x10] sm:$0xff]  }
 0x5c8   : > { %v2243_v45 = vadd.f32 %v2238_v43, %v2135_v54  ;;  %v7939_v54 = vld [vmem:[%s8383_s1 + $0x8] sm:$0xff]  }
 0x5cb   : > { %v2451_v55 = vpop.f32.mrb[68].mxu0 }
 0x5cc   : > { %v6173_v49 = vpop.f32.mrb[69].mxu0 }
 0x5cd   : > { %v2454_v51 = vpop.f32.mrb[70].mxu0  ;;  %v7985_v49 = vld [vmem:[%s8383_s1 + $0x30] sm:$0xff]  }
 0x5ce   : > { %v6174_v52 = vpop.f32.mrb[71].mxu0 }
 0x5cf   : > { %v8003_v52 = vld [vmem:[%s8383_s1 + $0x40] sm:$0xff]  }
 0x5e3   : > { %v2343_v56 = vpop.f32.mrb[64].mxu1 }
 0x5e4   : > { %v2350_v57 = vadd.f32 %v2343_v56, %v2242_v44  ;;  %v6153_v59 = vpop.f32.mrb[65].mxu1  ;;  %v7958_v44 = vld [vmem:[%s8383_s1 + $0x18] sm:$0xff]   ;;  %v6902_v56 = vld [vmem:[#allocation7 + $0x4e8] sm:$0xff]  }
 0x5e5   : > { %v2346_v60 = vpop.f32.mrb[66].mxu1  ;;  %6264 = vmatpush3.bf16.msra.mxu0 %v6902_v56  ;;  %v6904_v59 = vld [vmem:[#allocation7 + $0x518] sm:$0xff]   ;;  %v6930_v56 = vld [vmem:[#allocation7 + $0x5b0] sm:$0xff]  }
 0x5e6   : > { %v2351_v61 = vadd.f32 %v2346_v60, %v2243_v45  ;;  %v6154_v0 = vpop.f32.mrb[67].mxu1  ;;  %v2458_v2 = vadd.f32 %v2451_v55, %v2350_v57  ;;  %v7967_v45 = vld [vmem:[%s8383_s1 + $0x20] sm:$0xff]   ;;  %v7976_v55 = vld [vmem:[%s8383_s1 + $0x28] sm:$0xff]   ;;  %6265 = vmatprep.subr.bf16.mxu0 %v7261_v11  ;;  %v6903_v57 = vld [vmem:[#allocation7 + $0x4f0] sm:$0xff]  }
 0x5e7   : > { %v6905_v60 = vld [vmem:[#allocation7 + $0x4f8] sm:$0xff]   ;;  %v6911_v0 = vld [vmem:[#allocation7 + $0x528] sm:$0xff]  }
 0x5e8   : > { %v2459_v1 = vadd.f32 %v2454_v51, %v2351_v61  ;;  %v7994_v51 = vld [vmem:[%s8383_s1 + $0x38] sm:$0xff]   ;;  %v6907_v61 = vld [vmem:[#allocation7 + $0x520] sm:$0xff]  }
 0x5e9   : > { %6266 = vmatpush3.bf16.msra.mxu0 %v6903_v57 }
 0x5ea   : > { %6267 = vmatprep.subr.bf16.mxu0 %v7261_v11 }
 0x5eb   : > { %v2667_v3 = vpop.f32.mrb[72].mxu0 }
 0x5ec   : > { %v6213_v4 = vpop.f32.mrb[73].mxu0 }
 0x5ed   : > { %v2670_v7 = vpop.f32.mrb[74].mxu0  ;;  %6268 = vmatpush3.bf16.msra.mxu0 %v6905_v60 }
 0x5ee   : > { %v6214_v8 = vpop.f32.mrb[75].mxu0  ;;  %6273 = vmatprep.subr.bf16.mxu0 %v7261_v11 }
 0x603   : > { %v2559_v13 = vpop.f32.mrb[68].mxu1 }
 0x604   : > { %v2566_v14 = vadd.f32 %v2559_v13, %v2458_v2  ;;  %v6193_v15 = vpop.f32.mrb[69].mxu1  ;;  %v6914_v2 = vld [vmem:[#allocation7 + $0x530] sm:$0xff]  }
 0x605   : > { %v2562_v17 = vpop.f32.mrb[70].mxu1  ;;  %v6908_v15 = vld [vmem:[#allocation7 + $0x488] sm:$0xff]  }
 0x606   : > { %v2674_v19 = vadd.f32 %v2667_v3, %v2566_v14  ;;  %v2567_v22 = vadd.f32 %v2562_v17, %v2459_v1  ;;  %v6194_v23 = vpop.f32.mrb[71].mxu1  ;;  %v6916_v1 = vld [vmem:[#allocation7 + $0x538] sm:$0xff]  }
 0x607   : > { %v6918_v23 = vld [vmem:[#allocation7 + $0x580] sm:$0xff]  }
 0x608   : > { %v2684_v25 = vadd.f32 %v5244_v16, %v2674_v19  ;;  %v2675_v6 = vadd.f32 %v2670_v7, %v2567_v22  ;;  %v6909_v19 = vld [vmem:[#allocation7 + $0x490] sm:$0xff]  }
 0x60a   : > { %v2688_v10 = vmul.f32 0.044715, %v2684_v25  ;;  %v2685_v12 = vadd.f32 %v5244_v16, %v2675_v6  ;;  %v2686_v35 = vmul.f32 0.5, %v2684_v25 }
 0x60c   : > { %v2690_v28 = vmul.f32 %v2688_v10, %v2684_v25  ;;  %v2689_v30 = vmul.f32 0.044715, %v2685_v12  ;;  %v2687_v38 = vmul.f32 0.5, %v2685_v12  ;;  %v6910_v10 = vld [vmem:[#allocation7 + $0x498] sm:$0xff]  }
 0x60e   : > { %v2692_v31 = vmul.f32 %v2690_v28, %v2684_v25  ;;  %v2691_v18 = vmul.f32 %v2689_v30, %v2685_v12 }
 0x610   : > { %v2694_v20 = vadd.f32 %v2692_v31, %v2684_v25  ;;  %v2693_v21 = vmul.f32 %v2691_v18, %v2685_v12  ;;  %v6912_v31 = vld [vmem:[#allocation7 + $0x4a0] sm:$0xff]   ;;  %v6922_v18 = vld [vmem:[#allocation7 + $0x590] sm:$0xff]  }
 0x612   : > { %v2695_v24 = vadd.f32 %v2693_v21, %v2685_v12  ;;  %v2696_v29 = vmul.f32 0.7978846, %v2694_v20  ;;  %v6920_v12 = vld [vmem:[#allocation7 + $0x588] sm:$0xff]  }
 0x614   : > { %v2697_v32 = vmul.f32 0.7978846, %v2695_v24  ;;  %7042 = vtanh.f32 %v2696_v29  ;;  %v6913_v29 = vld [vmem:[#allocation7 + $0x4a8] sm:$0xff]  }
 0x616   : > { %7044 = vtanh.f32 %v2697_v32  ;;  %v6924_v32 = vld [vmem:[#allocation7 + $0x598] sm:$0xff]  }
 0x61e   : > { %v7043_v34 = vpop.eup %7042 }
 0x61f   : > { %v2700_v36 = vadd.f32 1.0, %v7043_v34 }
 0x620   : > { %v7045_v37 = vpop.eup %7044 }
 0x621   : > { %v2701_v39 = vadd.f32 1.0, %v7045_v37  ;;  %v2702_v40 = vmul.f32 %v2700_v36, %v2686_v35  ;;  %v6915_v36 = vld [vmem:[#allocation7 + $0x4b0] sm:$0xff]   ;;  %v6926_v37 = vld [vmem:[#allocation7 + $0x5a0] sm:$0xff]  }
 0x623   : > { %v2703_v43 = vmul.f32 %v2701_v39, %v2687_v38  ;;  %v7917_v46 = vadd.f32 %v2702_v40, %v7493_v26  ;;  %v6898_v26 = vld [vmem:[#allocation7 + $0x508] sm:$0xff]  }
 0x625   : > { %v7920_v47 = vadd.f32 %v2703_v43, %v7495_v27  ;;  %v6901_v27 = vld [vmem:[#allocation7 + $0x510] sm:$0xff]   ;;  %v6917_v43 = vld [vmem:[#allocation7 + $0x4b8] sm:$0xff]  }
 0x627   : > { %v2706_v48 = vpack.c.bf16 %v7920_v47, %v7917_v46 }
 0x629   : > { %6216 = vmatpush3.bf16.msra.mxu1 %v2706_v48  ;;  %v6928_v48 = vld [vmem:[#allocation7 + $0x5a8] sm:$0xff]  }
 0x62a   : > { %6293 = vmatprep.subr.bf16.mxu1 %v7261_v11 }
 0x62c   : > { %6218 = vmatmul.mubr.msk.bf16.vlgmr.msra.gmra.mrb[72].mxu1 %vm455_vm4, %v7928_v53 }
 0x62d   : > { %6221 = vmatprep.mubr.msk.bf16.mxu1 %vm7262_vm3, %v7261_v11  ;;  %6294 = vmatpush3.bf16.msra.mxu1 %v6894_v50 }
 0x62e   : > { %6295 = vmatprep.subr.bf16.mxu1 %v7261_v11 }
 0x631   : > { %6296 = vmatpush3.bf16.msra.mxu1 %v6898_v26 }
 0x632   : > { %6297 = vmatprep.subr.bf16.mxu1 %v7261_v11 }
 0x634   : > { %6222 = vmatmul.mubr.msk.bf16.gmra.mrb[76].mxu1 %vm455_vm4, %v7939_v54 }
 0x635   : > { %6225 = vmatprep.mubr.msk.bf16.mxu1 %vm7262_vm3, %v7261_v11  ;;  %6298 = vmatpush3.bf16.msra.mxu1 %v6901_v27  ;;  %v6919_v27 = vld [vmem:[#allocation7 + $0x540] sm:$0xff]  }
 0x636   : > { %6299 = vmatprep.subr.bf16.mxu1 %v7261_v11 }
 0x639   : > { %6300 = vmatpush3.bf16.msra.mxu1 %v6904_v59 }
 0x63a   : > { %6301 = vmatprep.subr.bf16.mxu1 %v7261_v11 }
 0x63c   : > { %6226 = vmatmul.mubr.msk.bf16.gmra.mrb[80].mxu1 %vm455_vm4, %v7949_v33 }
 0x63d   : > { %6229 = vmatprep.mubr.msk.bf16.mxu1 %vm7262_vm3, %v7261_v11  ;;  %6302 = vmatpush3.bf16.msra.mxu1 %v6907_v61  ;;  %v6921_v61 = vld [vmem:[#allocation7 + $0x548] sm:$0xff]  }
 0x63e   : > { %6303 = vmatprep.subr.bf16.mxu1 %v7261_v11 }
 0x641   : > { %6304 = vmatpush3.bf16.msra.mxu1 %v6911_v0  ;;  %v6932_v0 = vld [vmem:[#allocation7 + $0x5b8] sm:$0xff]  }
 0x642   : > { %6305 = vmatprep.subr.bf16.mxu1 %v7261_v11 }
 0x644   : > { %6230 = vmatmul.mubr.msk.bf16.gmra.mrb[84].mxu1 %vm455_vm4, %v7958_v44 }
 0x645   : > { %6233 = vmatprep.mubr.msk.bf16.mxu1 %vm7262_vm3, %v7261_v11  ;;  %6306 = vmatpush3.bf16.msra.mxu1 %v6914_v2 }
 0x646   : > { %6307 = vmatprep.subr.bf16.mxu1 %v7261_v11 }
 0x649   : > { %6308 = vmatpush3.bf16.msra.mxu1 %v6916_v1 }
 0x64a   : > { %6333 = vmatprep.subr.bf16.mxu1 %v7261_v11 }
 0x64c   : > { %6234 = vmatmul.mubr.msk.bf16.gmra.mrb[88].mxu1 %vm455_vm4, %v7967_v45 }
 0x64d   : > { %6237 = vmatprep.mubr.msk.bf16.mxu1 %vm7262_vm3, %v7261_v11 }
 0x654   : > { %6238 = vmatmul.mubr.msk.bf16.gmra.mrb[92].mxu1 %vm455_vm4, %v7976_v55 }
 0x655   : > { %6241 = vmatprep.mubr.msk.bf16.mxu1 %vm7262_vm3, %v7261_v11 }
 0x65c   : > { %6242 = vmatmul.mubr.msk.bf16.gmra.mrb[96].mxu1 %vm455_vm4, %v7985_v49 }
 0x65d   : > { %6245 = vmatprep.mubr.msk.bf16.mxu1 %vm7262_vm3, %v7261_v11 }
 0x664   : > { %6246 = vmatmul.mubr.msk.bf16.gmra.mrb[100].mxu1 %vm455_vm4, %v7994_v51 }
 0x665   : > { %6249 = vmatprep.mubr.msk.bf16.mxu1 %vm7262_vm3, %v7261_v11 }
 0x66c   : > { %6250 = vmatmul.mubr.msk.bf16.gmra.mrb[104].mxu1 %vm455_vm4, %v8003_v52 }
 0x66d   : > { %6309 = vmatprep.mubr.msk.bf16.mxu1 %vm7262_vm3, %v7261_v11 }
 0x6ff   : > { %v8017_v3 = vpop.f32.mrb[72].mxu1 }
 0x700   : > { %v6219_v4 = vpop.f32.mrb[73].mxu1 }
 0x701   : > { %v8019_v5 = vpop.f32.mrb[74].mxu1  ;;  %v6923_v4 = vld [vmem:[#allocation7 + $0x550] sm:$0xff]  }
 0x702   : > { %v2812_v7 = vpack.c.bf16 %v8019_v5, %v8017_v3  ;;  %v6220_v8 = vpop.f32.mrb[75].mxu1 }
 0x703   : > { %v6934_v8 = vld [vmem:[#allocation7 + $0x600] sm:$0xff]  }
 0x707   : > { %v2749_v58 = vpop.f32.mrb[76].mxu1 }
 0x708   : > { %v6223_v62 = vpop.f32.mrb[77].mxu1 }
 0x709   : > { %v2752_v63 = vpop.f32.mrb[78].mxu1  ;;  %v6936_v62 = vld [vmem:[#allocation7 + $0x608] sm:$0xff]  }
 0x70a   : > { %v2813_v13 = vpack.c.bf16 %v2752_v63, %v2749_v58  ;;  %v6224_v14 = vpop.f32.mrb[79].mxu1  ;;  %v6925_v58 = vld [vmem:[#allocation7 + $0x558] sm:$0xff]  }
 0x70b   : > { %v6938_v14 = vld [vmem:[#allocation7 + $0x610] sm:$0xff]  }
 0x70c   : > { %6270 = vmatmul.mubr.bf16.vlgmr.msra.gmra.mrb[76].mxu0 %v2813_v13  ;;  %v6927_v13 = vld [vmem:[#allocation7 + $0x560] sm:$0xff]  }
 0x70d   : > { %6274 = vmatpush3.bf16.msra.mxu0 %v6906_v9  ;;  %6289 = vmatprep.mubr.msk.bf16.mxu0 %vm7262_vm3, %v7261_v11 }
 0x70e   : > { %6275 = vmatprep.subr.bf16.mxu0 %v7261_v11 }
 0x70f   : > { %v2757_v16 = vpop.f32.mrb[80].mxu1 }
 0x710   : > { %v6227_v17 = vpop.f32.mrb[81].mxu1 }
 0x711   : > { %6276 = vmatpush3.bf16.msra.mxu0 %v6908_v15  ;;  %v2760_v22 = vpop.f32.mrb[82].mxu1 }
 0x712   : > { %6277 = vmatprep.subr.bf16.mxu0 %v7261_v11  ;;  %v2814_v25 = vpack.c.bf16 %v2760_v22, %v2757_v16  ;;  %v6228_v6 = vpop.f32.mrb[83].mxu1  ;;  %v6940_v22 = vld [vmem:[#allocation7 + $0x618] sm:$0xff]  }
 0x713   : > { %v6931_v6 = vld [vmem:[#allocation7 + $0x570] sm:$0xff]  }
 0x714   : > { %6310 = vmatmul.mubr.bf16.vlgmr.msra.gmra.mrb[108].mxu1 %v2814_v25 }
 0x715   : > { %6278 = vmatpush3.bf16.msra.mxu0 %v6909_v19  ;;  %6334 = vmatpush3.bf16.msra.mxu1 %v6918_v23  ;;  %v6929_v19 = vld [vmem:[#allocation7 + $0x568] sm:$0xff]  }
 0x716   : > { %6279 = vmatprep.subr.bf16.mxu0 %v7261_v11  ;;  %6335 = vmatprep.subr.bf16.mxu1 %v7261_v11 }
 0x717   : > { %v8029_v28 = vpop.f32.mrb[84].mxu1  ;;  %6349 = vmatprep.mubr.msk.bf16.mxu1 %vm7262_vm3, %v7261_v11 }
 0x718   : > { %v6231_v30 = vpop.f32.mrb[85].mxu1 }
 0x719   : > { %6280 = vmatpush3.bf16.msra.mxu0 %v6910_v10  ;;  %6336 = vmatpush3.bf16.msra.mxu1 %v6920_v12  ;;  %v8033_v20 = vpop.f32.mrb[86].mxu1  ;;  %v6942_v10 = vld [vmem:[#allocation7 + $0x620] sm:$0xff]  }
 0x71a   : > { %6281 = vmatprep.subr.bf16.mxu0 %v7261_v11  ;;  %6337 = vmatprep.subr.bf16.mxu1 %v7261_v11  ;;  %v2815_v21 = vpack.c.bf16 %v8033_v20, %v8029_v28  ;;  %v6232_v24 = vpop.f32.mrb[87].mxu1  ;;  %v6941_v28 = vld [vmem:[#allocation7 + $0x5d8] sm:$0xff]   ;;  %v6952_v20 = vld [vmem:[#allocation7 + $0x688] sm:$0xff]  }
 0x71b   : > { %v6944_v24 = vld [vmem:[#allocation7 + $0x628] sm:$0xff]  }
 0x71d   : > { %6282 = vmatpush3.bf16.msra.mxu0 %v6912_v31  ;;  %6338 = vmatpush3.bf16.msra.mxu1 %v6922_v18  ;;  %v6933_v18 = vld [vmem:[#allocation7 + $0x578] sm:$0xff]  }
 0x71e   : > { %6283 = vmatprep.subr.bf16.mxu0 %v7261_v11  ;;  %6339 = vmatprep.subr.bf16.mxu1 %v7261_v11 }
 0x71f   : > { %v2773_v34 = vpop.f32.mrb[88].mxu1 }
 0x720   : > { %v6235_v35 = vpop.f32.mrb[89].mxu1 }
 0x721   : > { %6284 = vmatpush3.bf16.msra.mxu0 %v6913_v29  ;;  %6340 = vmatpush3.bf16.msra.mxu1 %v6924_v32  ;;  %v2776_v38 = vpop.f32.mrb[90].mxu1  ;;  %v6935_v29 = vld [vmem:[#allocation7 + $0x5c0] sm:$0xff]   ;;  %v6946_v32 = vld [vmem:[#allocation7 + $0x630] sm:$0xff]   ;;  %v6948_v35 = vld [vmem:[#allocation7 + $0x638] sm:$0xff]  }
 0x722   : > { %6285 = vmatprep.subr.bf16.mxu0 %v7261_v11  ;;  %6341 = vmatprep.subr.bf16.mxu1 %v7261_v11  ;;  %v2816_v39 = vpack.c.bf16 %v2776_v38, %v2773_v34  ;;  %v6236_v40 = vpop.f32.mrb[91].mxu1  ;;  %v6937_v34 = vld [vmem:[#allocation7 + $0x5c8] sm:$0xff]   ;;  %v6954_v38 = vld [vmem:[#allocation7 + $0x690] sm:$0xff]  }
 0x723   : > { %v6956_v40 = vld [vmem:[#allocation7 + $0x698] sm:$0xff]  }
 0x725   : > { %6286 = vmatpush3.bf16.msra.mxu0 %v6915_v36  ;;  %6342 = vmatpush3.bf16.msra.mxu1 %v6926_v37  ;;  %v6939_v36 = vld [vmem:[#allocation7 + $0x5d0] sm:$0xff]   ;;  %v6950_v37 = vld [vmem:[#allocation7 + $0x680] sm:$0xff]  }
 0x726   : > { %6287 = vmatprep.subr.bf16.mxu0 %v7261_v11  ;;  %6343 = vmatprep.subr.bf16.mxu1 %v7261_v11 }
 0x727   : > { %v8045_v50 = vpop.f32.mrb[92].mxu1 }
 0x728   : > { %v6239_v26 = vpop.f32.mrb[93].mxu1 }
 0x729   : > { %6288 = vmatpush3.bf16.msra.mxu0 %v6917_v43  ;;  %6344 = vmatpush3.bf16.msra.mxu1 %v6928_v48  ;;  %v8047_v57 = vpop.f32.mrb[94].mxu1  ;;  %v6947_v43 = vld [vmem:[#allocation7 + $0x5f0] sm:$0xff]   ;;  %v6958_v48 = vld [vmem:[#allocation7 + $0x6a0] sm:$0xff]   ;;  %v6949_v26 = vld [vmem:[#allocation7 + $0x5f8] sm:$0xff]  }
 0x72a   : > { %6313 = vmatprep.subr.bf16.mxu0 %v7261_v11  ;;  %6345 = vmatprep.subr.bf16.mxu1 %v7261_v11  ;;  %v2817_v59 = vpack.c.bf16 %v8047_v57, %v8045_v50  ;;  %v6240_v60 = vpop.f32.mrb[95].mxu1  ;;  %v6957_v50 = vld [vmem:[#allocation7 + $0x658] sm:$0xff]   ;;  %v6959_v57 = vld [vmem:[#allocation7 + $0x660] sm:$0xff]  }
 0x72b   : > { %v6962_v60 = vld [vmem:[#allocation7 + $0x6b0] sm:$0xff]  }
 0x72c   : > { %6290 = vmatmul.mubr.bf16.vlgmr.msra.gmra.mrb[80].mxu0 %v2812_v7 }
 0x72d   : > { %6314 = vmatpush3.bf16.msra.mxu0 %v6919_v27  ;;  %6346 = vmatpush3.bf16.msra.mxu1 %v6930_v56  ;;  %v6960_v27 = vld [vmem:[#allocation7 + $0x6a8] sm:$0xff]   ;;  %v6951_v56 = vld [vmem:[#allocation7 + $0x640] sm:$0xff]  }
 0x72e   : > { %6315 = vmatprep.subr.bf16.mxu0 %v7261_v11  ;;  %6347 = vmatprep.subr.bf16.mxu1 %v7261_v11 }
 0x72f   : > { %6329 = vmatprep.mubr.msk.bf16.mxu0 %vm7262_vm3, %v7261_v11  ;;  %v8060_v2 = vpop.f32.mrb[96].mxu1 }
 0x730   : > { %v6243_v1 = vpop.f32.mrb[97].mxu1 }
 0x731   : > { %6316 = vmatpush3.bf16.msra.mxu0 %v6921_v61  ;;  %6348 = vmatpush3.bf16.msra.mxu1 %v6932_v0  ;;  %v8062_v3 = vpop.f32.mrb[98].mxu1  ;;  %v6953_v61 = vld [vmem:[#allocation7 + $0x648] sm:$0xff]   ;;  %v6964_v0 = vld [vmem:[#allocation7 + $0x6b8] sm:$0xff]   ;;  %v6963_v1 = vld [vmem:[#allocation7 + $0x670] sm:$0xff]  }
 0x732   : > { %6317 = vmatprep.subr.bf16.mxu0 %v7261_v11  ;;  %6373 = vmatprep.subr.bf16.mxu1 %v7261_v11  ;;  %v2818_v5 = vpack.c.bf16 %v8062_v3, %v8060_v2  ;;  %v6244_v7 = vpop.f32.mrb[99].mxu1  ;;  %v6955_v2 = vld [vmem:[#allocation7 + $0x650] sm:$0xff]  }
 0x734   : > { %6350 = vmatmul.mubr.bf16.vlgmr.msra.gmra.mrb[112].mxu1 %v2816_v39  ;;  %v6945_v39 = vld [vmem:[#allocation7 + $0x5e8] sm:$0xff]  }
 0x735   : > { %6318 = vmatpush3.bf16.msra.mxu0 %v6923_v4  ;;  %6374 = vmatpush3.bf16.msra.mxu1 %v6934_v8  ;;  %v6965_v4 = vld [vmem:[#allocation7 + $0x678] sm:$0xff]  }
 0x736   : > { %6319 = vmatprep.subr.bf16.mxu0 %v7261_v11  ;;  %6375 = vmatprep.subr.bf16.mxu1 %v7261_v11 }
 0x737   : > { %6389 = vmatprep.mubr.msk.bf16.mxu1 %vm7262_vm3, %v7261_v11  ;;  %v8072_v63 = vpop.f32.mrb[100].mxu1 }
 0x738   : > { %v6247_v9 = vpop.f32.mrb[101].mxu1 }
 0x739   : > { %6320 = vmatpush3.bf16.msra.mxu0 %v6925_v58  ;;  %6376 = vmatpush3.bf16.msra.mxu1 %v6936_v62  ;;  %v8074_v15 = vpop.f32.mrb[102].mxu1 }
 0x73a   : > { %6321 = vmatprep.subr.bf16.mxu0 %v7261_v11  ;;  %6377 = vmatprep.subr.bf16.mxu1 %v7261_v11  ;;  %v2819_v16 = vpack.c.bf16 %v8074_v15, %v8072_v63  ;;  %v6248_v17 = vpop.f32.mrb[103].mxu1 }
 0x73d   : > { %6322 = vmatpush3.bf16.msra.mxu0 %v6927_v13  ;;  %6378 = vmatpush3.bf16.msra.mxu1 %v6938_v14 }
 0x73e   : > { %6323 = vmatprep.subr.bf16.mxu0 %v7261_v11  ;;  %6379 = vmatprep.subr.bf16.mxu1 %v7261_v11 }
 0x73f   : > { %v8082_v23 = vpop.f32.mrb[104].mxu1 }
 0x740   : > { %v6251_v25 = vpop.f32.mrb[105].mxu1 }
 0x741   : > { %6324 = vmatpush3.bf16.msra.mxu0 %v6929_v19  ;;  %6380 = vmatpush3.bf16.msra.mxu1 %v6940_v22  ;;  %v8084_v12 = vpop.f32.mrb[106].mxu1 }
 0x742   : > { %6325 = vmatprep.subr.bf16.mxu0 %v7261_v11  ;;  %6381 = vmatprep.subr.bf16.mxu1 %v7261_v11  ;;  %v2820_v30 = vpack.c.bf16 %v8084_v12, %v8082_v23  ;;  %v6252_v31 = vpop.f32.mrb[107].mxu1 }
 0x745   : > { %6326 = vmatpush3.bf16.msra.mxu0 %v6931_v6  ;;  %6382 = vmatpush3.bf16.msra.mxu1 %v6942_v10 }
 0x746   : > { %6327 = vmatprep.subr.bf16.mxu0 %v7261_v11  ;;  %6383 = vmatprep.subr.bf16.mxu1 %v7261_v11 }
 0x749   : > { %6328 = vmatpush3.bf16.msra.mxu0 %v6933_v18  ;;  %6384 = vmatpush3.bf16.msra.mxu1 %v6944_v24 }
 0x74a   : > { %6353 = vmatprep.subr.bf16.mxu0 %v7261_v11  ;;  %6385 = vmatprep.subr.bf16.mxu1 %v7261_v11 }
 0x74c   : > { %6330 = vmatmul.mubr.bf16.vlgmr.msra.gmra.mrb[84].mxu0 %v2815_v21  ;;  %v6943_v21 = vld [vmem:[#allocation7 + $0x5e0] sm:$0xff]  }
 0x74d   : > { %6354 = vmatpush3.bf16.msra.mxu0 %v6935_v29  ;;  %6386 = vmatpush3.bf16.msra.mxu1 %v6946_v32 }
 0x74e   : > { %6355 = vmatprep.subr.bf16.mxu0 %v7261_v11  ;;  %6387 = vmatprep.subr.bf16.mxu1 %v7261_v11 }
 0x74f   : > { %6369 = vmatprep.mubr.msk.bf16.mxu0 %vm7262_vm3, %v7261_v11 }
 0x751   : > { %6356 = vmatpush3.bf16.msra.mxu0 %v6937_v34  ;;  %6388 = vmatpush3.bf16.msra.mxu1 %v6948_v35 }
 0x752   : > { %6357 = vmatprep.subr.bf16.mxu0 %v7261_v11  ;;  %6413 = vmatprep.subr.bf16.mxu1 %v7261_v11 }
 0x754   : > { %6390 = vmatmul.mubr.bf16.vlgmr.msra.gmra.mrb[116].mxu1 %v2818_v5 }
 0x755   : > { %6358 = vmatpush3.bf16.msra.mxu0 %v6939_v36  ;;  %6414 = vmatpush3.bf16.msra.mxu1 %v6950_v37 }
 0x756   : > { %6359 = vmatprep.subr.bf16.mxu0 %v7261_v11  ;;  %6415 = vmatprep.subr.bf16.mxu1 %v7261_v11 }
 0x757   : > { %6429 = vmatprep.mubr.msk.bf16.mxu1 %vm7262_vm3, %v7261_v11 }
 0x759   : > { %6360 = vmatpush3.bf16.msra.mxu0 %v6941_v28  ;;  %6416 = vmatpush3.bf16.msra.mxu1 %v6952_v20 }
 0x75a   : > { %6361 = vmatprep.subr.bf16.mxu0 %v7261_v11  ;;  %6417 = vmatprep.subr.bf16.mxu1 %v7261_v11 }
 0x75d   : > { %6362 = vmatpush3.bf16.msra.mxu0 %v6943_v21  ;;  %6418 = vmatpush3.bf16.msra.mxu1 %v6954_v38 }
 0x75e   : > { %6363 = vmatprep.subr.bf16.mxu0 %v7261_v11  ;;  %6419 = vmatprep.subr.bf16.mxu1 %v7261_v11 }
 0x761   : > { %6364 = vmatpush3.bf16.msra.mxu0 %v6945_v39  ;;  %6420 = vmatpush3.bf16.msra.mxu1 %v6956_v40 }
 0x762   : > { %6365 = vmatprep.subr.bf16.mxu0 %v7261_v11  ;;  %6421 = vmatprep.subr.bf16.mxu1 %v7261_v11 }
 0x765   : > { %6366 = vmatpush3.bf16.msra.mxu0 %v6947_v43  ;;  %6422 = vmatpush3.bf16.msra.mxu1 %v6958_v48 }
 0x766   : > { %6367 = vmatprep.subr.bf16.mxu0 %v7261_v11  ;;  %6423 = vmatprep.subr.bf16.mxu1 %v7261_v11 }
 0x769   : > { %6368 = vmatpush3.bf16.msra.mxu0 %v6949_v26  ;;  %6424 = vmatpush3.bf16.msra.mxu1 %v6960_v27 }
 0x76a   : > { %6393 = vmatprep.subr.bf16.mxu0 %v7261_v11  ;;  %6425 = vmatprep.subr.bf16.mxu1 %v7261_v11 }
 0x76c   : > { %6370 = vmatmul.mubr.bf16.vlgmr.msra.gmra.mrb[88].mxu0 %v2817_v59  ;;  %v6961_v59 = vld [vmem:[#allocation7 + $0x668] sm:$0xff]  }
 0x76d   : > { %6394 = vmatpush3.bf16.msra.mxu0 %v6951_v56  ;;  %6426 = vmatpush3.bf16.msra.mxu1 %v6962_v60 }
 0x76e   : > { %6395 = vmatprep.subr.bf16.mxu0 %v7261_v11  ;;  %6427 = vmatprep.subr.bf16.mxu1 %v7261_v11 }
 0x76f   : > { %6409 = vmatprep.mubr.msk.bf16.mxu0 %vm7262_vm3, %v7261_v11 }
 0x771   : > { %6396 = vmatpush3.bf16.msra.mxu0 %v6953_v61  ;;  %6428 = vmatpush3.bf16.msra.mxu1 %v6964_v0  ;;  %v6967_v61 = vld [vmem:[#allocation7 + $0x700] sm:$0xff]  }
 0x772   : > { %6397 = vmatprep.subr.bf16.mxu0 %v7261_v11  ;;  %6471 = vmatprep.subr.bf16.mxu1 %v7261_v11 }
 0x774   : > { %6430 = vmatmul.mubr.bf16.vlgmr.msra.gmra.mrb[120].mxu1 %v2820_v30 }
 0x775   : > { %6398 = vmatpush3.bf16.msra.mxu0 %v6955_v2  ;;  %6487 = vmatprep.mubr.msk.bf16.mxu1 %vm7262_vm3, %v7261_v11 }
 0x776   : > { %6399 = vmatprep.subr.bf16.mxu0 %v7261_v11  ;;  %6472 = vmatpush3.bf16.msra.mxu1 %v6967_v61  ;;  %v6980_v61 = vld [vmem:[#allocation7 + $0x6c8] sm:$0xff]  }
 0x777   : > { %6473 = vmatprep.subr.bf16.mxu1 %v7261_v11 }
 0x779   : > { %6400 = vmatpush3.bf16.msra.mxu0 %v6957_v50  ;;  %v6968_v50 = vld [vmem:[#allocation7 + $0x708] sm:$0xff]  }
 0x77a   : > { %6401 = vmatprep.subr.bf16.mxu0 %v7261_v11  ;;  %6474 = vmatpush3.bf16.msra.mxu1 %v6968_v50  ;;  %v6981_v50 = vld [vmem:[#allocation7 + $0x6d0] sm:$0xff]  }
 0x77b   : > { %6475 = vmatprep.subr.bf16.mxu1 %v7261_v11 }
 0x77d   : > { %6402 = vmatpush3.bf16.msra.mxu0 %v6959_v57  ;;  %v6969_v57 = vld [vmem:[#allocation7 + $0x710] sm:$0xff]  }
 0x77e   : > { %6403 = vmatprep.subr.bf16.mxu0 %v7261_v11  ;;  %6476 = vmatpush3.bf16.msra.mxu1 %v6969_v57 }
 0x77f   : > { %6477 = vmatprep.subr.bf16.mxu1 %v7261_v11 }
 0x781   : > { %6404 = vmatpush3.bf16.msra.mxu0 %v6961_v59  ;;  %v6971_v59 = vld [vmem:[#allocation7 + $0x718] sm:$0xff]  }
 0x782   : > { %6405 = vmatprep.subr.bf16.mxu0 %v7261_v11  ;;  %6478 = vmatpush3.bf16.msra.mxu1 %v6971_v59  ;;  %v6991_v59 = vld [vmem:[#allocation7 + $0x7c0] sm:$0xff]  }
 0x783   : > { %6479 = vmatprep.subr.bf16.mxu1 %v7261_v11 }
 0x785   : > { %6406 = vmatpush3.bf16.msra.mxu0 %v6963_v1  ;;  %v6972_v1 = vld [vmem:[#allocation7 + $0x720] sm:$0xff]  }
 0x786   : > { %6407 = vmatprep.subr.bf16.mxu0 %v7261_v11  ;;  %6480 = vmatpush3.bf16.msra.mxu1 %v6972_v1 }
 0x787   : > { %6481 = vmatprep.subr.bf16.mxu1 %v7261_v11 }
 0x789   : > { %6408 = vmatpush3.bf16.msra.mxu0 %v6965_v4  ;;  %v6974_v4 = vld [vmem:[#allocation7 + $0x728] sm:$0xff]  }
 0x78a   : > { %6433 = vmatprep.subr.bf16.mxu0 %v7261_v11  ;;  %6482 = vmatpush3.bf16.msra.mxu1 %v6974_v4 }
 0x78b   : > { %6483 = vmatprep.subr.bf16.mxu1 %v7261_v11 }
 0x78c   : > { %6410 = vmatmul.mubr.bf16.vlgmr.msra.gmra.mrb[92].mxu0 %v2819_v16 }
 0x78d   : > { %6435 = vmatprep.mubr.msk.bf16.mxu0 %vm7262_vm3, %v7261_v11 }
 0x7df   : > { %v2937_v8 = vpop.f32.mrb[76].mxu0 }
 0x7e0   : > { %v6271_v3 = vpop.f32.mrb[77].mxu0 }
 0x7e1   : > { %v2940_v5 = vpop.f32.mrb[78].mxu0 }
 0x7e2   : > { %v6272_v7 = vpop.f32.mrb[79].mxu0 }
 0x7e3   : > { %v5326_v7 = vld [vmem:[#allocation8 + $0x2] ss:$0 sm:$0xff] }
 0x7e7   : > { %v3132_v58 = vpop.f32.mrb[108].mxu1 }
 0x7e8   : > { %v6311_v62 = vpop.f32.mrb[109].mxu1 }
 0x7e9   : > { %v3135_v9 = vpop.f32.mrb[110].mxu1 }
 0x7ea   : > { %v6312_v13 = vpop.f32.mrb[111].mxu1 }
 0x7ff   : > { %v3026_v14 = vpop.f32.mrb[80].mxu0 }
 0x800   : > { %v3027_v17 = vadd.f32 %v3026_v14, %v2937_v8  ;;  %v6291_v19 = vpop.f32.mrb[81].mxu0 }
 0x801   : > { %v3029_v22 = vpop.f32.mrb[82].mxu0 }
 0x802   : > { %v3030_v23 = vadd.f32 %v3029_v22, %v2940_v5  ;;  %v6292_v25 = vpop.f32.mrb[83].mxu0  ;;  %v3139_v6 = vadd.f32 %v3132_v58, %v3027_v17 }
 0x804   : > { %v3140_v63 = vadd.f32 %v3135_v9, %v3030_v23 }
 0x807   : > { %v3348_v15 = vpop.f32.mrb[112].mxu1 }
 0x808   : > { %v6351_v16 = vpop.f32.mrb[113].mxu1 }
 0x809   : > { %v3351_v10 = vpop.f32.mrb[114].mxu1 }
 0x80a   : > { %v6352_v12 = vpop.f32.mrb[115].mxu1 }
 0x81f   : > { %v3240_v30 = vpop.f32.mrb[84].mxu0 }
 0x820   : > { %v3247_v31 = vadd.f32 %v3240_v30, %v3139_v6  ;;  %v6331_v18 = vpop.f32.mrb[85].mxu0 }
 0x821   : > { %v3243_v24 = vpop.f32.mrb[86].mxu0 }
 0x822   : > { %v3248_v29 = vadd.f32 %v3243_v24, %v3140_v63  ;;  %v6332_v32 = vpop.f32.mrb[87].mxu0  ;;  %v3355_v34 = vadd.f32 %v3348_v15, %v3247_v31 }
 0x824   : > { %v3356_v35 = vadd.f32 %v3351_v10, %v3248_v29 }
 0x827   : > { %v3564_v36 = vpop.f32.mrb[116].mxu1 }
 0x828   : > { %v6391_v37 = vpop.f32.mrb[117].mxu1 }
 0x829   : > { %v3567_v28 = vpop.f32.mrb[118].mxu1 }
 0x82a   : > { %v6392_v20 = vpop.f32.mrb[119].mxu1 }
 0x83f   : > { %v3456_v21 = vpop.f32.mrb[88].mxu0 }
 0x840   : > { %v3463_v38 = vadd.f32 %v3456_v21, %v3355_v34  ;;  %v6371_v39 = vpop.f32.mrb[89].mxu0  ;;  %v6966_v21 = vld [vmem:[#allocation7 + $0x740] sm:$0xff]  }
 0x841   : > { %v3459_v40 = vpop.f32.mrb[90].mxu0 }
 0x842   : > { %v3464_v43 = vadd.f32 %v3459_v40, %v3356_v35  ;;  %v6372_v48 = vpop.f32.mrb[91].mxu0  ;;  %v3571_v26 = vadd.f32 %v3564_v36, %v3463_v38  ;;  %v6970_v38 = vld [vmem:[#allocation7 + $0x748] sm:$0xff]  }
 0x844   : > { %v3572_v27 = vadd.f32 %v3567_v28, %v3464_v43 }
 0x847   : > { %v3780_v56 = vpop.f32.mrb[120].mxu1 }
 0x848   : > { %v6431_v60 = vpop.f32.mrb[121].mxu1 }
 0x849   : > { %v3783_v0 = vpop.f32.mrb[122].mxu1 }
 0x84a   : > { %v6432_v2 = vpop.f32.mrb[123].mxu1 }
 0x85f   : > { %v3672_v8 = vpop.f32.mrb[92].mxu0 }
 0x860   : > { %v3679_v3 = vadd.f32 %v3672_v8, %v3571_v26  ;;  %v6411_v5 = vpop.f32.mrb[93].mxu0  ;;  %v6982_v8 = vld [vmem:[#allocation7 + $0x6d8] sm:$0xff]  }
 0x861   : > { %v3675_v58 = vpop.f32.mrb[94].mxu0 }
 0x862   : > { %v3787_v62 = vadd.f32 %v3780_v56, %v3679_v3  ;;  %v3680_v9 = vadd.f32 %v3675_v58, %v3572_v27  ;;  %v6412_v13 = vpop.f32.mrb[95].mxu0  ;;  %v6978_v27 = vld [vmem:[#allocation7 + $0x6c0] sm:$0xff]   ;;  %v6993_v3 = vld [vmem:[#allocation7 + $0x7c8] sm:$0xff]  }
 0x863   : > { %v6984_v58 = vld [vmem:[#allocation7 + $0x6e0] sm:$0xff]  }
 0x864   : > { %v3797_v14 = vadd.f32 %v5326_v7, %v3787_v62  ;;  %v3788_v17 = vadd.f32 %v3783_v0, %v3680_v9  ;;  %v6995_v62 = vld [vmem:[#allocation7 + $0x7d0] sm:$0xff]  }
 0x866   : > { %v3801_v19 = vmul.f32 0.044715, %v3797_v14  ;;  %v3798_v22 = vadd.f32 %v5326_v7, %v3788_v17  ;;  %v3799_v18 = vmul.f32 0.5, %v3797_v14  ;;  %v6985_v17 = vld [vmem:[#allocation7 + $0x6e8] sm:$0xff]  }
 0x868   : > { %v3803_v23 = vmul.f32 %v3801_v19, %v3797_v14  ;;  %v3802_v25 = vmul.f32 0.044715, %v3798_v22  ;;  %v3800_v32 = vmul.f32 0.5, %v3798_v22  ;;  %v6997_v19 = vld [vmem:[#allocation7 + $0x7d8] sm:$0xff]  }
 0x86a   : > { %v3805_v6 = vmul.f32 %v3803_v23, %v3797_v14  ;;  %v3804_v63 = vmul.f32 %v3802_v25, %v3798_v22  ;;  %v6987_v25 = vld [vmem:[#allocation7 + $0x6f0] sm:$0xff]  }
 0x86c   : > { %v3807_v15 = vadd.f32 %v3805_v6, %v3797_v14  ;;  %v3806_v16 = vmul.f32 %v3804_v63, %v3798_v22  ;;  %v6999_v6 = vld [vmem:[#allocation7 + $0x7e0] sm:$0xff]  }
 0x86e   : > { %v3808_v10 = vadd.f32 %v3806_v16, %v3798_v22  ;;  %v3809_v12 = vmul.f32 0.7978846, %v3807_v15 }
 0x870   : > { %v3810_v30 = vmul.f32 0.7978846, %v3808_v10  ;;  %7046 = vtanh.f32 %v3809_v12  ;;  %v6988_v10 = vld [vmem:[#allocation7 + $0x6f8] sm:$0xff]   ;;  %v7001_v12 = vld [vmem:[#allocation7 + $0x7e8] sm:$0xff]  }
 0x872   : > { %7048 = vtanh.f32 %v3810_v30 }
 0x87a   : > { %v7047_v31 = vpop.eup %7046 }
 0x87b   : > { %v3813_v24 = vadd.f32 1.0, %v7047_v31 }
 0x87c   : > { %v7049_v29 = vpop.eup %7048 }
 0x87d   : > { %v3814_v34 = vadd.f32 1.0, %v7049_v29  ;;  %v3815_v35 = vmul.f32 %v3813_v24, %v3799_v18  ;;  %v6990_v18 = vld [vmem:[#allocation7 + $0x780] sm:$0xff]   ;;  %v7003_v24 = vld [vmem:[#allocation7 + $0x7f0] sm:$0xff]  }
 0x87f   : > { %v3816_v36 = vmul.f32 %v3814_v34, %v3800_v32  ;;  %v8152_v37 = vadd.f32 %v3815_v35, %v7729_v41  ;;  %v6973_v41 = vld [vmem:[#allocation7 + $0x750] sm:$0xff]   ;;  %v6992_v35 = vld [vmem:[#allocation7 + $0x788] sm:$0xff]  }
 0x881   : > { %v8155_v28 = vadd.f32 %v3816_v36, %v7731_v42  ;;  %v6975_v42 = vld [vmem:[#allocation7 + $0x730] sm:$0xff]   ;;  %v7005_v36 = vld [vmem:[#allocation7 + $0x7f8] sm:$0xff]  }
 0x882   : > { %6484 = vmatpush3.bf16.msra.mxu1 %v6975_v42 }
 0x883   : > { %v3819_v20 = vpack.c.bf16 %v8155_v28, %v8152_v37  ;;  %6485 = vmatprep.subr.bf16.mxu1 %v7261_v11 }
 0x885   : > { %6434 = vmatpush3.bf16.msra.mxu0 %v3819_v20 }
 0x886   : > { %6511 = vmatprep.subr.bf16.mxu0 %v7261_v11 }
 0x888   : > { %6436 = vmatmul.mubr.msk.bf16.vlgmr.msra.gmra.mrb[96].mxu0 %vm455_vm4, %v7928_v53  ;;  %v6976_v53 = vld [vmem:[#allocation7 + $0x758] sm:$0xff]  }
 0x889   : > { %6439 = vmatprep.mubr.msk.bf16.mxu0 %vm7262_vm3, %v7261_v11  ;;  %6512 = vmatpush3.bf16.msra.mxu0 %v6966_v21 }
 0x88a   : > { %6513 = vmatprep.subr.bf16.mxu0 %v7261_v11 }
 0x88d   : > { %6514 = vmatpush3.bf16.msra.mxu0 %v6970_v38  ;;  %v6994_v38 = vld [vmem:[#allocation7 + $0x790] sm:$0xff]  }
 0x88e   : > { %6515 = vmatprep.subr.bf16.mxu0 %v7261_v11 }
 0x890   : > { %6440 = vmatmul.mubr.msk.bf16.gmra.mrb[100].mxu0 %vm455_vm4, %v7939_v54  ;;  %v6977_v54 = vld [vmem:[#allocation7 + $0x738] sm:$0xff]  }
 0x891   : > { %6443 = vmatprep.mubr.msk.bf16.mxu0 %vm7262_vm3, %v7261_v11  ;;  %6516 = vmatpush3.bf16.msra.mxu0 %v6973_v41  ;;  %v7007_v41 = vld [vmem:[#allocation7 + $0x840] sm:$0xff]  }
 0x892   : > { %6517 = vmatprep.subr.bf16.mxu0 %v7261_v11  ;;  %6486 = vmatpush3.bf16.msra.mxu1 %v6977_v54 }
 0x893   : > { %6491 = vmatprep.subr.bf16.mxu1 %v7261_v11 }
 0x895   : > { %6518 = vmatpush3.bf16.msra.mxu0 %v6976_v53 }
 0x896   : > { %6519 = vmatprep.subr.bf16.mxu0 %v7261_v11 }
 0x898   : > { %6444 = vmatmul.mubr.msk.bf16.gmra.mrb[104].mxu0 %vm455_vm4, %v7949_v33  ;;  %v6979_v33 = vld [vmem:[#allocation7 + $0x760] sm:$0xff]  }
 0x899   : > { %6447 = vmatprep.mubr.msk.bf16.mxu0 %vm7262_vm3, %v7261_v11  ;;  %6520 = vmatpush3.bf16.msra.mxu0 %v6979_v33  ;;  %v6996_v33 = vld [vmem:[#allocation7 + $0x798] sm:$0xff]  }
 0x89a   : > { %6521 = vmatprep.subr.bf16.mxu0 %v7261_v11 }
 0x8a0   : > { %6448 = vmatmul.mubr.msk.bf16.gmra.mrb[108].mxu0 %vm455_vm4, %v7958_v44  ;;  %v6983_v44 = vld [vmem:[#allocation7 + $0x768] sm:$0xff]  }
 0x8a1   : > { %6451 = vmatprep.mubr.msk.bf16.mxu0 %vm7262_vm3, %v7261_v11  ;;  %6522 = vmatpush3.bf16.msra.mxu0 %v6983_v44  ;;  %v7009_v44 = vld [vmem:[#allocation7 + $0x848] sm:$0xff]  }
 0x8a2   : > { %6523 = vmatprep.subr.bf16.mxu0 %v7261_v11 }
 0x8a8   : > { %6452 = vmatmul.mubr.msk.bf16.gmra.mrb[112].mxu0 %vm455_vm4, %v7967_v45  ;;  %v6986_v45 = vld [vmem:[#allocation7 + $0x770] sm:$0xff]  }
 0x8a9   : > { %6455 = vmatprep.mubr.msk.bf16.mxu0 %vm7262_vm3, %v7261_v11  ;;  %6524 = vmatpush3.bf16.msra.mxu0 %v6986_v45 }
 0x8aa   : > { %6525 = vmatprep.subr.bf16.mxu0 %v7261_v11 }
 0x8b0   : > { %6456 = vmatmul.mubr.msk.bf16.gmra.mrb[116].mxu0 %vm455_vm4, %v7976_v55  ;;  %v6989_v55 = vld [vmem:[#allocation7 + $0x778] sm:$0xff]  }
 0x8b1   : > { %6459 = vmatprep.mubr.msk.bf16.mxu0 %vm7262_vm3, %v7261_v11  ;;  %6526 = vmatpush3.bf16.msra.mxu0 %v6989_v55 }
 0x8b2   : > { %6551 = vmatprep.subr.bf16.mxu0 %v7261_v11 }
 0x8b8   : > { %6460 = vmatmul.mubr.msk.bf16.gmra.mrb[120].mxu0 %vm455_vm4, %v7985_v49 }
 0x8b9   : > { %6463 = vmatprep.mubr.msk.bf16.mxu0 %vm7262_vm3, %v7261_v11 }
 0x8c0   : > { %6464 = vmatmul.mubr.msk.bf16.gmra.mrb[124].mxu0 %vm455_vm4, %v7994_v51 }
 0x8c1   : > { %6467 = vmatprep.mubr.msk.bf16.mxu0 %vm7262_vm3, %v7261_v11 }
 0x8c8   : > { %6468 = vmatmul.mubr.msk.bf16.gmra.mrb[128].mxu0 %vm455_vm4, %v8003_v52 }
 0x8c9   : > { %6527 = vmatprep.mubr.msk.bf16.mxu0 %vm7262_vm3, %v7261_v11 }
 0x95b   : > { %v8206_v49 = vpop.f32.mrb[96].mxu0 }
 0x95c   : > { %v6437_v51 = vpop.f32.mrb[97].mxu0 }
 0x95d   : > { %v8208_v52 = vpop.f32.mrb[98].mxu0  ;;  %v7011_v51 = vld [vmem:[#allocation7 + $0x850] sm:$0xff]  }
 0x95e   : > { %v3925_v39 = vpack.c.bf16 %v8208_v52, %v8206_v49  ;;  %v6438_v40 = vpop.f32.mrb[99].mxu0  ;;  %v6998_v49 = vld [vmem:[#allocation7 + $0x7a0] sm:$0xff]  }
 0x963   : > { %v3862_v43 = vpop.f32.mrb[100].mxu0 }
 0x964   : > { %v6441_v48 = vpop.f32.mrb[101].mxu0 }
 0x965   : > { %v3865_v26 = vpop.f32.mrb[102].mxu0  ;;  %v7013_v48 = vld [vmem:[#allocation7 + $0x858] sm:$0xff]  }
 0x966   : > { %v3926_v56 = vpack.c.bf16 %v3865_v26, %v3862_v43  ;;  %v6442_v60 = vpop.f32.mrb[103].mxu0  ;;  %v7000_v43 = vld [vmem:[#allocation7 + $0x7a8] sm:$0xff]  }
 0x967   : > { %v7015_v60 = vld [vmem:[#allocation7 + $0x860] sm:$0xff]  }
 0x968   : > { %6488 = vmatmul.mubr.bf16.vlgmr.msra.gmra.mrb[124].mxu1 %v3926_v56  ;;  %v7002_v56 = vld [vmem:[#allocation7 + $0x7b0] sm:$0xff]  }
 0x969   : > { %6492 = vmatpush3.bf16.msra.mxu1 %v6978_v27  ;;  %6507 = vmatprep.mubr.msk.bf16.mxu1 %vm7262_vm3, %v7261_v11 }
 0x96a   : > { %6493 = vmatprep.subr.bf16.mxu1 %v7261_v11 }
 0x96b   : > { %v3870_v0 = vpop.f32.mrb[104].mxu0 }
 0x96c   : > { %v6445_v2 = vpop.f32.mrb[105].mxu0 }
 0x96d   : > { %6494 = vmatpush3.bf16.msra.mxu1 %v6980_v61  ;;  %v3873_v57 = vpop.f32.mrb[106].mxu0 }
 0x96e   : > { %6495 = vmatprep.subr.bf16.mxu1 %v7261_v11  ;;  %v3927_v1 = vpack.c.bf16 %v3873_v57, %v3870_v0  ;;  %v6446_v4 = vpop.f32.mrb[107].mxu0  ;;  %v7017_v57 = vld [vmem:[#allocation7 + $0x868] sm:$0xff]  }
 0x96f   : > { %v7008_v4 = vld [vmem:[#allocation7 + $0x808] sm:$0xff]  }
 0x970   : > { %6528 = vmatmul.mubr.bf16.vlgmr.msra.gmra.mrb[132].mxu0 %v3927_v1  ;;  %v7019_v1 = vld [vmem:[#allocation7 + $0x870] sm:$0xff]  }
 0x971   : > { %6496 = vmatpush3.bf16.msra.mxu1 %v6981_v50  ;;  %6552 = vmatpush3.bf16.msra.mxu0 %v6991_v59  ;;  %v7004_v50 = vld [vmem:[#allocation7 + $0x7b8] sm:$0xff]   ;;  %v7006_v59 = vld [vmem:[#allocation7 + $0x800] sm:$0xff]  }
 0x972   : > { %6497 = vmatprep.subr.bf16.mxu1 %v7261_v11  ;;  %6553 = vmatprep.subr.bf16.mxu0 %v7261_v11 }
 0x973   : > { %v8218_v5 = vpop.f32.mrb[108].mxu0  ;;  %6567 = vmatprep.mubr.msk.bf16.mxu0 %vm7262_vm3, %v7261_v11 }
 0x974   : > { %v6449_v7 = vpop.f32.mrb[109].mxu0 }
 0x975   : > { %6498 = vmatpush3.bf16.msra.mxu1 %v6982_v8  ;;  %6554 = vmatpush3.bf16.msra.mxu0 %v6993_v3  ;;  %v8222_v9 = vpop.f32.mrb[110].mxu0  ;;  %v7021_v8 = vld [vmem:[#allocation7 + $0x878] sm:$0xff]   ;;  %v7010_v3 = vld [vmem:[#allocation7 + $0x810] sm:$0xff]   ;;  %v7023_v7 = vld [vmem:[#allocation7 + $0x8c0] sm:$0xff]  }
 0x976   : > { %6499 = vmatprep.subr.bf16.mxu1 %v7261_v11  ;;  %6555 = vmatprep.subr.bf16.mxu0 %v7261_v11  ;;  %v3928_v13 = vpack.c.bf16 %v8222_v9, %v8218_v5  ;;  %v6450_v14 = vpop.f32.mrb[111].mxu0  ;;  %v7012_v5 = vld [vmem:[#allocation7 + $0x818] sm:$0xff]   ;;  %v7027_v9 = vld [vmem:[#allocation7 + $0x8d0] sm:$0xff]  }
 0x977   : > { %v7029_v14 = vld [vmem:[#allocation7 + $0x8d8] sm:$0xff]  }
 0x979   : > { %6500 = vmatpush3.bf16.msra.mxu1 %v6984_v58  ;;  %6556 = vmatpush3.bf16.msra.mxu0 %v6995_v62  ;;  %v7025_v58 = vld [vmem:[#allocation7 + $0x8c8] sm:$0xff]   ;;  %v7014_v62 = vld [vmem:[#allocation7 + $0x820] sm:$0xff]  }
 0x97a   : > { %6501 = vmatprep.subr.bf16.mxu1 %v7261_v11  ;;  %6557 = vmatprep.subr.bf16.mxu0 %v7261_v11 }
 0x97b   : > { %v3886_v22 = vpop.f32.mrb[112].mxu0 }
 0x97c   : > { %v6453_v23 = vpop.f32.mrb[113].mxu0 }
 0x97d   : > { %6502 = vmatpush3.bf16.msra.mxu1 %v6985_v17  ;;  %6558 = vmatpush3.bf16.msra.mxu0 %v6997_v19  ;;  %v3889_v63 = vpop.f32.mrb[114].mxu0  ;;  %v7018_v17 = vld [vmem:[#allocation7 + $0x830] sm:$0xff]   ;;  %v7031_v19 = vld [vmem:[#allocation7 + $0x8e0] sm:$0xff]   ;;  %v7033_v23 = vld [vmem:[#allocation7 + $0x8e8] sm:$0xff]  }
 0x97e   : > { %6503 = vmatprep.subr.bf16.mxu1 %v7261_v11  ;;  %6559 = vmatprep.subr.bf16.mxu0 %v7261_v11  ;;  %v3929_v15 = vpack.c.bf16 %v3889_v63, %v3886_v22  ;;  %v6454_v16 = vpop.f32.mrb[115].mxu0  ;;  %v7020_v22 = vld [vmem:[#allocation7 + $0x838] sm:$0xff]   ;;  %v7024_v63 = vld [vmem:[#allocation7 + $0x888] sm:$0xff]  }
 0x97f   : > { %v7026_v16 = vld [vmem:[#allocation7 + $0x890] sm:$0xff]  }
 0x981   : > { %6504 = vmatpush3.bf16.msra.mxu1 %v6987_v25  ;;  %6560 = vmatpush3.bf16.msra.mxu0 %v6999_v6  ;;  %v7022_v25 = vld [vmem:[#allocation7 + $0x880] sm:$0xff]   ;;  %v7035_v6 = vld [vmem:[#allocation7 + $0x8f0] sm:$0xff]  }
 0x982   : > { %6505 = vmatprep.subr.bf16.mxu1 %v7261_v11  ;;  %6561 = vmatprep.subr.bf16.mxu0 %v7261_v11 }
 0x983   : > { %v8234_v30 = vpop.f32.mrb[116].mxu0 }
 0x984   : > { %v6457_v31 = vpop.f32.mrb[117].mxu0 }
 0x985   : > { %6506 = vmatpush3.bf16.msra.mxu1 %v6988_v10  ;;  %6562 = vmatpush3.bf16.msra.mxu0 %v7001_v12  ;;  %v8236_v29 = vpop.f32.mrb[118].mxu0  ;;  %v7028_v10 = vld [vmem:[#allocation7 + $0x898] sm:$0xff]   ;;  %v7030_v12 = vld [vmem:[#allocation7 + $0x8a0] sm:$0xff]   ;;  %v7034_v31 = vld [vmem:[#allocation7 + $0x8b0] sm:$0xff]  }
 0x986   : > { %6531 = vmatprep.subr.bf16.mxu1 %v7261_v11  ;;  %6563 = vmatprep.subr.bf16.mxu0 %v7261_v11  ;;  %v3930_v32 = vpack.c.bf16 %v8236_v29, %v8234_v30  ;;  %v6458_v34 = vpop.f32.mrb[119].mxu0  ;;  %v7032_v30 = vld [vmem:[#allocation7 + $0x8a8] sm:$0xff]  }
 0x988   : > { %6508 = vmatmul.mubr.bf16.vlgmr.msra.gmra.mrb[128].mxu1 %v3925_v39 }
 0x989   : > { %6532 = vmatpush3.bf16.msra.mxu1 %v6990_v18  ;;  %6564 = vmatpush3.bf16.msra.mxu0 %v7003_v24  ;;  %v7036_v18 = vld [vmem:[#allocation7 + $0x8b8] sm:$0xff]  }
 0x98a   : > { %6533 = vmatprep.subr.bf16.mxu1 %v7261_v11  ;;  %6565 = vmatprep.subr.bf16.mxu0 %v7261_v11 }
 0x98b   : > { %6547 = vmatprep.mubr.msk.bf16.mxu1 %vm7262_vm3, %v7261_v11  ;;  %v8249_v20 = vpop.f32.mrb[120].mxu0 }
 0x98c   : > { %v6461_v21 = vpop.f32.mrb[121].mxu0 }
 0x98d   : > { %6534 = vmatpush3.bf16.msra.mxu1 %v6992_v35  ;;  %6566 = vmatpush3.bf16.msra.mxu0 %v7005_v36  ;;  %v8251_v42 = vpop.f32.mrb[122].mxu0 }
 0x98e   : > { %6535 = vmatprep.subr.bf16.mxu1 %v7261_v11  ;;  %6591 = vmatprep.subr.bf16.mxu0 %v7261_v11  ;;  %v3931_v53 = vpack.c.bf16 %v8251_v42, %v8249_v20  ;;  %v6462_v54 = vpop.f32.mrb[123].mxu0 }
 0x990   : > { %6568 = vmatmul.mubr.bf16.vlgmr.msra.gmra.mrb[136].mxu0 %v3929_v15  ;;  %v7037_v15 = vld [vmem:[#allocation7 + $0x8f8] sm:$0xff]  }
 0x991   : > { %6536 = vmatpush3.bf16.msra.mxu1 %v6994_v38  ;;  %6592 = vmatpush3.bf16.msra.mxu0 %v7007_v41 }
 0x992   : > { %6537 = vmatprep.subr.bf16.mxu1 %v7261_v11  ;;  %6593 = vmatprep.subr.bf16.mxu0 %v7261_v11 }
 0x993   : > { %6607 = vmatprep.mubr.msk.bf16.mxu0 %vm7262_vm3, %v7261_v11  ;;  %v8261_v45 = vpop.f32.mrb[124].mxu0 }
 0x994   : > { %v6465_v55 = vpop.f32.mrb[125].mxu0 }
 0x995   : > { %6538 = vmatpush3.bf16.msra.mxu1 %v6996_v33  ;;  %6594 = vmatpush3.bf16.msra.mxu0 %v7009_v44  ;;  %v8263_v52 = vpop.f32.mrb[126].mxu0 }
 0x996   : > { %6539 = vmatprep.subr.bf16.mxu1 %v7261_v11  ;;  %6595 = vmatprep.subr.bf16.mxu0 %v7261_v11  ;;  %v3932_v39 = vpack.c.bf16 %v8263_v52, %v8261_v45  ;;  %v6466_v40 = vpop.f32.mrb[127].mxu0 }
 0x999   : > { %6540 = vmatpush3.bf16.msra.mxu1 %v6998_v49  ;;  %6596 = vmatpush3.bf16.msra.mxu0 %v7011_v51 }
 0x99a   : > { %6541 = vmatprep.subr.bf16.mxu1 %v7261_v11  ;;  %6597 = vmatprep.subr.bf16.mxu0 %v7261_v11 }
 0x99b   : > { %v8271_v26 = vpop.f32.mrb[128].mxu0 }
 0x99c   : > { %v6469_v27 = vpop.f32.mrb[129].mxu0 }
 0x99d   : > { %6542 = vmatpush3.bf16.msra.mxu1 %v7000_v43  ;;  %6598 = vmatpush3.bf16.msra.mxu0 %v7013_v48  ;;  %v8273_v61 = vpop.f32.mrb[130].mxu0 }
 0x99e   : > { %6543 = vmatprep.subr.bf16.mxu1 %v7261_v11  ;;  %6599 = vmatprep.subr.bf16.mxu0 %v7261_v11  ;;  %v3933_v0 = vpack.c.bf16 %v8273_v61, %v8271_v26  ;;  %v6470_v2 = vpop.f32.mrb[131].mxu0 }
 0x9a1   : > { %6544 = vmatpush3.bf16.msra.mxu1 %v7002_v56  ;;  %6600 = vmatpush3.bf16.msra.mxu0 %v7015_v60 }
 0x9a2   : > { %6545 = vmatprep.subr.bf16.mxu1 %v7261_v11  ;;  %6601 = vmatprep.subr.bf16.mxu0 %v7261_v11 }
 0x9a5   : > { %6546 = vmatpush3.bf16.msra.mxu1 %v7004_v50  ;;  %6602 = vmatpush3.bf16.msra.mxu0 %v7017_v57 }
 0x9a6   : > { %6571 = vmatprep.subr.bf16.mxu1 %v7261_v11  ;;  %6603 = vmatprep.subr.bf16.mxu0 %v7261_v11 }
 0x9a8   : > { %6548 = vmatmul.mubr.bf16.vlgmr.msra.gmra.mrb[132].mxu1 %v3928_v13  ;;  %v7016_v13 = vld [vmem:[#allocation7 + $0x828] sm:$0xff]  }
 0x9a9   : > { %6572 = vmatpush3.bf16.msra.mxu1 %v7006_v59  ;;  %6604 = vmatpush3.bf16.msra.mxu0 %v7019_v1 }
 0x9aa   : > { %6573 = vmatprep.subr.bf16.mxu1 %v7261_v11  ;;  %6605 = vmatprep.subr.bf16.mxu0 %v7261_v11 }
 0x9ab   : > { %6587 = vmatprep.mubr.msk.bf16.mxu1 %vm7262_vm3, %v7261_v11 }
 0x9ad   : > { %6574 = vmatpush3.bf16.msra.mxu1 %v7008_v4  ;;  %6606 = vmatpush3.bf16.msra.mxu0 %v7021_v8 }
 0x9ae   : > { %6575 = vmatprep.subr.bf16.mxu1 %v7261_v11  ;;  %6631 = vmatprep.subr.bf16.mxu0 %v7261_v11 }
 0x9b0   : > { %6608 = vmatmul.mubr.bf16.vlgmr.msra.gmra.mrb[140].mxu0 %v3931_v53 }
 0x9b1   : > { %6576 = vmatpush3.bf16.msra.mxu1 %v7010_v3  ;;  %6632 = vmatpush3.bf16.msra.mxu0 %v7023_v7 }
 0x9b2   : > { %6577 = vmatprep.subr.bf16.mxu1 %v7261_v11  ;;  %6633 = vmatprep.subr.bf16.mxu0 %v7261_v11 }
 0x9b3   : > { %6647 = vmatprep.mubr.msk.bf16.mxu0 %vm7262_vm3, %v7261_v11 }
 0x9b5   : > { %6578 = vmatpush3.bf16.msra.mxu1 %v7012_v5  ;;  %6634 = vmatpush3.bf16.msra.mxu0 %v7025_v58 }
 0x9b6   : > { %6579 = vmatprep.subr.bf16.mxu1 %v7261_v11  ;;  %6635 = vmatprep.subr.bf16.mxu0 %v7261_v11 }
 0x9b9   : > { %6580 = vmatpush3.bf16.msra.mxu1 %v7014_v62  ;;  %6636 = vmatpush3.bf16.msra.mxu0 %v7027_v9 }
 0x9ba   : > { %6581 = vmatprep.subr.bf16.mxu1 %v7261_v11  ;;  %6637 = vmatprep.subr.bf16.mxu0 %v7261_v11 }
 0x9bd   : > { %6582 = vmatpush3.bf16.msra.mxu1 %v7016_v13  ;;  %6638 = vmatpush3.bf16.msra.mxu0 %v7029_v14 }
 0x9be   : > { %6583 = vmatprep.subr.bf16.mxu1 %v7261_v11  ;;  %6639 = vmatprep.subr.bf16.mxu0 %v7261_v11 }
 0x9c1   : > { %6584 = vmatpush3.bf16.msra.mxu1 %v7018_v17  ;;  %6640 = vmatpush3.bf16.msra.mxu0 %v7031_v19 }
 0x9c2   : > { %6585 = vmatprep.subr.bf16.mxu1 %v7261_v11  ;;  %6641 = vmatprep.subr.bf16.mxu0 %v7261_v11 }
 0x9c5   : > { %6586 = vmatpush3.bf16.msra.mxu1 %v7020_v22  ;;  %6642 = vmatpush3.bf16.msra.mxu0 %v7033_v23  ;;  %v5408_v22 = vld [vmem:[#allocation8 + $0x3] ss:$0 sm:$0xff] }
 0x9c6   : > { %6611 = vmatprep.subr.bf16.mxu1 %v7261_v11  ;;  %6643 = vmatprep.subr.bf16.mxu0 %v7261_v11 }
 0x9c8   : > { %6588 = vmatmul.mubr.bf16.vlgmr.msra.gmra.mrb[136].mxu1 %v3930_v32 }
 0x9c9   : > { %6612 = vmatpush3.bf16.msra.mxu1 %v7022_v25  ;;  %6644 = vmatpush3.bf16.msra.mxu0 %v7035_v6 }
 0x9ca   : > { %6613 = vmatprep.subr.bf16.mxu1 %v7261_v11  ;;  %6645 = vmatprep.subr.bf16.mxu0 %v7261_v11 }
 0x9cb   : > { %6627 = vmatprep.mubr.msk.bf16.mxu1 %vm7262_vm3, %v7261_v11 }
 0x9cd   : > { %6614 = vmatpush3.bf16.msra.mxu1 %v7024_v63  ;;  %6646 = vmatpush3.bf16.msra.mxu0 %v7037_v15 }
 0x9ce   : > { %6615 = vmatprep.subr.bf16.mxu1 %v7261_v11 }
 0x9d0   : > { %6648 = vmatmul.mubr.bf16.vlgmr.msra.gmra.mrb[144].mxu0 %v3933_v0 }
 0x9d1   : > { %6616 = vmatpush3.bf16.msra.mxu1 %v7026_v16 }
 0x9d2   : > { %6617 = vmatprep.subr.bf16.mxu1 %v7261_v11 }
 0x9d5   : > { %6618 = vmatpush3.bf16.msra.mxu1 %v7028_v10 }
 0x9d6   : > { %6619 = vmatprep.subr.bf16.mxu1 %v7261_v11 }
 0x9d9   : > { %6620 = vmatpush3.bf16.msra.mxu1 %v7030_v12 }
 0x9da   : > { %6621 = vmatprep.subr.bf16.mxu1 %v7261_v11 }
 0x9dd   : > { %6622 = vmatpush3.bf16.msra.mxu1 %v7032_v30 }
 0x9de   : > { %6623 = vmatprep.subr.bf16.mxu1 %v7261_v11 }
 0x9e1   : > { %6624 = vmatpush3.bf16.msra.mxu1 %v7034_v31 }
 0x9e2   : > { %6625 = vmatprep.subr.bf16.mxu1 %v7261_v11 }
 0x9e5   : > { %6626 = vmatpush3.bf16.msra.mxu1 %v7036_v18 }
 0x9e8   : > { %6628 = vmatmul.mubr.bf16.vlgmr.msra.gmra.mrb[140].mxu1 %v3932_v39 }
 0xa3b   : > { %v4050_v24 = vpop.f32.mrb[124].mxu1 }
 0xa3c   : > { %v6489_v29 = vpop.f32.mrb[125].mxu1 }
 0xa3d   : > { %v4053_v32 = vpop.f32.mrb[126].mxu1 }
 0xa3e   : > { %v6490_v34 = vpop.f32.mrb[127].mxu1 }
 0xa43   : > { %v4245_v35 = vpop.f32.mrb[132].mxu0 }
 0xa44   : > { %v6529_v36 = vpop.f32.mrb[133].mxu0 }
 0xa45   : > { %v4248_v20 = vpop.f32.mrb[134].mxu0 }
 0xa46   : > { %v6530_v21 = vpop.f32.mrb[135].mxu0 }
 0xa5b   : > { %v4139_v38 = vpop.f32.mrb[128].mxu1 }
 0xa5c   : > { %v4140_v41 = vadd.f32 %v4139_v38, %v4050_v24  ;;  %v6509_v42 = vpop.f32.mrb[129].mxu1 }
 0xa5d   : > { %v4142_v53 = vpop.f32.mrb[130].mxu1 }
 0xa5e   : > { %v4143_v54 = vadd.f32 %v4142_v53, %v4053_v32  ;;  %v4252_v33 = vadd.f32 %v4245_v35, %v4140_v41  ;;  %v6510_v11 = vpop.f32.mrb[131].mxu1 }
 0xa60   : > { %v4253_v44 = vadd.f32 %v4248_v20, %v4143_v54 }
 0xa63   : > { %v4461_v55 = vpop.f32.mrb[136].mxu0 }
 0xa64   : > { %v6569_v49 = vpop.f32.mrb[137].mxu0 }
 0xa65   : > { %v4464_v45 = vpop.f32.mrb[138].mxu0 }
 0xa66   : > { %v6570_v51 = vpop.f32.mrb[139].mxu0 }
 0xa7b   : > { %v4353_v52 = vpop.f32.mrb[132].mxu1 }
 0xa7c   : > { %v4360_v39 = vadd.f32 %v4353_v52, %v4252_v33  ;;  %v6549_v40 = vpop.f32.mrb[133].mxu1 }
 0xa7d   : > { %v4356_v43 = vpop.f32.mrb[134].mxu1 }
 0xa7e   : > { %v4361_v48 = vadd.f32 %v4356_v43, %v4253_v44  ;;  %v4468_v26 = vadd.f32 %v4461_v55, %v4360_v39  ;;  %v6550_v27 = vpop.f32.mrb[135].mxu1 }
 0xa80   : > { %v4469_v56 = vadd.f32 %v4464_v45, %v4361_v48 }
 0xa83   : > { %v4677_v60 = vpop.f32.mrb[140].mxu0 }
 0xa84   : > { %v6609_v61 = vpop.f32.mrb[141].mxu0 }
 0xa85   : > { %v4680_v0 = vpop.f32.mrb[142].mxu0 }
 0xa86   : > { %v6610_v2 = vpop.f32.mrb[143].mxu0 }
 0xa9b   : > { %v4569_v50 = vpop.f32.mrb[136].mxu1 }
 0xa9c   : > { %v4576_v57 = vadd.f32 %v4569_v50, %v4468_v26  ;;  %v6589_v59 = vpop.f32.mrb[137].mxu1 }
 0xa9d   : > { %v4572_v1 = vpop.f32.mrb[138].mxu1 }
 0xa9e   : > { %v4577_v4 = vadd.f32 %v4572_v1, %v4469_v56  ;;  %v4684_v8 = vadd.f32 %v4677_v60, %v4576_v57  ;;  %v6590_v3 = vpop.f32.mrb[139].mxu1 }
 0xaa0   : > { %v4685_v7 = vadd.f32 %v4680_v0, %v4577_v4 }
 0xaa3   : > { %v4893_v5 = vpop.f32.mrb[144].mxu0 }
 0xaa4   : > { %v6649_v58 = vpop.f32.mrb[145].mxu0 }
 0xaa5   : > { %v4896_v62 = vpop.f32.mrb[146].mxu0 }
 0xaa6   : > { %v6650_v9 = vpop.f32.mrb[147].mxu0 }
 0xabb   : > { %v4785_v13 = vpop.f32.mrb[140].mxu1 }
 0xabc   : > { %v4792_v14 = vadd.f32 %v4785_v13, %v4684_v8  ;;  %v6629_v17 = vpop.f32.mrb[141].mxu1 }
 0xabd   : > { %v4788_v19 = vpop.f32.mrb[142].mxu1 }
 0xabe   : > { %v4793_v23 = vadd.f32 %v4788_v19, %v4685_v7  ;;  %v4900_v25 = vadd.f32 %v4893_v5, %v4792_v14  ;;  %v6630_v6 = vpop.f32.mrb[143].mxu1 }
 0xac0   : > { %v4910_v63 = vadd.f32 %v5408_v22, %v4900_v25  ;;  %v4901_v15 = vadd.f32 %v4896_v62, %v4793_v23 }
 0xac2   : > { %v4914_v16 = vmul.f32 0.044715, %v4910_v63  ;;  %v4911_v10 = vadd.f32 %v5408_v22, %v4901_v15  ;;  %v4912_v20 = vmul.f32 0.5, %v4910_v63 }
 0xac4   : > { %v4916_v12 = vmul.f32 %v4914_v16, %v4910_v63  ;;  %v4915_v30 = vmul.f32 0.044715, %v4911_v10  ;;  %v4913_v42 = vmul.f32 0.5, %v4911_v10 }
 0xac6   : > { %v4918_v31 = vmul.f32 %v4916_v12, %v4910_v63  ;;  %v4917_v18 = vmul.f32 %v4915_v30, %v4911_v10 }
 0xac8   : > { %v4920_v24 = vadd.f32 %v4918_v31, %v4910_v63  ;;  %v4919_v29 = vmul.f32 %v4917_v18, %v4911_v10 }
 0xaca   : > { %v4922_v32 = vmul.f32 0.7978846, %v4920_v24  ;;  %v4921_v34 = vadd.f32 %v4919_v29, %v4911_v10 }
 0xacc   : > { %7050 = vtanh.f32 %v4922_v32  ;;  %v4923_v35 = vmul.f32 0.7978846, %v4921_v34 }
 0xace   : > { %7052 = vtanh.f32 %v4923_v35 }
 0xad6   : > { %v7051_v36 = vpop.eup %7050 }
 0xad7   : > { %v4926_v21 = vadd.f32 1.0, %v7051_v36 }
 0xad8   : > { %v7053_v38 = vpop.eup %7052 }
 0xad9   : > { %v4928_v41 = vmul.f32 %v4926_v21, %v4912_v20  ;;  %v4927_v53 = vadd.f32 1.0, %v7053_v38 }
 0xadb   : > { %v4930_v54 = vadd.f32 %v4928_v41, %v7917_v46  ;;  %v4929_v33 = vmul.f32 %v4927_v53, %v4913_v42 }
 0xadd   : > { %v4931_v11 = vadd.f32 %v4929_v33, %v7920_v47  ;;  %v4932_v44 = vadd.f32 %v4930_v54, %v8152_v37 }
 0xadf   : > { %v4933_v55 = vadd.f32 %v4931_v11, %v8155_v28  ;;  %v4934_v49 = vmul.f32 0.5, %v4932_v44 }
 0xae1   : > { %v4935_v46 = vmul.f32 0.5, %v4933_v55  ;;  %4936 = vst [vmem:[%s300_s12] sm:$0xff] %v4934_v49 }
 0xae3   : > { %4937 = vst [vmem:[%s300_s12 + $0x8] sm:$0xff] %v4935_v46 }
 0xae4   : > { %7188 = shalt.err (!%p7185_p1)
}
 0xae5   : > { %s7189_s14 = scalar_lea.hbm %s8337_s15, 256  ;;  %s7193_s19 = scalar_lea.hbm %s8388_s6, 512 }
 0xae6   : > { %p7190_p0 = scmp.ne.s32.totalorder %s8337_s15, %s7189_s14  ;;  %p7194_p9 = scmp.lt.u32.totalorder %s8337_s15, %s8388_s6 }
 0xae7   : > { %p7195_p12 = scmp.lt.u32.totalorder %s7193_s19, %s7189_s14  ;;  %p7197_p2 = scmp.lt.u32.totalorder %s7189_s14, %s8337_s15 }
 0xae8   : > { %p7191_p6 = pnand %p7190_p0, %p8408_p3 }
 0xae9   : > { %p7196_p10 = por %p7195_p12, %p7194_p9 }
 0xaea   : > { %p7192_p5 = pneg %p7191_p6 }
 0xaeb   : > { %p7198_p4 = por %p7197_p2, %p7196_p10 }
 0xaed   : > { %p7199_p7 = pnand %p7198_p4, %p7192_p5 }
 0xaef   : > { %7202 = shalt.err (!%p7199_p7)
}
 0xaf0   : > { %s7264_s29 = smov 128   ;;  %s7265_s10 = smov 8  }
 0xaf1   : > { %6667 = dma.vmem_to_hbm [thread:$0]  (%p8408_p3), %s8339_s13, 256, %s8337_s15, %s8341_s17, %s7264_s29, %s7264_s29, %s7265_s10  }
 0xaf2 PF: > { %p6694_p8 = scmp.ge.s32.totalorder %s7249_s24, 2  ;;  %s4967_s12 = sand.u32 1, %s7237_s21  }
 0xaf3   : > { %p8409_p11 = scmp.ne.s32.totalorder %s8395_s8, 0  ;;  %s4968_s16 = scalar_lea.sflag [#allocation4], %s4967_s12 }
 0xaf5   : > { %p6683_p13 = pnand %p6694_p8, %p8409_p11 }
 0xaf7   : > { %7232 = dma.done.wait (!%p6683_p13), %s4968_s16, 256  }
 0xaf8   : > { %7234 = vsyncadd (!%p6683_p13), %s4968_s16, 4294967040  ;;  %p19_p1 = scmp.ge.s32.totalorder %s7326_s27, 4   ;;  %s8410_s21 = smov %s7241_s22 }
 0xaf9   : > { %s8411_s22 = smov %s7245_s23  ;;  %s8412_s23 = smov %s7337_s30 }
 0xafa   : > { %s8413_s24 = smov %s7326_s27  ;;  %21 = sbr.rel (!%p19_p1) target bundleno = 9 (0x9), region = 134 }
 0xb01   :  { %4973 = vsyncpa [#allocation3], 1 }
 0xb02   :  { %4975 = vsyncpa [#allocation3 + $0x1], 1 }
 0xb03   :  { %4976 = vsyncpa [#allocation6], 1 }
 0xb04   :  { %4977 = vsyncpa [#allocation9], 1 }
 0xb05   :  { %4978 = vsyncpa [#allocation4], 1 }
 0xb06   :  { %4980 = vsyncpa [#allocation4 + $0x1], 1 }

</bundles_post_ra>
